<compile_context>
chip_gen: v5e
topology: v5e:2x2
jax: 0.10.0
libtpu: 0.0.40
codegen_flags: <defaults>
</compile_context>

<pallas_src>
import functools

import jax
import jax.numpy as jnp
from jax.experimental import pallas as pl
from jax.experimental.pallas import tpu as pltpu


def _round_up(n, m):
    return ((n + m - 1) // m) * m


# -----------------------------------------------------------------------------
# Kernel
# -----------------------------------------------------------------------------
def _vae_kernel(
    # per-batch-tile inputs
    x_ref, eps_ref,
    # packed [gamma | beta | b1 | b2 | b_head | bd1 | bd2 | bd3] slab, f32 [8, W]
    bias_ref,
    # bf16 weight matrices (wd1 zero-padded to 2L input rows)
    w1_ref, w2_ref, wh_ref, wd1_ref, wd2_ref, wd3_ref,
    # outputs
    xhat_ref, mulv_ref,
    *, latent_dim, feature_dim, hidden,
):
    f32 = jnp.float32
    mxu = w1_ref.dtype                 # bf16 MXU inputs, f32 accumulation
    L, F, H = latent_dim, feature_dim, hidden
    L2 = 2 * L

    x = x_ref[...].astype(f32)

    # Static slices of the packed bias slab (free; no extra DMAs).
    gamma = bias_ref[0:1, :F]
    beta = bias_ref[1:2, :F]
    b1 = bias_ref[2:3, :H]
    b2 = bias_ref[3:4, :H]
    bh = bias_ref[4:5, :L2]
    bd1 = bias_ref[5:6, :H]
    bd2 = bias_ref[6:7, :H]
    bd3 = bias_ref[7:8, :F]

    # ---- LayerNorm(feature_dim), eps=1e-5, biased variance (PyTorch semantics) ----
    # Entirely f32 on the VPU/EUP (v5e has no bf16 elementwise path).
    mean = jnp.mean(x, axis=-1, keepdims=True)
    var = jnp.mean((x - mean) ** 2, axis=-1, keepdims=True)
    xn = (x - mean) * jax.lax.rsqrt(var + 1e-5) * gamma + beta

    def dense(a, w_ref, b, relu=False):
        y = jnp.dot(a.astype(mxu), w_ref[...], preferred_element_type=f32) + b
        return jnp.maximum(y, 0.0) if relu else y

    # ---- Encoder MLP: Linear->ReLU->Linear->ReLU ----
    h = dense(xn, w1_ref, b1, relu=True)
    h = dense(h, w2_ref, b2, relu=True)

    # ---- Fused [mu | log_var] head: one lane-dense 2L = 128-wide matmul ----
    head = dense(h, wh_ref, bh)                        # (tile_b, 2L) f32
    lane = jax.lax.broadcasted_iota(jnp.int32, head.shape, dimension=1)
    is_lv = lane >= L
    mulv = jnp.where(is_lv, jnp.clip(head, -10.0, 10.0), head)   # clamp log_var only
    mulv_ref[...] = mulv.astype(mulv_ref.dtype)        # single lane-dense store

    # ---- Reparameterize (packed, lane-dense): z = mu + exp(0.5*log_var) * eps ----
    # XLU roll brings log_var into lanes [0, L); eps lanes [L, 2L) are zero and
    # wd1 rows [L, 2L) are zero, so the upper half of z never contributes.
    # The clip MUST stay: exp(0.5 * mu) on the rolled mu half could overflow and
    # inf * 0 would poison the wd1 contraction.
    lv_first = pltpu.roll(mulv, shift=L, axis=1)       # [log_var | mu]
    std = jnp.exp(0.5 * jnp.clip(lv_first, -10.0, 10.0))
    z = mulv + std * eps_ref[...].astype(f32)

    # ---- Decoder MLP: Linear->ReLU->Linear->ReLU->Linear ----
    d = dense(z, wd1_ref, bd1, relu=True)
    d = dense(d, wd2_ref, bd2, relu=True)
    x_hat = dense(d, wd3_ref, bd3)

    xhat_ref[...] = x_hat.astype(xhat_ref.dtype)


# -----------------------------------------------------------------------------
# One-time host-side parameter packing (hoisted out of the forward pass)
# -----------------------------------------------------------------------------
def pack_params(params, weight_dtype=jnp.bfloat16):
    """Pack raw f32 parameters into the kernel-ready form. Call once per update."""
    F = params["gamma"].shape[0]
    H = params["w1"].shape[1]
    L = params["wmu"].shape[1]
    L2 = 2 * L
    W = _round_up(max(F, H, L2), 128)

    def row(v):
        v = v.astype(jnp.float32).reshape(-1)
        return jnp.pad(v, (0, W - v.shape[0]))

    bias_slab = jnp.stack([
        row(params["gamma"]), row(params["beta"]),
        row(params["b1"]), row(params["b2"]),
        row(jnp.concatenate([params["bmu"], params["blv"]])),
        row(params["bd1"]), row(params["bd2"]), row(params["bd3"]),
    ], axis=0)                                                        # [8, W] f32

    def w(v):
        return v.astype(weight_dtype)

    w_head = w(jnp.concatenate([params["wmu"], params["wlv"]], axis=1))      # [H, 2L]
    wd1_pad = w(jnp.concatenate(
        [params["wd1"], jnp.zeros((L, H), params["wd1"].dtype)], axis=0))    # [2L, H]

    return dict(
        bias=bias_slab,
        w1=w(params["w1"]), w2=w(params["w2"]), wh=w_head,
        wd1=wd1_pad, wd2=w(params["wd2"]), wd3=w(params["wd3"]),
    )


# -----------------------------------------------------------------------------
# Forward wrapper
# -----------------------------------------------------------------------------
def memory_vae_forward(x, eps, packed, *, tile_b=256, single_buffer_weights=True):
    """Full MemoryVAE forward in one Pallas kernel, tiled over batch.

    `packed` must come from pack_params(). Returns (x_hat, mu, log_var)."""
    B, F = x.shape
    H = packed["w1"].shape[1]
    L2 = packed["wh"].shape[1]
    L = L2 // 2
    f32 = jnp.float32

    # Batch tile selection: fill the 256-tall MXU (v6e/v7x); keep >= 2 tiles when
    # the batch allows so v7x's two TensorCores both get work.
    if B >= 2 * tile_b:
        pass                                           # grid >= 2 already
    elif B > tile_b:
        tile_b = _round_up(pl.cdiv(B, 2), 8)           # exactly 2 tiles
    else:
        tile_b = max(8, _round_up(B, 8))               # single tile
    Bp = _round_up(B, tile_b)
    grid = (Bp // tile_b,)

    # Pad batch; eps stored bf16 (halves its streaming DMA), lanes padded to 2L.
    xp = jnp.pad(x, ((0, Bp - B), (0, 0)))
    eps_p = jnp.pad(eps.astype(jnp.bfloat16), ((0, Bp - B), (0, L)))

    weight_args = (packed["bias"], packed["w1"], packed["w2"], packed["wh"],
                   packed["wd1"], packed["wd2"], packed["wd3"])

    def batch_spec(ncols):
        return pl.BlockSpec((tile_b, ncols), lambda i: (i, 0))

    def weight_spec(shape, single_buffer):
        if single_buffer:
            # Grid-invariant blocks -> no need for double buffering.
            return pl.BlockSpec(shape, lambda i: (0, 0),
                                pipeline_mode=pl.Buffered(1))
        return pl.BlockSpec(shape, lambda i: (0, 0))

    # Advisory cost estimate for XLA's scheduler.
    flops = 2 * Bp * (F * H + H * H + H * L2 + L2 * H + H * H + H * F)
    transcendentals = Bp * (L2 + 1)                    # exp lanes + rsqrt
    bytes_weights = sum(int(a.size) * a.dtype.itemsize for a in weight_args)
    bytes_accessed = (int(xp.size) * 4 + int(eps_p.size) * 2
                      + bytes_weights + (Bp * F + Bp * L2) * 4)
    cost = pl.CostEstimate(flops=flops, transcendentals=transcendentals,
                           bytes_accessed=bytes_accessed)

    compiler_params = pltpu.CompilerParams(
        dimension_semantics=("parallel",),             # batch grid shards across TCs
    )

    out_shape = (
        jax.ShapeDtypeStruct((Bp, F), x.dtype),        # x_hat
        jax.ShapeDtypeStruct((Bp, L2), f32),           # packed [mu | log_var]
    )
    out_specs = (batch_spec(F), batch_spec(L2))

    kernel = functools.partial(_vae_kernel, latent_dim=L, feature_dim=F, hidden=H)

    def run(single_buffer):
        in_specs = [batch_spec(F), batch_spec(L2)] + [
            weight_spec(a.shape, single_buffer) for a in weight_args
        ]
        return pl.pallas_call(
            kernel,
            grid=grid,
            in_specs=in_specs,
            out_specs=out_specs,
            out_shape=out_shape,
            compiler_params=compiler_params,
            cost_estimate=cost,
        )(xp, eps_p, *weight_args)

    if single_buffer_weights:
        try:
            x_hat_p, mulv_p = run(True)
        except (pltpu.LoweringException, NotImplementedError, ValueError, TypeError):
            # Narrow fallback: only pipeline_mode / lowering rejections retry with
            # default (double) buffering; genuine errors re-surface from run(False).
            x_hat_p, mulv_p = run(False)
    else:
        x_hat_p, mulv_p = run(False)

    x_hat = x_hat_p[:B]
    mu = mulv_p[:B, :L].astype(x.dtype)
    log_var = mulv_p[:B, L:].astype(x.dtype)
    return x_hat, mu, log_var


# -----------------------------------------------------------------------------
# Parameter init + pure-JAX reference (same precision policy as the kernel)
# -----------------------------------------------------------------------------
def init_params(key, feature_dim, latent_dim, hidden):
    ks = jax.random.split(key, 8)

    def lin(k, fan_in, fan_out):
        scale = 1.0 / jnp.sqrt(fan_in)
        return jax.random.uniform(k, (fan_in, fan_out), jnp.float32, -scale, scale)

    return dict(
        gamma=jnp.ones((feature_dim,), jnp.float32),
        beta=jnp.zeros((feature_dim,), jnp.float32),
        w1=lin(ks[0], feature_dim, hidden), b1=jnp.zeros((hidden,), jnp.float32),
        w2=lin(ks[1], hidden, hidden), b2=jnp.zeros((hidden,), jnp.float32),
        wmu=lin(ks[2], hidden, latent_dim), bmu=jnp.zeros((latent_dim,), jnp.float32),
        wlv=lin(ks[3], hidden, latent_dim), blv=jnp.zeros((latent_dim,), jnp.float32),
        wd1=lin(ks[4], latent_dim, hidden), bd1=jnp.zeros((hidden,), jnp.float32),
        wd2=lin(ks[5], hidden, hidden), bd2=jnp.zeros((hidden,), jnp.float32),
        wd3=lin(ks[6], hidden, feature_dim), bd3=jnp.zeros((feature_dim,), jnp.float32),
    )


def reference_forward(x, eps, p, matmul_dtype=jnp.bfloat16):
    """Pure-JAX reference with the same bf16-matmul / bf16-eps-storage policy."""
    f32 = jnp.float32
    eps = eps.astype(jnp.bfloat16).astype(f32)         # kernel stores eps as bf16

    def mm(a, w_, b_):
        return jnp.dot(a.astype(matmul_dtype), w_.astype(matmul_dtype),
                       preferred_element_type=f32) + b_

    mean = jnp.mean(x, axis=-1, keepdims=True)
    var = jnp.mean((x - mean) ** 2, axis=-1, keepdims=True)
    xn = (x - mean) * jax.lax.rsqrt(var + 1e-5) * p["gamma"] + p["beta"]
    h = jax.nn.relu(mm(xn, p["w1"], p["b1"]))
    h = jax.nn.relu(mm(h, p["w2"], p["b2"]))
    mu = mm(h, p["wmu"], p["bmu"])
    lv = jnp.clip(mm(h, p["wlv"], p["blv"]), -10.0, 10.0)
    z = mu + jnp.exp(0.5 * lv) * eps
    d = jax.nn.relu(mm(z, p["wd1"], p["bd1"]))
    d = jax.nn.relu(mm(d, p["wd2"], p["bd2"]))
    x_hat = mm(d, p["wd3"], p["bd3"])
    return x_hat, mu, lv


if __name__ == "__main__":
    # Module defaults: latent_dim=64, hidden=256; feature_dim=128.
    # B=512 with tile_b=256 -> grid=(2,), so both v7x TensorCores get a tile.
    B, FEAT, LATENT, HIDDEN = 512, 128, 64, 256

    key = jax.random.PRNGKey(0)
    k_x, k_eps, k_p = jax.random.split(key, 3)

    x = jax.random.normal(k_x, (B, FEAT), jnp.float32)
    # Noise for reparameterize (torch.randn_like equivalent), passed in explicitly.
    eps = jax.random.normal(k_eps, (B, LATENT), jnp.float32)
    params = init_params(k_p, FEAT, LATENT, HIDDEN)

    # One-time packing (hoisted out of the per-call forward path).
    packed = pack_params(params)

    x_hat, mu, log_var = memory_vae_forward(x, eps, packed, tile_b=256)
    jax.block_until_ready((x_hat, mu, log_var))

    # Check against a pure-JAX reference using the same bf16-matmul / f32-accum
    # precision policy (mu/log_var/x_hat are bf16-matmul-precision, not f32-exact).
    rx, rmu, rlv = reference_forward(x, eps, params)
    assert jnp.allclose(x_hat, rx, atol=2e-2, rtol=2e-2), \
        float(jnp.max(jnp.abs(x_hat - rx)))
    assert jnp.allclose(mu, rmu, atol=2e-2, rtol=2e-2), \
        float(jnp.max(jnp.abs(mu - rmu)))
    assert jnp.allclose(log_var, rlv, atol=2e-2, rtol=2e-2), \
        float(jnp.max(jnp.abs(log_var - rlv)))

    print("KERNEL_OK")
</pallas_src>

<mosaic_0001>
module attributes {stable_mosaic.version = 11 : i64} {
  func.func @_vae_kernel(%arg0: i32, %arg1: memref<256x128xf32, #tpu.memory_space<vmem>>, %arg2: memref<256x128xbf16, #tpu.memory_space<vmem>>, %arg3: memref<8x256xf32, #tpu.memory_space<vmem>>, %arg4: memref<128x256xbf16, #tpu.memory_space<vmem>>, %arg5: memref<256x256xbf16, #tpu.memory_space<vmem>>, %arg6: memref<256x128xbf16, #tpu.memory_space<vmem>>, %arg7: memref<128x256xbf16, #tpu.memory_space<vmem>>, %arg8: memref<256x256xbf16, #tpu.memory_space<vmem>>, %arg9: memref<256x128xbf16, #tpu.memory_space<vmem>>, %arg10: memref<256x128xf32, #tpu.memory_space<vmem>>, %arg11: memref<256x128xf32, #tpu.memory_space<vmem>>) attributes {dimension_semantics = [#tpu.dimension_semantics<parallel>], iteration_bounds = array<i64: 2>, scalar_prefetch = 0 : i64, scratch_operands = 0 : i64, tpu.core_type = #tpu.core_type<tc>, window_params = [{transform_indices = @transform_0, window_bounds = array<i64: 256, 128>}, {transform_indices = @transform_1, window_bounds = array<i64: 256, 128>}, {pipeline_mode = #tpu.pipeline_mode<synchronous>, transform_indices = @transform_2, window_bounds = array<i64: 8, 256>}, {pipeline_mode = #tpu.pipeline_mode<synchronous>, transform_indices = @transform_3, window_bounds = array<i64: 128, 256>}, {pipeline_mode = #tpu.pipeline_mode<synchronous>, transform_indices = @transform_4, window_bounds = array<i64: 256, 256>}, {pipeline_mode = #tpu.pipeline_mode<synchronous>, transform_indices = @transform_5, window_bounds = array<i64: 256, 128>}, {pipeline_mode = #tpu.pipeline_mode<synchronous>, transform_indices = @transform_6, window_bounds = array<i64: 128, 256>}, {pipeline_mode = #tpu.pipeline_mode<synchronous>, transform_indices = @transform_7, window_bounds = array<i64: 256, 256>}, {pipeline_mode = #tpu.pipeline_mode<synchronous>, transform_indices = @transform_8, window_bounds = array<i64: 256, 128>}, {transform_indices = @transform_9, window_bounds = array<i64: 256, 128>}, {transform_indices = @transform_10, window_bounds = array<i64: 256, 128>}]} {
    %c0 = arith.constant 0 : index
    %c0_0 = arith.constant 0 : index
    %0 = vector.load %arg1[%c0, %c0_0] : memref<256x128xf32, #tpu.memory_space<vmem>>, vector<256x128xf32>
    %c0_1 = arith.constant 0 : index
    %c0_2 = arith.constant 0 : index
    %1 = vector.load %arg3[%c0_1, %c0_2] : memref<8x256xf32, #tpu.memory_space<vmem>>, vector<1x128xf32>
    %c1 = arith.constant 1 : index
    %c0_3 = arith.constant 0 : index
    %2 = vector.load %arg3[%c1, %c0_3] : memref<8x256xf32, #tpu.memory_space<vmem>>, vector<1x128xf32>
    %c2 = arith.constant 2 : index
    %c0_4 = arith.constant 0 : index
    %3 = vector.load %arg3[%c2, %c0_4] : memref<8x256xf32, #tpu.memory_space<vmem>>, vector<1x256xf32>
    %c3 = arith.constant 3 : index
    %c0_5 = arith.constant 0 : index
    %4 = vector.load %arg3[%c3, %c0_5] : memref<8x256xf32, #tpu.memory_space<vmem>>, vector<1x256xf32>
    %c4 = arith.constant 4 : index
    %c0_6 = arith.constant 0 : index
    %5 = vector.load %arg3[%c4, %c0_6] : memref<8x256xf32, #tpu.memory_space<vmem>>, vector<1x128xf32>
    %c5 = arith.constant 5 : index
    %c0_7 = arith.constant 0 : index
    %6 = vector.load %arg3[%c5, %c0_7] : memref<8x256xf32, #tpu.memory_space<vmem>>, vector<1x256xf32>
    %c6 = arith.constant 6 : index
    %c0_8 = arith.constant 0 : index
    %7 = vector.load %arg3[%c6, %c0_8] : memref<8x256xf32, #tpu.memory_space<vmem>>, vector<1x256xf32>
    %c7 = arith.constant 7 : index
    %c0_9 = arith.constant 0 : index
    %8 = vector.load %arg3[%c7, %c0_9] : memref<8x256xf32, #tpu.memory_space<vmem>>, vector<1x128xf32>
    %cst = arith.constant dense<0.000000e+00> : vector<256xf32>
    %9 = vector.multi_reduction <add>, %0, %cst [1] : vector<256x128xf32> to vector<256xf32>
    %10 = vector.shape_cast %9 : vector<256xf32> to vector<256x1xf32>
    %cst_10 = arith.constant 1.280000e+02 : f32
    %11 = vector.broadcast %cst_10 : f32 to vector<256x1xf32>
    %12 = arith.divf %10, %11 : vector<256x1xf32>
    %13 = vector.broadcast %12 : vector<256x1xf32> to vector<256x128xf32>
    %14 = arith.subf %0, %13 : vector<256x128xf32>
    %15 = arith.mulf %14, %14 : vector<256x128xf32>
    %cst_11 = arith.constant dense<0.000000e+00> : vector<256xf32>
    %16 = vector.multi_reduction <add>, %15, %cst_11 [1] : vector<256x128xf32> to vector<256xf32>
    %17 = vector.shape_cast %16 : vector<256xf32> to vector<256x1xf32>
    %cst_12 = arith.constant 1.280000e+02 : f32
    %18 = vector.broadcast %cst_12 : f32 to vector<256x1xf32>
    %19 = arith.divf %17, %18 : vector<256x1xf32>
    %20 = vector.broadcast %12 : vector<256x1xf32> to vector<256x128xf32>
    %21 = arith.subf %0, %20 : vector<256x128xf32>
    %cst_13 = arith.constant 9.99999974E-6 : f32
    %22 = vector.broadcast %cst_13 : f32 to vector<256x1xf32>
    %23 = arith.addf %19, %22 : vector<256x1xf32>
    %24 = math.rsqrt %23 : vector<256x1xf32>
    %25 = vector.broadcast %24 : vector<256x1xf32> to vector<256x128xf32>
    %26 = arith.mulf %21, %25 : vector<256x128xf32>
    %27 = vector.broadcast %1 : vector<1x128xf32> to vector<256x128xf32>
    %28 = arith.mulf %26, %27 : vector<256x128xf32>
    %29 = vector.broadcast %2 : vector<1x128xf32> to vector<256x128xf32>
    %30 = arith.addf %28, %29 : vector<256x128xf32>
    %31 = arith.truncf %30 : vector<256x128xf32> to vector<256x128xbf16>
    %c0_14 = arith.constant 0 : index
    %c0_15 = arith.constant 0 : index
    %32 = vector.load %arg4[%c0_14, %c0_15] : memref<128x256xbf16, #tpu.memory_space<vmem>>, vector<128x256xbf16>
    %cst_16 = arith.constant dense<0.000000e+00> : vector<256x256xf32>
    %33 = tpu.matmul %31, %32, %cst_16 {dimension_numbers = #tpu.dot_dimension_numbers<[1], [0], [0], [1], [0, 0, 1, 1], [], []>} : vector<256x128xbf16>, vector<128x256xbf16>, vector<256x256xf32> -> vector<256x256xf32>
    %34 = vector.broadcast %3 : vector<1x256xf32> to vector<256x256xf32>
    %35 = arith.addf %33, %34 : vector<256x256xf32>
    %cst_17 = arith.constant 0.000000e+00 : f32
    %36 = vector.broadcast %cst_17 : f32 to vector<256x256xf32>
    %37 = arith.maximumf %35, %36 : vector<256x256xf32>
    %38 = arith.truncf %37 : vector<256x256xf32> to vector<256x256xbf16>
    %c0_18 = arith.constant 0 : index
    %c0_19 = arith.constant 0 : index
    %39 = vector.load %arg5[%c0_18, %c0_19] : memref<256x256xbf16, #tpu.memory_space<vmem>>, vector<256x256xbf16>
    %cst_20 = arith.constant dense<0.000000e+00> : vector<256x256xf32>
    %40 = tpu.matmul %38, %39, %cst_20 {dimension_numbers = #tpu.dot_dimension_numbers<[1], [0], [0], [1], [0, 0, 1, 1], [], []>} : vector<256x256xbf16>, vector<256x256xbf16>, vector<256x256xf32> -> vector<256x256xf32>
    %41 = vector.broadcast %4 : vector<1x256xf32> to vector<256x256xf32>
    %42 = arith.addf %40, %41 : vector<256x256xf32>
    %cst_21 = arith.constant 0.000000e+00 : f32
    %43 = vector.broadcast %cst_21 : f32 to vector<256x256xf32>
    %44 = arith.maximumf %42, %43 : vector<256x256xf32>
    %45 = arith.truncf %44 : vector<256x256xf32> to vector<256x256xbf16>
    %c0_22 = arith.constant 0 : index
    %c0_23 = arith.constant 0 : index
    %46 = vector.load %arg6[%c0_22, %c0_23] : memref<256x128xbf16, #tpu.memory_space<vmem>>, vector<256x128xbf16>
    %cst_24 = arith.constant dense<0.000000e+00> : vector<256x128xf32>
    %47 = tpu.matmul %45, %46, %cst_24 {dimension_numbers = #tpu.dot_dimension_numbers<[1], [0], [0], [1], [0, 0, 1, 1], [], []>} : vector<256x256xbf16>, vector<256x128xbf16>, vector<256x128xf32> -> vector<256x128xf32>
    %48 = vector.broadcast %5 : vector<1x128xf32> to vector<256x128xf32>
    %49 = arith.addf %47, %48 : vector<256x128xf32>
    %50 = tpu.iota {dimensions = array<i32: 1>} : vector<256x128xi32>
    %c64_i32 = arith.constant 64 : i32
    %51 = vector.broadcast %c64_i32 : i32 to vector<256x128xi32>
    %52 = arith.cmpi sge, %50, %51 : vector<256x128xi32>
    %cst_25 = arith.constant -1.000000e+01 : f32
    %cst_26 = arith.constant 1.000000e+01 : f32
    %53 = vector.broadcast %cst_25 : f32 to vector<256x128xf32>
    %54 = arith.maximumf %53, %49 : vector<256x128xf32>
    %55 = vector.broadcast %cst_26 : f32 to vector<256x128xf32>
    %56 = arith.minimumf %55, %54 : vector<256x128xf32>
    %57 = arith.select %52, %56, %49 : vector<256x128xi1>, vector<256x128xf32>
    %c0_27 = arith.constant 0 : index
    %c0_28 = arith.constant 0 : index
    %58 = vector.load %arg11[%c0_27, %c0_28] : memref<256x128xf32, #tpu.memory_space<vmem>>, vector<256x128xf32>
    tpu.vector_store %arg11[%c0_27, %c0_28], %57 {strides = array<i32>} : memref<256x128xf32, #tpu.memory_space<vmem>>, vector<256x128xf32>,
    %c64_i32_29 = arith.constant 64 : i32
    %59 = tpu.dynamic_rotate %57 by %c64_i32_29 dim 1 : vector<256x128xf32>, i32 -> vector<256x128xf32>
    %cst_30 = arith.constant -1.000000e+01 : f32
    %cst_31 = arith.constant 1.000000e+01 : f32
    %60 = vector.broadcast %cst_30 : f32 to vector<256x128xf32>
    %61 = arith.maximumf %60, %59 : vector<256x128xf32>
    %62 = vector.broadcast %cst_31 : f32 to vector<256x128xf32>
    %63 = arith.minimumf %62, %61 : vector<256x128xf32>
    %cst_32 = arith.constant 5.000000e-01 : f32
    %64 = vector.broadcast %cst_32 : f32 to vector<256x128xf32>
    %65 = arith.mulf %64, %63 : vector<256x128xf32>
    %66 = math.exp %65 : vector<256x128xf32>
    %c0_33 = arith.constant 0 : index
    %c0_34 = arith.constant 0 : index
    %67 = vector.load %arg2[%c0_33, %c0_34] : memref<256x128xbf16, #tpu.memory_space<vmem>>, vector<256x128xbf16>
    %68 = arith.extf %67 : vector<256x128xbf16> to vector<256x128xf32>
    %69 = arith.mulf %66, %68 : vector<256x128xf32>
    %70 = arith.addf %57, %69 : vector<256x128xf32>
    %71 = arith.truncf %70 : vector<256x128xf32> to vector<256x128xbf16>
    %c0_35 = arith.constant 0 : index
    %c0_36 = arith.constant 0 : index
    %72 = vector.load %arg7[%c0_35, %c0_36] : memref<128x256xbf16, #tpu.memory_space<vmem>>, vector<128x256xbf16>
    %cst_37 = arith.constant dense<0.000000e+00> : vector<256x256xf32>
    %73 = tpu.matmul %71, %72, %cst_37 {dimension_numbers = #tpu.dot_dimension_numbers<[1], [0], [0], [1], [0, 0, 1, 1], [], []>} : vector<256x128xbf16>, vector<128x256xbf16>, vector<256x256xf32> -> vector<256x256xf32>
    %74 = vector.broadcast %6 : vector<1x256xf32> to vector<256x256xf32>
    %75 = arith.addf %73, %74 : vector<256x256xf32>
    %cst_38 = arith.constant 0.000000e+00 : f32
    %76 = vector.broadcast %cst_38 : f32 to vector<256x256xf32>
    %77 = arith.maximumf %75, %76 : vector<256x256xf32>
    %78 = arith.truncf %77 : vector<256x256xf32> to vector<256x256xbf16>
    %c0_39 = arith.constant 0 : index
    %c0_40 = arith.constant 0 : index
    %79 = vector.load %arg8[%c0_39, %c0_40] : memref<256x256xbf16, #tpu.memory_space<vmem>>, vector<256x256xbf16>
    %cst_41 = arith.constant dense<0.000000e+00> : vector<256x256xf32>
    %80 = tpu.matmul %78, %79, %cst_41 {dimension_numbers = #tpu.dot_dimension_numbers<[1], [0], [0], [1], [0, 0, 1, 1], [], []>} : vector<256x256xbf16>, vector<256x256xbf16>, vector<256x256xf32> -> vector<256x256xf32>
    %81 = vector.broadcast %7 : vector<1x256xf32> to vector<256x256xf32>
    %82 = arith.addf %80, %81 : vector<256x256xf32>
    %cst_42 = arith.constant 0.000000e+00 : f32
    %83 = vector.broadcast %cst_42 : f32 to vector<256x256xf32>
    %84 = arith.maximumf %82, %83 : vector<256x256xf32>
    %85 = arith.truncf %84 : vector<256x256xf32> to vector<256x256xbf16>
    %c0_43 = arith.constant 0 : index
    %c0_44 = arith.constant 0 : index
    %86 = vector.load %arg9[%c0_43, %c0_44] : memref<256x128xbf16, #tpu.memory_space<vmem>>, vector<256x128xbf16>
    %cst_45 = arith.constant dense<0.000000e+00> : vector<256x128xf32>
    %87 = tpu.matmul %85, %86, %cst_45 {dimension_numbers = #tpu.dot_dimension_numbers<[1], [0], [0], [1], [0, 0, 1, 1], [], []>} : vector<256x256xbf16>, vector<256x128xbf16>, vector<256x128xf32> -> vector<256x128xf32>
    %88 = vector.broadcast %8 : vector<1x128xf32> to vector<256x128xf32>
    %89 = arith.addf %87, %88 : vector<256x128xf32>
    %c0_46 = arith.constant 0 : index
    %c0_47 = arith.constant 0 : index
    %90 = vector.load %arg10[%c0_46, %c0_47] : memref<256x128xf32, #tpu.memory_space<vmem>>, vector<256x128xf32>
    tpu.vector_store %arg10[%c0_46, %c0_47], %89 {strides = array<i32>} : memref<256x128xf32, #tpu.memory_space<vmem>>, vector<256x128xf32>,
    return
  }
  func.func @transform_0(%arg0: i32) -> (i32, i32) {
    %c0_i32 = arith.constant 0 : i32
    %c0_i32_0 = arith.constant 0 : i32
    return %arg0, %c0_i32 : i32, i32
  }
  func.func @transform_1(%arg0: i32) -> (i32, i32) {
    %c0_i32 = arith.constant 0 : i32
    %c0_i32_0 = arith.constant 0 : i32
    return %arg0, %c0_i32 : i32, i32
  }
  func.func @transform_2(%arg0: i32) -> (i32, i32) {
    %c0_i32 = arith.constant 0 : i32
    %c0_i32_0 = arith.constant 0 : i32
    %c0_i32_1 = arith.constant 0 : i32
    return %c0_i32, %c0_i32_0 : i32, i32
  }
  func.func @transform_3(%arg0: i32) -> (i32, i32) {
    %c0_i32 = arith.constant 0 : i32
    %c0_i32_0 = arith.constant 0 : i32
    %c0_i32_1 = arith.constant 0 : i32
    return %c0_i32, %c0_i32_0 : i32, i32
  }
  func.func @transform_4(%arg0: i32) -> (i32, i32) {
    %c0_i32 = arith.constant 0 : i32
    %c0_i32_0 = arith.constant 0 : i32
    %c0_i32_1 = arith.constant 0 : i32
    return %c0_i32, %c0_i32_0 : i32, i32
  }
  func.func @transform_5(%arg0: i32) -> (i32, i32) {
    %c0_i32 = arith.constant 0 : i32
    %c0_i32_0 = arith.constant 0 : i32
    %c0_i32_1 = arith.constant 0 : i32
    return %c0_i32, %c0_i32_0 : i32, i32
  }
  func.func @transform_6(%arg0: i32) -> (i32, i32) {
    %c0_i32 = arith.constant 0 : i32
    %c0_i32_0 = arith.constant 0 : i32
    %c0_i32_1 = arith.constant 0 : i32
    return %c0_i32, %c0_i32_0 : i32, i32
  }
  func.func @transform_7(%arg0: i32) -> (i32, i32) {
    %c0_i32 = arith.constant 0 : i32
    %c0_i32_0 = arith.constant 0 : i32
    %c0_i32_1 = arith.constant 0 : i32
    return %c0_i32, %c0_i32_0 : i32, i32
  }
  func.func @transform_8(%arg0: i32) -> (i32, i32) {
    %c0_i32 = arith.constant 0 : i32
    %c0_i32_0 = arith.constant 0 : i32
    %c0_i32_1 = arith.constant 0 : i32
    return %c0_i32, %c0_i32_0 : i32, i32
  }
  func.func @transform_9(%arg0: i32) -> (i32, i32) {
    %c0_i32 = arith.constant 0 : i32
    %c0_i32_0 = arith.constant 0 : i32
    return %arg0, %c0_i32 : i32, i32
  }
  func.func @transform_10(%arg0: i32) -> (i32, i32) {
    %c0_i32 = arith.constant 0 : i32
    %c0_i32_0 = arith.constant 0 : i32
    return %arg0, %c0_i32 : i32, i32
  }
}

</mosaic_0001>

<bundles_post_ra>
// kernel: tpu_custom_call.1
= control target key start
LH: loop header
LB: loop body
LE: loop exit
PB: predicated region body
PF: predicated region fallthrough
CT: control target
= control target key end

     0   :  { %s8617_s0 = inlined_call_operand.hbm [shape: f32[512,128], index: 0, kind: input, shape index: {}]   ;;  %s8618_s1 = inlined_call_operand.hbm [shape: bf16[512,128], index: 1, kind: input, shape index: {}]   ;;  %s8619_s2 = inlined_call_operand.hbm [shape: f32[8,256], index: 2, kind: input, shape index: {}]   ;;  %s8620_s3 = inlined_call_operand.hbm [shape: bf16[128,256], index: 3, kind: input, shape index: {}]   ;;  %s8621_s4 = inlined_call_operand.hbm [shape: bf16[256,256], index: 4, kind: input, shape index: {}]   ;;  %s8622_s5 = inlined_call_operand.hbm [shape: bf16[256,128], index: 5, kind: input, shape index: {}]   ;;  %s8623_s6 = inlined_call_operand.hbm [shape: bf16[128,256], index: 6, kind: input, shape index: {}]   ;;  %s8624_s7 = inlined_call_operand.hbm [shape: bf16[256,256], index: 7, kind: input, shape index: {}]   ;;  %s8625_s8 = inlined_call_operand.hbm [shape: bf16[256,128], index: 8, kind: input, shape index: {}]   ;;  %s8626_s9 = inlined_call_operand.hbm [shape: f32[512,128], index: 9, kind: output, shape index: {0}]   ;;  %s8627_s10 = inlined_call_operand.hbm [shape: f32[512,128], index: 10, kind: output, shape index: {1}]  }
   0x1   :  { %8633 = sst [smem:[#allocation39_spill]] %s8619_s2 }
   0x2   :  { %8634 = sst [smem:[#allocation40_spill]] %s8620_s3 }
   0x3   :  { %8635 = sst [smem:[#allocation41_spill]] %s8621_s4 }
   0x4   :  { %8636 = sst [smem:[#allocation42_spill]] %s8622_s5 }
   0x5   :  { %8637 = sst [smem:[#allocation43_spill]] %s8623_s6 }
   0x6   :  { %8638 = sst [smem:[#allocation44_spill]] %s8624_s7 }
   0x7   :  { %8639 = sst [smem:[#allocation45_spill]] %s8625_s8 }
   0x8   :  { %16 = vsyncpa [#allocation3], 0 }
   0x9   :  { %18 = vsyncpa [#allocation3 + $0x1], 0 }
   0xa   :  { %19 = vsyncpa [#allocation6], 0 }
   0xb   :  { %21 = vsyncpa [#allocation6 + $0x1], 0 }
   0xc   :  { %22 = vsyncpa [#allocation9], 0 }
   0xd   :  { %23 = vsyncpa [#allocation12], 0 }
   0xe   :  { %24 = vsyncpa [#allocation15], 0 }
   0xf   :  { %25 = vsyncpa [#allocation4], 0 }
  0x10   :  { %27 = vsyncpa [#allocation4 + $0x1], 0 }
  0x11   :  { %28 = vsyncpa [#allocation19], 0 }
  0x12   :  { %30 = vsyncpa [#allocation19 + $0x1], 0  ;;  %s6297_s13 = smov 0   ;;  %s6299_s14 = smov 0  }
  0x13   :  { %s6301_s15 = smov 0   ;;  %s6303_s16 = smov 0  }
  0x14 LB: > { %8640 = sst [smem:[#allocation28_spill]] %s6221_s15  ;;  %s6321_s20 = sadd.s32 4294967295, %s6225_s16   ;;  %s6225_s16 = sphi %s6303_s16, %s8729_s16   ;;  %s6221_s15 = sphi %s6301_s15, %s8726_s15   ;;  %s6217_s14 = sphi %s6299_s14, %s8728_s14   ;;  %s6213_s13 = sphi %s6297_s13, %s8727_s13  }
  0x15   : > { %s8641_s2 = sld [smem:[#allocation39_spill]]  ;;  %p4746_p0 = scmp.ge.s32.totalorder %s6225_s16, 1 }
  0x16   : > { %p57_p1 = scmp.eq.s32.totalorder %s6321_s20, 0  ;;  %p292_p2 = scmp.lt.s32.totalorder %s6225_s16, 3 }
  0x17   : > { %s6227_s22 = smov [#allocation7]   ;;  %s8643_s3 = sld [smem:[#allocation40_spill]] }
  0x18   : > { %p6326_p3 = pnand %p4746_p0, %p292_p2  ;;  %s306_s23 = sshll.u32 %s6227_s22, 4  ;;  %s307_s23 = int_to_ptr.vmem [resolvable:$true] %s306_s23 }
  0x19   : > { %s6228_s28 = smov [#allocation8]   ;;  %s8630_s30 = smov 128  }
  0x1a   : > { %p5604_p5 = pneg %p6326_p3  ;;  %s317_s29 = sshll.u32 %s6228_s28, 4  ;;  %s318_s29 = int_to_ptr.vmem [resolvable:$true] %s317_s29 }
  0x1b   : > { %s304_s19 = sshll.u32 %s8641_s2, 4  ;;  %s8631_s11 = smov 8   ;;  %s305_s19 = int_to_ptr.hbm [resolvable:$true] %s304_s19 }
  0x1c   : > { %p6338_p6 = pnand %p5604_p5, %p57_p1  ;;  %s8645_s5 = sld [smem:[#allocation42_spill]] }
  0x1d   : > { %s315_s26 = sshll.u32 %s8643_s3, 4  ;;  %s6231_s22 = smov [#allocation11]   ;;  %s316_s26 = int_to_ptr.hbm [resolvable:$true] %s315_s26 }
  0x1e   : > { %5607 = dma.hbm_to_vmem [thread:$0]  (!%p6338_p6), %s305_s19, 256, %s307_s23, [#allocation6]  }
  0x1f   : > { %5610 = dma.hbm_to_vmem [thread:$0]  (!%p6338_p6), %s316_s26, 2048, %s318_s29, [#allocation9], %s8630_s30, %s8630_s30, %s8631_s11  }
  0x20   : > { %s345_s24 = sshll.u32 %s6231_s22, 4  ;;  %s8646_s7 = sld [smem:[#allocation44_spill]]  ;;  %s346_s24 = int_to_ptr.vmem [resolvable:$true] %s345_s24 }
  0x21   : > { %s8628_s23 = smov 64   ;;  %s8629_s2 = smov 4  }
  0x22   : > { %s343_s18 = sshll.u32 %s8645_s5, 4  ;;  %s6234_s26 = smov [#allocation14]   ;;  %s344_s18 = int_to_ptr.hbm [resolvable:$true] %s343_s18 }
  0x23   : > { %5616 = dma.hbm_to_vmem [thread:$0]  (!%p6338_p6), %s344_s18, 2048, %s346_s24, [#allocation12], %s8628_s23, %s8628_s23, %s8629_s2  }
  0x24   : > { %s373_s29 = sshll.u32 %s6234_s26, 4  ;;  %s8647_s4 = sld [smem:[#allocation41_spill]]  ;;  %s374_s29 = int_to_ptr.vmem [resolvable:$true] %s373_s29 }
  0x25   : > { %s8648_s6 = sld [smem:[#allocation43_spill]]  ;;  %s6235_s24 = smov [#allocation10]  }
  0x26   : > { %s371_s19 = sshll.u32 %s8646_s7, 4  ;;  %s331_s26 = sshll.u32 %s6235_s24, 4  ;;  %s372_s19 = int_to_ptr.hbm [resolvable:$true] %s371_s19  ;;  %s332_s26 = int_to_ptr.vmem [resolvable:$true] %s331_s26 }
  0x27   : > { %5622 = dma.hbm_to_vmem [thread:$0]  (!%p6338_p6), %s372_s19, 4096, %s374_s29, [#allocation15], %s8630_s30, %s8630_s30, %s8631_s11  }
  0x28   : > { %s6236_s19 = smov [#allocation13]   ;;  %s8649_s8 = sld [smem:[#allocation45_spill]] }
  0x29   : > { %s359_s29 = sshll.u32 %s6236_s19, 4  ;;  %s4745_s24 = sadd.s32 4294967294, %s6225_s16   ;;  %s360_s29 = int_to_ptr.vmem [resolvable:$true] %s359_s29 }
  0x2a   : > { %s329_s22 = sshll.u32 %s8647_s4, 4  ;;  %s43_s19 = sadd.s32 1, %s6221_s15  ;;  %s330_s22 = int_to_ptr.hbm [resolvable:$true] %s329_s22 }
  0x2b   : > { %s357_s18 = sshll.u32 %s8648_s6, 4  ;;  %p50_p7 = scmp.ne.s32.totalorder %s6221_s15, %s6217_s14  ;;  %s358_s18 = int_to_ptr.hbm [resolvable:$true] %s357_s18 }
  0x2c   : > { %5613 = dma.hbm_to_vmem [thread:$0]  (!%p6338_p6), %s330_s22, 4096, %s332_s26, [#allocation9], %s8630_s30, %s8630_s30, %s8631_s11  }
  0x2d   : > { %5619 = dma.hbm_to_vmem [thread:$0]  (!%p6338_p6), %s358_s18, 2048, %s360_s29, [#allocation12], %s8630_s30, %s8630_s30, %s8631_s11  }
  0x2e   : > { %s385_s25 = sshll.u32 %s8649_s8, 4  ;;  %s6237_s22 = smov [#allocation16]   ;;  %s386_s25 = int_to_ptr.hbm [resolvable:$true] %s385_s25 }
  0x2f   : > { %s387_s28 = sshll.u32 %s6237_s22, 4  ;;  %s6391_s26 = sadd.s32 1, %s6225_s16   ;;  %s388_s28 = int_to_ptr.vmem [resolvable:$true] %s387_s28 }
  0x30   : > { %5625 = dma.hbm_to_vmem [thread:$0]  (!%p6338_p6), %s386_s25, 2048, %s388_s28, [#allocation15], %s8628_s23, %s8628_s23, %s8629_s2  }
  0x31   : > { %s40_s12 = ssub.s32 %s6225_s16, %s6391_s26  ;;  %p51_p9 = scmp.eq.s32.totalorder %s6225_s16, 0 }
  0x32   : > { %p41_p8 = scmp.eq.s32.totalorder %s40_s12, 0  ;;  %p56_p10 = scmp.ne.s32.totalorder %s6217_s14, %s6213_s13 }
  0x33   : > { %p253_p11 = scmp.eq.s32.totalorder %s6321_s20, 1  ;;  %p6405_p12 = por %p51_p9, %p50_p7 }
  0x34   : > { %s6403_s18 = scalar_select %p41_p8, %s6221_s15, %s43_s19  }
  0x35   : > { %p6411_p13 = por %p57_p1, %p56_p10  ;;  %p6415_p0 = por %p253_p11, %p50_p7 }
  0x36   : > { %8650 = sst [smem:[#allocation29_spill]] %s6403_s18  ;;  %p259_p2 = scmp.eq.s32.totalorder %s4745_s24, 1 }
  0x37   : > { %p5647_p5 = scmp.lt.s32.totalorder %s6225_s16, 2  ;;  %s6421_s25 = sand.u32 1, %s6221_s15  }
  0x38   : > { %p6423_p6 = por %p259_p2, %p56_p10  ;;  %s4755_s28 = sshll.u32 %s6421_s25, 8 }
  0x39   : > { %s5357_s19 = sshll.u32 %s6225_s16, 8  ;;  %s405_s11 = scalar_lea.vmem [#allocation2], %s4755_s28 }
  0x3a   : > { %s410_s2 = scalar_lea.hbm %s8617_s0, %s5357_s19  ;;  %s413_s3 = sshll.u32 %s405_s11, 4  ;;  %s414_s3 = int_to_ptr.vmem [resolvable:$true] %s413_s3 }
  0x3b   : > { %s411_s30 = sshll.u32 %s410_s2, 4  ;;  %p6434_p7 = pnand %p5647_p5, %p6405_p12  ;;  %s412_s30 = int_to_ptr.hbm [resolvable:$true] %s411_s30 }
  0x3c   : > { %s423_s4 = sand.u32 1, %s6225_s16   ;;  %s4758_s5 = sshll.u32 %s6421_s25, 7 }
  0x3d   : > { %s402_s6 = scalar_lea.sflag [#allocation3], %s6421_s25  ;;  %s6047_s7 = sshra.s32 %s412_s30, 4  ;;  %s6048_s7 = int_to_ptr.hbm [resolvable:$true] %s6047_s7 }
  0x3e   : > { %s6049_s8 = scalar_lea.hbm %s6048_s7, 256  ;;  %p6051_p9 = pneg %p6434_p7 }
  0x3f   : > { %p6050_p8 = scmp.ne.s32.totalorder %s6048_s7, %s6049_s8  ;;  %s6054_s23 = scalar_lea.hbm %s8617_s0, 512 }
  0x40   : > { %p6055_p12 = scmp.lt.s32.totalorder %s6048_s7, %s8617_s0  ;;  %p6056_p2 = scmp.lt.s32.totalorder %s6054_s23, %s6049_s8 }
  0x41   : > { %p6052_p10 = pnand %p6051_p9, %p6050_p8 }
  0x42   : > { %p6057_p5 = por %p6056_p2, %p6055_p12 }
  0x43   : > { %p6053_p11 = pneg %p6052_p10 }
  0x45   : > { %p6058_p4 = pnand %p6057_p5, %p6053_p11 }
  0x47   : > { %6061 = shalt.err (!%p6058_p4)
}
  0x48   : > { %s8656_s25 = smov 8   ;;  %s8657_s19 = smov 128  }
  0x49   : > { %5629 = dma.hbm_to_vmem [thread:$0]  (!%p6434_p7), %s412_s30, 4096, %s414_s3, %s402_s6, %s8657_s19, %s8657_s19, %s8656_s25  }
  0x4a   : > { %s5358_s12 = sshll.u32 %s6225_s16, 7  ;;  %s427_s18 = scalar_lea.vmem [#allocation5], %s4758_s5 }
  0x4b   : > { %s435_s2 = sshll.u32 %s427_s18, 4  ;;  %s432_s27 = scalar_lea.hbm %s8618_s1, %s5358_s12  ;;  %s436_s2 = int_to_ptr.vmem [resolvable:$true] %s435_s2 }
  0x4c   : > { %s433_s7 = sshll.u32 %s432_s27, 4  ;;  %s424_s8 = scalar_lea.sflag [#allocation6], %s423_s4  ;;  %s434_s7 = int_to_ptr.hbm [resolvable:$true] %s433_s7 }
  0x4d   : > { %s6077_s23 = sshra.s32 %s434_s7, 4  ;;  %s6084_s5 = scalar_lea.hbm %s8618_s1, 256  ;;  %s6078_s23 = int_to_ptr.hbm [resolvable:$true] %s6077_s23 }
  0x4e   : > { %s6079_s28 = scalar_lea.hbm %s6078_s23, 128  ;;  %p6085_p11 = scmp.lt.s32.totalorder %s6078_s23, %s8618_s1 }
  0x4f   : > { %p6080_p4 = scmp.ne.s32.totalorder %s6078_s23, %s6079_s28  ;;  %p6086_p12 = scmp.lt.s32.totalorder %s6084_s5, %s6079_s28 }
  0x51   : > { %p6082_p8 = pnand %p6080_p4, %p6051_p9  ;;  %p6087_p2 = por %p6086_p12, %p6085_p11 }
  0x53   : > { %p6083_p10 = pneg %p6082_p8 }
  0x55   : > { %p6088_p5 = pnand %p6087_p2, %p6083_p10 }
  0x57   : > { %6091 = shalt.err (!%p6088_p5)
}
  0x58   : > { %s8658_s4 = smov 4   ;;  %s8659_s15 = smov 64  }
  0x59   : > { %5632 = dma.hbm_to_vmem [thread:$0]  (!%p6434_p7), %s434_s7, 2048, %s436_s2, %s424_s8, %s8659_s15, %s8659_s15, %s8658_s4  }
  0x5a   : > { %447 = sbr.rel (%p6326_p3) target bundleno = 2143 (0x85f), region = 56 }
  0x5f   : > { %s6478_s25 = sand.u32 1, %s6217_s14  }
  0x60   : > { %s6481_s19 = sshll.u32 %s6478_s25, 8  ;;  %s450_s12 = scalar_lea.sflag [#allocation3], %s6478_s25 }
  0x61   : > { %s6485_s11 = scalar_lea.vmem [#allocation2], %s6481_s19 }
  0x62   : > { %6180 = dma.done.wait (%p6411_p13), %s450_s12, 4096  }
  0x63   : > { %6182 = vsyncadd (%p6411_p13), %s450_s12, 4294963200  ;;  %s459_s21 = sand.u32 1, %s6321_s20   ;;  %s4763_s24 = sshll.u32 %s6478_s25, 7 }
  0x64   : > { %s460_s2 = scalar_lea.sflag [#allocation6], %s459_s21  ;;  %s6493_s27 = scalar_lea.vmem [#allocation5], %s4763_s24 }
  0x65   : > { %6184 = dma.done.wait (%p6411_p13), %s460_s2, 2048  }
  0x66   : > { %6186 = vsyncadd (%p6411_p13), %s460_s2, 4294965248 }
  0x67   : > { %6188 = dma.done.wait (%p57_p1), [#allocation6], 256  }
  0x68   : > { %6190 = vsyncadd (%p57_p1), [#allocation6], 4294967040 }
  0x69   : > { %6192 = dma.done.wait (%p57_p1), [#allocation9], 6144  }
  0x6a   : > { %6194 = vsyncadd (%p57_p1), [#allocation9], 4294961152 }
  0x6b   : > { %6196 = dma.done.wait (%p57_p1), [#allocation12], 4096  }
  0x6c   : > { %6198 = vsyncadd (%p57_p1), [#allocation12], 4294963200 }
  0x6d   : > { %6200 = dma.done.wait (%p57_p1), [#allocation15], 6144  }
  0x6e   : > { %6202 = vsyncadd (%p57_p1), [#allocation15], 4294961152  ;;  %v552_v0 = vld [vmem:[%s6485_s11 + $0x10] sm:$0xff]  ;;  %v550_v1 = vld [vmem:[%s6485_s11] sm:$0xff]  ;;  %v6238_v7 = vmov 128.0   ;;  %s6239_s29 = smov 64  }
  0x6f   : > { %598 = vadd.xlane.f32.xlu1 %v552_v0  ;;  %594 = vadd.xlane.f32.xlu0 %v550_v1  ;;  %v554_v2 = vld [vmem:[%s6485_s11 + $0x20] sm:$0xff]  ;;  %v553_v3 = vld [vmem:[%s6485_s11 + $0x18] sm:$0xff]  ;;  %v551_v4 = vld [vmem:[%s6485_s11 + $0x8] sm:$0xff]  ;;  %5703 = vrcp.f32 %v6238_v7  ;;  %s7806_s7 = scalar_lea.vmem [#allocation18], %s6481_s19  ;;  %s8473_s8 = scalar_lea.vmem [#allocation17], %s6481_s19 }
  0x70   : > { %602 = vadd.xlane.f32.xlu2 %v554_v2  ;;  %v555_v5 = vld [vmem:[%s6485_s11 + $0x28] sm:$0xff]  ;;  %v556_v6 = vld [vmem:[%s6485_s11 + $0x30] sm:$0xff]  ;;  %v6538_v28 = vld [vmem:[%s6485_s11 + $0x38] sm:$0xff]  ;;  %s5487_s23 = sshll.u32 %s6321_s20, 8  ;;  %s4547_s5 = sshll.u32 %s7806_s7, 4  ;;  %s4548_s5 = int_to_ptr.vmem [resolvable:$true] %s4547_s5 }
  0x71   : > { %v6553_v36 = vld [vmem:[%s6485_s11 + $0x40] sm:$0xff]  ;;  %v6564_v42 = vld [vmem:[%s6485_s11 + $0x58] sm:$0xff]  ;;  %v6567_v43 = vld [vmem:[%s6485_s11 + $0x48] sm:$0xff]  ;;  %s4546_s6 = scalar_lea.hbm %s8627_s10, %s5487_s23  ;;  %s4518_s18 = scalar_lea.sflag [#allocation19], %s6478_s25 }
  0x72   : > { %v6576_v46 = vld [vmem:[%s6485_s11 + $0x60] sm:$0xff]  ;;  %v6579_v47 = vld [vmem:[%s6485_s11 + $0x50] sm:$0xff]  ;;  %v6584_v48 = vld [vmem:[%s6485_s11 + $0x68] sm:$0xff]  ;;  %s4549_s30 = sshll.u32 %s4546_s6, 4  ;;  %s4550_s30 = int_to_ptr.hbm [resolvable:$true] %s4549_s30 }
  0x73   : > { %v6588_v49 = vld [vmem:[%s6485_s11 + $0x70] sm:$0xff]  ;;  %v4831_v50 = vld [vmem:[#allocation8 + $0x70] sm:$0xf]  ;;  %v5374_v51 = vld [vmem:[#allocation8 + $0x74] sm:$0xf0]  ;;  %s6121_s4 = sshra.s32 %s4550_s30, 4  ;;  %s6122_s4 = int_to_ptr.hbm [resolvable:$true] %s6121_s4 }
  0x74   : > { %v5373_v52 = vld [vmem:[#allocation8 + $0x74] sm:$0xf]  ;;  %v4832_v53 = vor.u32 %v5374_v51, %v4831_v50  ;;  %v4833_v54 = vld [vmem:[#allocation8 + $0x78] sm:$0xf0]  ;;  %v4823_v56 = vld [vmem:[#allocation8 + $0x60] sm:$0xf]  ;;  %p6128_p7 = scmp.lt.s32.totalorder %s6122_s4, %s8627_s10 }
  0x75   : > { %v5704_v8 = vpop.eup %5703  ;;  %v4836_v55 = vor.u32 %v5373_v52, %v4833_v54  ;;  %v5372_v57 = vld [vmem:[#allocation8 + $0x64] sm:$0xf0]  ;;  %v5371_v58 = vld [vmem:[#allocation8 + $0x64] sm:$0xf]  ;;  %v4825_v60 = vld [vmem:[#allocation8 + $0x68] sm:$0xf0] }
  0x76   : > { %v659_v9 = vmul.f32 128.0, %v5704_v8  ;;  %vm663_vm0 = vweird.f32 %v5704_v8  ;;  %1422 = vmatpush.bf16.msra.mxu0 %v4832_v53  ;;  %v4824_v59 = vor.u32 %v5372_v57, %v4823_v56  ;;  %v4828_v61 = vor.u32 %v5371_v58, %v4825_v60  ;;  %v4815_v62 = vld [vmem:[#allocation8 + $0x50] sm:$0xf]  ;;  %v5370_v63 = vld [vmem:[#allocation8 + $0x54] sm:$0xf0]  ;;  %s6123_s15 = scalar_lea.hbm %s6122_s4, 256 }
  0x77   : > { %600 = vadd.xlane.f32.xlu1 %v553_v3  ;;  %596 = vadd.xlane.f32.xlu0 %v551_v4  ;;  %v5359_v50 = vld [vmem:[#allocation8 + $0x4] sm:$0xf]  ;;  %v4777_v51 = vld [vmem:[#allocation8 + $0x8] sm:$0xf0]  ;;  %p6124_p1 = scmp.ne.s32.totalorder %s6122_s4, %s6123_s15 }
  0x78   : > { %604 = vadd.xlane.f32.xlu2 %v555_v5  ;;  %v660_v10 = vsub.f32 1.0, %v659_v9  ;;  %1511 = vmatpush.bf16.msra.mxu1 %v4836_v55  ;;  %v4780_v52 = vor.u32 %v5359_v50, %v4777_v51 }
  0x79   : > { %p6125_p3 = pnand %p6124_p1, %p6415_p0 }
  0x7a   : > { %v661_v11 = vmul.f32 %v5704_v8, %v660_v10  ;;  %1423 = vmatpush.bf16.msra.mxu0 %v4824_v59  ;;  %v4799_v10 = vld [vmem:[#allocation8 + $0x30] sm:$0xf] }
  0x7b   : > { %p6126_p13 = pneg %p6125_p3 }
  0x7c   : > { %v662_v12 = vadd.f32 %v5704_v8, %v661_v11  ;;  %1512 = vmatpush.bf16.msra.mxu1 %v4828_v61  ;;  %v5366_v11 = vld [vmem:[#allocation8 + $0x34] sm:$0xf0] }
  0x7e   : > { %v6522_v13 = vsel %vm663_vm0, %v5704_v8, %v662_v12  ;;  %v4809_v8 = vld [vmem:[#allocation8 + $0x48] sm:$0xf0]  ;;  %v5365_v12 = vld [vmem:[#allocation8 + $0x34] sm:$0xf] }
  0x80   : > { %606 = vadd.xlane.f32.xlu2 %v556_v6 }
  0xe2   : > { %v599_v14 = vpop.xlane.xlu1 %598  ;;  %v595_v15 = vpop.xlane.xlu0 %594 }
  0xe3   : > { %v665_v16 = vmul.f32 %v6522_v13, %v595_v15  ;;  %v603_v18 = vpop.xlane.xlu2 %602  ;;  %v667_v27 = vmul.f32 %v6522_v13, %v599_v14  ;;  %v4800_v14 = vor.u32 %v5366_v11, %v4799_v10  ;;  %v4801_v15 = vld [vmem:[#allocation8 + $0x38] sm:$0xf0] }
  0xe4   : > { %v669_v26 = vmul.f32 %v6522_v13, %v603_v18  ;;  %v4791_v18 = vld [vmem:[#allocation8 + $0x20] sm:$0xf] }
  0xe5   : > { %v6525_v17 = vsub.f32 %v550_v1, %v665_v16  ;;  %v6547_v33 = vsub.f32 %v552_v0, %v667_v27  ;;  %v5369_v0 = vld [vmem:[#allocation8 + $0x54] sm:$0xf]  ;;  %v4816_v1 = vor.u32 %v5370_v63, %v4815_v62  ;;  %v4804_v16 = vor.u32 %v5365_v12, %v4801_v15  ;;  %v5362_v27 = vld [vmem:[#allocation8 + $0x14] sm:$0xf0] }
  0xe6   : > { %v6545_v32 = vsub.f32 %v554_v2, %v669_v26  ;;  %v4817_v2 = vld [vmem:[#allocation8 + $0x58] sm:$0xf0]  ;;  %v4783_v26 = vld [vmem:[#allocation8 + $0x10] sm:$0xf] }
  0xe7   : > { %v729_v19 = vmul.f32 %v6525_v17, %v6525_v17  ;;  %v731_v37 = vmul.f32 %v6547_v33, %v6547_v33  ;;  %1424 = vmatpush.bf16.msra.mxu0 %v4816_v1 }
  0xe8   : > { %v733_v34 = vmul.f32 %v6545_v32, %v6545_v32 }
  0xe9   : > { %761 = vadd.xlane.f32.xlu0 %v729_v19  ;;  %v5364_v19 = vld [vmem:[#allocation8 + $0x24] sm:$0xf0] }
  0xea   : > { %v601_v20 = vpop.xlane.xlu1 %600  ;;  %v597_v21 = vpop.xlane.xlu0 %596 }
  0xeb   : > { %v668_v22 = vmul.f32 %v6522_v13, %v601_v20  ;;  %v666_v23 = vmul.f32 %v6522_v13, %v597_v21  ;;  %v605_v31 = vpop.xlane.xlu2 %604  ;;  %v5363_v20 = vld [vmem:[#allocation8 + $0x24] sm:$0xf]  ;;  %v4792_v21 = vor.u32 %v5364_v19, %v4791_v18 }
  0xec   : > { %v670_v35 = vmul.f32 %v6522_v13, %v605_v31  ;;  %v5361_v31 = vld [vmem:[#allocation8 + $0x14] sm:$0xf] }
  0xed   : > { %v6531_v24 = vsub.f32 %v553_v3, %v668_v22  ;;  %v6533_v25 = vsub.f32 %v551_v4, %v666_v23  ;;  %v4820_v3 = vor.u32 %v5369_v0, %v4817_v2  ;;  %v4807_v4 = vld [vmem:[#allocation8 + $0x40] sm:$0xf]  ;;  %v4793_v22 = vld [vmem:[#allocation8 + $0x28] sm:$0xf0] }
  0xee   : > { %v6558_v38 = vsub.f32 %v555_v5, %v670_v35  ;;  %v5368_v5 = vld [vmem:[#allocation8 + $0x44] sm:$0xf0]  ;;  %v4796_v23 = vor.u32 %v5363_v20, %v4793_v22 }
  0xef   : > { %v732_v29 = vmul.f32 %v6531_v24, %v6531_v24  ;;  %v730_v30 = vmul.f32 %v6533_v25, %v6533_v25  ;;  %1513 = vmatpush.bf16.msra.mxu1 %v4820_v3  ;;  %v4808_v7 = vor.u32 %v5368_v5, %v4807_v4 }
  0xf0   : > { %v734_v40 = vmul.f32 %v6558_v38, %v6558_v38 }
  0xf1   : > { %767 = vadd.xlane.f32.xlu2 %v732_v29  ;;  %608 = vadd.xlane.f32.xlu0 %v6538_v28 }
  0xf2   : > { %763 = vadd.xlane.f32.xlu1 %v730_v30  ;;  %1425 = vmatpush.bf16.msra.mxu0 %v4808_v7  ;;  %v4784_v30 = vor.u32 %v5362_v27, %v4783_v26 }
  0xf3   : > { %v607_v39 = vpop.xlane.xlu2 %606 }
  0xf4   : > { %v671_v41 = vmul.f32 %v6522_v13, %v607_v39 }
  0xf6   : > { %v6570_v44 = vsub.f32 %v556_v6, %v671_v41  ;;  %v5367_v6 = vld [vmem:[#allocation8 + $0x44] sm:$0xf]  ;;  %1426 = vmatpush.bf16.msra.mxu0 %v4800_v14  ;;  %v5360_v41 = vld [vmem:[#allocation8 + $0x4] sm:$0xf0] }
  0xf7   : > { %v4812_v9 = vor.u32 %v5367_v6, %v4809_v8 }
  0xf8   : > { %v735_v45 = vmul.f32 %v6570_v44, %v6570_v44 }
  0xf9   : > { %769 = vadd.xlane.f32.xlu2 %v733_v34  ;;  %610 = vadd.xlane.f32.xlu0 %v6553_v36  ;;  %v4785_v34 = vld [vmem:[#allocation8 + $0x18] sm:$0xf0] }
  0xfa   : > { %765 = vadd.xlane.f32.xlu1 %v731_v37  ;;  %1514 = vmatpush.bf16.msra.mxu1 %v4812_v9  ;;  %v4788_v37 = vor.u32 %v5361_v31, %v4785_v34 }
  0xfb   : > { %1427 = vmatpush.bf16.msra.mxu0 %v4792_v21 }
  0xfe   : > { %1515 = vmatpush.bf16.msra.mxu1 %v4804_v16 }
  0xff   : > { %1428 = vmatpush.bf16.msra.mxu0 %v4784_v30 }
 0x101   : > { %616 = vadd.xlane.f32.xlu2 %v6564_v42  ;;  %771 = vadd.xlane.f32.xlu0 %v734_v40  ;;  %v4775_v40 = vld [vmem:[#allocation8] sm:$0xf] }
 0x102   : > { %612 = vadd.xlane.f32.xlu1 %v6567_v43  ;;  %1516 = vmatpush.bf16.msra.mxu1 %v4796_v23 }
 0x106   : > { %1517 = vmatpush.bf16.msra.mxu1 %v4788_v37 }
 0x109   : > { %618 = vadd.xlane.f32.xlu2 %v6576_v46  ;;  %773 = vadd.xlane.f32.xlu0 %v735_v45  ;;  %v4776_v45 = vor.u32 %v5360_v41, %v4775_v40  ;;  %v6726_v41 = vld [vmem:[%s6485_s11 + $0x98] sm:$0xff] }
 0x10a   : > { %614 = vadd.xlane.f32.xlu1 %v6579_v47  ;;  %1518 = vmatpush.bf16.msra.mxu1 %v4780_v52 }
 0x10b   : > { %1429 = vmatpush.bf16.msra.mxu0 %v4776_v45 }
 0x111   : > { %620 = vadd.xlane.f32.xlu0 %v6584_v48 }
 0x119   : > { %622 = vadd.xlane.f32.xlu0 %v6588_v49 }
 0x15c   : > { %v762_v29 = vpop.xlane.xlu0 %761 }
 0x15d   : > { %v825_v35 = vmul.f32 %v762_v29, %v6522_v13 }
 0x15f   : > { %v857_v39 = vadd.f32 1e-05, %v825_v35 }
 0x161   : > { %5705 = vrsqrt.f32 %v857_v39  ;;  %vm895_vm2 = vweird.f32 %v857_v39 }
 0x164   : > { %v768_v53 = vpop.xlane.xlu2 %767  ;;  %v609_v54 = vpop.xlane.xlu0 %608 }
 0x165   : > { %v828_v55 = vmul.f32 %v768_v53, %v6522_v13  ;;  %v764_v56 = vpop.xlane.xlu1 %763  ;;  %v672_v57 = vmul.f32 %v6522_v13, %v609_v54  ;;  %v6654_v53 = vld [vmem:[%s6485_s11 + $0x78] sm:$0xff] }
 0x166   : > { %v826_v58 = vmul.f32 %v764_v56, %v6522_v13  ;;  %v6658_v56 = vld [vmem:[#allocation7] ss:$0 sm:$0xff] }
 0x167   : > { %v5706_v59 = vpop.eup %5705  ;;  %v6595_v60 = vadd.f32 1e-05, %v828_v55  ;;  %v6598_v61 = vsub.f32 %v6538_v28, %v672_v57 }
 0x168   : > { %v890_v62 = vmul.f32 %v5706_v59, %v857_v39  ;;  %v858_v63 = vadd.f32 1e-05, %v826_v58  ;;  %vm896_vm1 = vweird.f32 %v5706_v59 }
 0x169   : > { %5707 = vrsqrt.f32 %v6595_v60  ;;  %v736_v0 = vmul.f32 %v6598_v61, %v6598_v61  ;;  %vm6620_vm5 = vmor %vm895_vm2, %vm896_vm1  ;;  %vm925_vm9 = vweird.f32 %v6595_v60 }
 0x16a   : > { %v891_v1 = vmul.f32 %v5706_v59, %v890_v62  ;;  %5709 = vrsqrt.f32 %v858_v63  ;;  %vm905_vm3 = vweird.f32 %v858_v63 }
 0x16b   : > { %775 = vadd.xlane.f32.xlu1 %v736_v0 }
 0x16c   : > { %v892_v2 = vmul.f32 0.5, %v891_v1  ;;  %v770_v3 = vpop.xlane.xlu2 %769  ;;  %v611_v4 = vpop.xlane.xlu0 %610 }
 0x16d   : > { %v766_v5 = vpop.xlane.xlu1 %765  ;;  %v673_v6 = vmul.f32 %v6522_v13, %v611_v4  ;;  %v829_v15 = vmul.f32 %v770_v3, %v6522_v13 }
 0x16e   : > { %v827_v7 = vmul.f32 %v766_v5, %v6522_v13  ;;  %v893_v8 = vsub.f32 1.5, %v892_v2 }
 0x16f   : > { %v6605_v28 = vpop.eup %5707  ;;  %v6608_v9 = vsub.f32 %v6553_v36, %v673_v6  ;;  %v6625_v30 = vadd.f32 1e-05, %v829_v15  ;;  %v5390_v15 = vld [vmem:[#allocation10 + $0x74] sm:$0xf0] }
 0x170   : > { %v5710_v10 = vpop.eup %5709  ;;  %v6610_v11 = vadd.f32 1e-05, %v827_v7  ;;  %v920_v14 = vmul.f32 %v6605_v28, %v6595_v60  ;;  %v894_v18 = vmul.f32 %v5706_v59, %v893_v8  ;;  %v6677_v7 = vld [vmem:[#allocation7 + $0x1] ss:$0 sm:$0xff]  ;;  %vm926_vm10 = vweird.f32 %v6605_v28 }
 0x171   : > { %v900_v12 = vmul.f32 %v5710_v10, %v858_v63  ;;  %v737_v16 = vmul.f32 %v6608_v9, %v6608_v9  ;;  %vm906_vm4 = vweird.f32 %v5710_v10  ;;  %vm6707_vm12 = vmor %vm925_vm9, %vm926_vm10  ;;  %vm935_vm15 = vweird.f32 %v6625_v30 }
 0x172   : > { %5711 = vrsqrt.f32 %v6610_v11  ;;  %v921_v29 = vmul.f32 %v6605_v28, %v920_v14  ;;  %v898_v39 = vsel %vm6620_vm5, %v5706_v59, %v894_v18  ;;  %vm6638_vm6 = vmor %vm905_vm3, %vm906_vm4  ;;  %vm915_vm7 = vweird.f32 %v6610_v11  ;;  %v6702_v18 = vld [vmem:[%s6485_s11 + $0x80] sm:$0xff] }
 0x173   : > { %v901_v19 = vmul.f32 %v5710_v10, %v900_v12  ;;  %777 = vadd.xlane.f32.xlu1 %v737_v16  ;;  %v1209_v54 = vmul.f32 %v898_v39, %v6525_v17 }
 0x174   : > { %v617_v36 = vpop.xlane.xlu2 %616  ;;  %v772_v20 = vpop.xlane.xlu0 %771 }
 0x175   : > { %v902_v21 = vmul.f32 0.5, %v901_v19  ;;  %v676_v22 = vmul.f32 %v6522_v13, %v617_v36  ;;  %v613_v23 = vpop.xlane.xlu1 %612  ;;  %v830_v26 = vmul.f32 %v772_v20, %v6522_v13  ;;  %v1241_v2 = vmul.f32 %v1209_v54, %v6658_v56 }
 0x176   : > { %v674_v31 = vmul.f32 %v6522_v13, %v613_v23 }
 0x177   : > { %v903_v34 = vsub.f32 1.5, %v902_v21  ;;  %v6629_v35 = vsub.f32 %v6564_v42, %v676_v22  ;;  %v6631_v37 = vadd.f32 1e-05, %v830_v26  ;;  %v1273_v60 = vadd.f32 %v1241_v2, %v6677_v7  ;;  %v6764_v2 = vld [vmem:[%s6485_s11 + $0xa8] sm:$0xff] }
 0x178   : > { %v6635_v40 = vpop.eup %5711  ;;  %v6643_v45 = vsub.f32 %v6567_v43, %v674_v31  ;;  %v922_v43 = vmul.f32 0.5, %v921_v29 }
 0x179   : > { %v904_v50 = vmul.f32 %v5710_v10, %v903_v34  ;;  %v910_v42 = vmul.f32 %v6635_v40, %v6610_v11  ;;  %5713 = vrsqrt.f32 %v6631_v37  ;;  %v740_v51 = vmul.f32 %v6629_v35, %v6629_v35  ;;  %v5388_v11 = vld [vmem:[#allocation10 + $0x64] sm:$0xf0] }
 0x17a   : > { %5715 = vrsqrt.f32 %v6625_v30  ;;  %v738_v52 = vmul.f32 %v6643_v45, %v6643_v45  ;;  %v923_v5 = vsub.f32 1.5, %v922_v43  ;;  %vm916_vm8 = vweird.f32 %v6635_v40 }
 0x17b   : > { %v911_v55 = vmul.f32 %v6635_v40, %v910_v42  ;;  %v908_v57 = vsel %vm6638_vm6, %v5710_v10, %v904_v50  ;;  %783 = vadd.xlane.f32.xlu0 %v740_v51  ;;  %624 = vadd.xlane.f32.xlu1 %v6654_v53  ;;  %vm6693_vm11 = vmor %vm915_vm7, %vm916_vm8  ;;  %v6729_v50 = vld [vmem:[%s6485_s11 + $0x88] sm:$0xff]  ;;  %vm945_vm13 = vweird.f32 %v6631_v37 }
 0x17c   : > { %779 = vadd.xlane.f32.xlu2 %v738_v52  ;;  %v619_v58 = vpop.xlane.xlu2 %618  ;;  %v6662_v59 = vpop.xlane.xlu0 %773  ;;  %v1210_v62 = vmul.f32 %v908_v57, %v6533_v25  ;;  %v924_v19 = vmul.f32 %v6605_v28, %v923_v5 }
 0x17d   : > { %v912_v63 = vmul.f32 0.5, %v911_v55  ;;  %v677_v17 = vmul.f32 %v6522_v13, %v619_v58  ;;  %v615_v0 = vpop.xlane.xlu1 %614  ;;  %v6749_v58 = vld [vmem:[%s6485_s11 + $0xa0] sm:$0xff] }
 0x17e   : > { %v675_v1 = vmul.f32 %v6522_v13, %v615_v0  ;;  %v1242_v3 = vmul.f32 %v1210_v62, %v6658_v56  ;;  %v928_v31 = vsel %vm6707_vm12, %v6605_v28, %v924_v19  ;;  %v6752_v62 = vld [vmem:[%s6485_s11 + $0x90] sm:$0xff] }
 0x17f   : > { %v6671_v4 = vpop.eup %5713  ;;  %v913_v6 = vsub.f32 1.5, %v912_v63  ;;  %v6675_v25 = vsub.f32 %v6576_v46, %v677_v17  ;;  %v1212_v42 = vmul.f32 %v928_v31, %v6531_v24  ;;  %v4943_v31 = vld [vmem:[#allocation10 + $0xd0] sm:$0xf] }
 0x180   : > { %v6679_v8 = vpop.eup %5715  ;;  %v6683_v10 = vsub.f32 %v6579_v47, %v675_v1  ;;  %v940_v14 = vmul.f32 %v6671_v4, %v6631_v37  ;;  %v1274_v16 = vadd.f32 %v1242_v3, %v6677_v7  ;;  %vm946_vm14 = vweird.f32 %v6671_v4 }
 0x181   : > { %v914_v12 = vmul.f32 %v6635_v40, %v913_v6  ;;  %v741_v46 = vmul.f32 %v6675_v25, %v6675_v25  ;;  %v930_v36 = vmul.f32 %v6679_v8, %v6625_v30  ;;  %v1244_v54 = vmul.f32 %v1212_v42, %v6658_v56  ;;  %vm947_vm1 = vmor %vm945_vm13, %vm946_vm14 }
 0x182   : > { %v739_v47 = vmul.f32 %v6683_v10, %v6683_v10  ;;  %v1305_v20 = vpack.c.bf16 %v1274_v16, %v1273_v60  ;;  %v941_v22 = vmul.f32 %v6671_v4, %v940_v14  ;;  %vm936_vm0 = vweird.f32 %v6679_v8  ;;  %v6773_v14 = vld [vmem:[%s6485_s11 + $0xb0] sm:$0xff]  ;;  %v5406_v16 = vld [vmem:[#allocation10 + $0xf4] sm:$0xf0] }
 0x183   : > { %785 = vadd.xlane.f32.xlu0 %v741_v46  ;;  %626 = vadd.xlane.f32.xlu1 %v6702_v18  ;;  %v918_v26 = vsel %vm6693_vm11, %v6635_v40, %v914_v12  ;;  %v931_v27 = vmul.f32 %v6679_v8, %v930_v36  ;;  %vm937_vm2 = vmor %vm935_vm15, %vm936_vm0  ;;  %v4887_v36 = vld [vmem:[#allocation10 + $0x60] sm:$0xf] }
 0x184   : > { %781 = vadd.xlane.f32.xlu2 %v739_v47  ;;  %v621_v21 = vpop.xlane.xlu0 %620  ;;  %1430 = vmatmul.bf16.vlgmr.msra.gmra.mxu0 %v1305_v20  ;;  %v1211_v34 = vmul.f32 %v918_v26, %v6547_v33  ;;  %v942_v39 = vmul.f32 0.5, %v941_v22  ;;  %v4959_v47 = vld [vmem:[#allocation10 + $0xf0] sm:$0xf]  ;;  %v5404_v22 = vld [vmem:[#allocation10 + $0xe4] sm:$0xf0] }
 0x185   : > { %v678_v23 = vmul.f32 %v6522_v13, %v621_v21  ;;  %1519 = vmatmul.bf16.vlgmr.msra.gmra.mxu1 %v1305_v20  ;;  %v932_v51 = vmul.f32 0.5, %v931_v27  ;;  %v4960_v19 = vor.u32 %v5406_v16, %v4959_v47  ;;  %v4951_v20 = vld [vmem:[#allocation10 + $0xe0] sm:$0xf]  ;;  %v4888_v21 = vor.u32 %v5388_v11, %v4887_v36  ;;  %v4879_v26 = vld [vmem:[#allocation10 + $0x50] sm:$0xf] }
 0x186   : > { %v1243_v33 = vmul.f32 %v1211_v34, %v6658_v56  ;;  %v943_v28 = vsub.f32 1.5, %v942_v39  ;;  %v5386_v27 = vld [vmem:[#allocation10 + $0x54] sm:$0xf0]  ;;  %v4847_v16 = vld [vmem:[#allocation10 + $0x10] sm:$0xf] }
 0x187   : > { %v6719_v29 = vsub.f32 %v6584_v48, %v678_v23  ;;  %v933_v43 = vsub.f32 1.5, %v932_v51  ;;  %1982 = vmatpush.bf16.msra.mxu3 %v4960_v19  ;;  %v4952_v23 = vor.u32 %v5404_v22, %v4951_v20  ;;  %v4880_v34 = vor.u32 %v5386_v27, %v4879_v26  ;;  %v5402_v39 = vld [vmem:[#allocation10 + $0xd4] sm:$0xf0]  ;;  %v4871_v51 = vld [vmem:[#allocation10 + $0x40] sm:$0xf] }
 0x188   : > { %v1275_v55 = vadd.f32 %v1243_v33, %v6677_v7  ;;  %v944_v57 = vmul.f32 %v6671_v4, %v943_v28  ;;  %v4935_v33 = vld [vmem:[#allocation10 + $0xc0] sm:$0xf]  ;;  %v5378_v19 = vld [vmem:[#allocation10 + $0x14] sm:$0xf0]  ;;  %v4911_v36 = vld [vmem:[#allocation10 + $0x90] sm:$0xf] }
 0x189   : > { %v742_v40 = vmul.f32 %v6719_v29, %v6719_v29  ;;  %v934_v63 = vmul.f32 %v6679_v8, %v933_v43  ;;  %v5394_v22 = vld [vmem:[#allocation10 + $0x94] sm:$0xf0] }
 0x18a   : > { %v948_v17 = vsel %vm947_vm1, %v6671_v4, %v944_v57 }
 0x18b   : > { %632 = vadd.xlane.f32.xlu0 %v6726_v41  ;;  %787 = vadd.xlane.f32.xlu1 %v742_v40  ;;  %v938_v0 = vsel %vm937_vm2, %v6679_v8, %v934_v63  ;;  %v1214_v1 = vmul.f32 %v948_v17, %v6558_v38  ;;  %v4895_v8 = vld [vmem:[#allocation10 + $0x70] sm:$0xf]  ;;  %v4944_v40 = vor.u32 %v5402_v39, %v4943_v31  ;;  %v5382_v63 = vld [vmem:[#allocation10 + $0x34] sm:$0xf0]  ;;  %v4839_v31 = vld [vmem:[#allocation10] sm:$0xf] }
 0x18c   : > { %628 = vadd.xlane.f32.xlu2 %v6729_v50  ;;  %v623_v48 = vpop.xlane.xlu0 %622  ;;  %v1213_v3 = vmul.f32 %v938_v0, %v6545_v32  ;;  %v831_v32 = vmul.f32 %v6662_v59, %v6522_v13  ;;  %v4896_v60 = vor.u32 %v5390_v15, %v4895_v8  ;;  %1983 = vmatpush.bf16.msra.mxu3 %v4952_v23  ;;  %v4927_v17 = vld [vmem:[#allocation10 + $0xb0] sm:$0xf]  ;;  %v5398_v0 = vld [vmem:[#allocation10 + $0xb4] sm:$0xf0]  ;;  %v4903_v39 = vld [vmem:[#allocation10 + $0x80] sm:$0xf] }
 0x18d   : > { %v679_v52 = vmul.f32 %v6522_v13, %v623_v48  ;;  %v1246_v5 = vmul.f32 %v1214_v1, %v6658_v56  ;;  %v5384_v48 = vld [vmem:[#allocation10 + $0x44] sm:$0xf0]  ;;  %v4912_v23 = vor.u32 %v5394_v22, %v4911_v36 }
 0x18e   : > { %v1245_v6 = vmul.f32 %v1213_v3, %v6658_v56  ;;  %v6778_v38 = vadd.f32 1e-05, %v831_v32  ;;  %1893 = vmatpush.bf16.msra.mxu2 %v4896_v60  ;;  %v4928_v3 = vor.u32 %v5398_v0, %v4927_v17 }
 0x18f   : > { %v6742_v24 = vsub.f32 %v6588_v49, %v679_v52  ;;  %v1276_v49 = vadd.f32 %v1244_v54, %v6677_v7  ;;  %v1278_v12 = vadd.f32 %v1246_v5, %v6677_v7  ;;  %v4872_v52 = vor.u32 %v5384_v48, %v4871_v51  ;;  %v5400_v54 = vld [vmem:[#allocation10 + $0xc4] sm:$0xf0]  ;;  %v4855_v5 = vld [vmem:[#allocation10 + $0x20] sm:$0xf] }
 0x190   : > { %v1277_v4 = vadd.f32 %v1245_v6, %v6677_v7  ;;  %5717 = vrsqrt.f32 %v6778_v38  ;;  %1984 = vmatpush.bf16.msra.mxu3 %v4944_v40  ;;  %v5380_v6 = vld [vmem:[#allocation10 + $0x24] sm:$0xf0]  ;;  %vm955_vm3 = vweird.f32 %v6778_v38 }
 0x191   : > { %v743_v37 = vmul.f32 %v6742_v24, %v6742_v24  ;;  %v1306_v30 = vpack.c.bf16 %v1276_v49, %v1275_v55  ;;  %v4936_v55 = vor.u32 %v5400_v54, %v4935_v33  ;;  %v4863_v49 = vld [vmem:[#allocation10 + $0x30] sm:$0xf] }
 0x192   : > { %v1307_v46 = vpack.c.bf16 %v1278_v12, %v1277_v4  ;;  %1894 = vmatpush.bf16.msra.mxu2 %v4888_v21  ;;  %v4919_v12 = vld [vmem:[#allocation10 + $0xa0] sm:$0xf]  ;;  %v4856_v4 = vor.u32 %v5380_v6, %v4855_v5  ;;  %v4848_v21 = vor.u32 %v5378_v19, %v4847_v16 }
 0x193   : > { %634 = vadd.xlane.f32.xlu0 %v6749_v58  ;;  %789 = vadd.xlane.f32.xlu1 %v743_v37 }
 0x194   : > { %630 = vadd.xlane.f32.xlu2 %v6752_v62  ;;  %1435 = vmatmul.bf16.gmra.mxu0 %v1306_v30 }
 0x195   : > { %1524 = vmatmul.bf16.gmra.mxu1 %v1306_v30  ;;  %1985 = vmatpush.bf16.msra.mxu3 %v4936_v55  ;;  %v4864_v30 = vor.u32 %v5382_v63, %v4863_v49 }
 0x196   : > { %v6781_v59 = vpop.eup %5717  ;;  %1895 = vmatpush.bf16.msra.mxu2 %v4880_v34  ;;  %v5376_v34 = vld [vmem:[#allocation10 + $0x4] sm:$0xf0] }
 0x197   : > { %v950_v42 = vmul.f32 %v6781_v59, %v6778_v38  ;;  %vm956_vm4 = vweird.f32 %v6781_v59  ;;  %v4840_v51 = vor.u32 %v5376_v34, %v4839_v31  ;;  %v5392_v38 = vld [vmem:[#allocation10 + $0x84] sm:$0xf0] }
 0x198   : > { %vm6798_vm5 = vmor %vm955_vm3, %vm956_vm4 }
 0x199   : > { %v951_v57 = vmul.f32 %v6781_v59, %v950_v42  ;;  %1986 = vmatpush.bf16.msra.mxu3 %v4928_v3 }
 0x19a   : > { %1896 = vmatpush.bf16.msra.mxu2 %v4872_v52 }
 0x19b   : > { %636 = vadd.xlane.f32.xlu1 %v6764_v2  ;;  %v952_v1 = vmul.f32 0.5, %v951_v57 }
 0x19d   : > { %v953_v15 = vsub.f32 1.5, %v952_v1 }
 0x19e   : > { %1897 = vmatpush.bf16.msra.mxu2 %v4864_v30 }
 0x19f   : > { %v954_v27 = vmul.f32 %v6781_v59, %v953_v15 }
 0x1a1   : > { %v958_v49 = vsel %vm6798_vm5, %v6781_v59, %v954_v27 }
 0x1a2   : > { %1898 = vmatpush.bf16.msra.mxu2 %v4856_v4  ;;  %v1215_v5 = vmul.f32 %v958_v49, %v6570_v44 }
 0x1a3   : > { %638 = vadd.xlane.f32.xlu1 %v6773_v14 }
 0x1a4   : > { %1440 = vmatmul.bf16.gmra.mxu0 %v1307_v46  ;;  %v1247_v44 = vmul.f32 %v1215_v5, %v6658_v56 }
 0x1a5   : > { %1529 = vmatmul.bf16.gmra.mxu1 %v1307_v46  ;;  %v5396_v46 = vld [vmem:[#allocation10 + $0xa4] sm:$0xf0] }
 0x1a6   : > { %v4920_v8 = vor.u32 %v5396_v46, %v4919_v12  ;;  %1899 = vmatpush.bf16.msra.mxu2 %v4848_v21 }
 0x1a8   : > { %1987 = vmatpush.bf16.msra.mxu3 %v4920_v8 }
 0x1aa   : > { %1900 = vmatpush.bf16.msra.mxu2 %v4840_v51 }
 0x1ac   : > { %1988 = vmatpush.bf16.msra.mxu3 %v4912_v23 }
 0x1de   : > { %v776_v28 = vpop.xlane.xlu1 %775 }
 0x1df   : > { %v832_v43 = vmul.f32 %v776_v28, %v6522_v13  ;;  %v4904_v28 = vor.u32 %v5392_v38, %v4903_v39  ;;  %v585_v38 = vld [vmem:[#allocation7 + $0x2] ss:$8 sm:$0x3] }
 0x1e1   : > { %v6787_v37 = vadd.f32 1e-05, %v832_v43  ;;  %1989 = vmatpush.bf16.msra.mxu3 %v4904_v28 }
 0x1e3   : > { %5719 = vrsqrt.f32 %v6787_v37  ;;  %vm965_vm7 = vweird.f32 %v6787_v37 }
 0x1e6   : > { %v778_v32 = vpop.xlane.xlu1 %777 }
 0x1e7   : > { %v833_v47 = vmul.f32 %v778_v32, %v6522_v13 }
 0x1e9   : > { %v5720_v60 = vpop.eup %5719  ;;  %v6792_v20 = vadd.f32 1e-05, %v833_v47 }
 0x1ea   : > { %v960_v11 = vmul.f32 %v5720_v60, %v6787_v37  ;;  %vm966_vm6 = vweird.f32 %v5720_v60 }
 0x1eb   : > { %5721 = vrsqrt.f32 %v6792_v20  ;;  %vm967_vm8 = vmor %vm965_vm7, %vm966_vm6  ;;  %vm975_vm10 = vweird.f32 %v6792_v20 }
 0x1ec   : > { %v961_v26 = vmul.f32 %v5720_v60, %v960_v11 }
 0x1ee   : > { %v962_v42 = vmul.f32 0.5, %v961_v26  ;;  %v784_v33 = vpop.xlane.xlu0 %783  ;;  %v625_v43 = vpop.xlane.xlu1 %624  ;;  %v1279_v26 = vadd.f32 %v1247_v44, %v6677_v7 }
 0x1ef   : > { %v780_v48 = vpop.xlane.xlu2 %779  ;;  %v836_v55 = vmul.f32 %v784_v33, %v6522_v13  ;;  %v680_v57 = vmul.f32 %v6522_v13, %v625_v43 }
 0x1f0   : > { %v963_v52 = vsub.f32 1.5, %v962_v42  ;;  %v834_v54 = vmul.f32 %v780_v48, %v6522_v13 }
 0x1f1   : > { %v6808_v63 = vpop.eup %5721  ;;  %v6813_v0 = vadd.f32 1e-05, %v836_v55  ;;  %v6818_v3 = vsub.f32 %v6654_v53, %v680_v57 }
 0x1f2   : > { %v964_v30 = vmul.f32 %v5720_v60, %v963_v52  ;;  %v6811_v17 = vadd.f32 1e-05, %v834_v54  ;;  %v970_v1 = vmul.f32 %v6808_v63, %v6792_v20  ;;  %vm976_vm9 = vweird.f32 %v6808_v63 }
 0x1f3   : > { %v744_v37 = vmul.f32 %v6818_v3, %v6818_v3  ;;  %vm6866_vm13 = vmor %vm975_vm10, %vm976_vm9  ;;  %vm1005_vm15 = vweird.f32 %v6813_v0 }
 0x1f4   : > { %5723 = vrsqrt.f32 %v6811_v17  ;;  %v968_v59 = vsel %vm967_vm8, %v5720_v60, %v964_v30  ;;  %v971_v6 = vmul.f32 %v6808_v63, %v970_v1  ;;  %vm985_vm11 = vweird.f32 %v6811_v17 }
 0x1f5   : > { %5725 = vrsqrt.f32 %v6813_v0  ;;  %v1216_v12 = vmul.f32 %v968_v59, %v6598_v61  ;;  %791 = vadd.xlane.f32.xlu2 %v744_v37  ;;  %v6877_v30 = vperm.slane %v585_v38, 0 }
 0x1f6   : > { %v972_v4 = vmul.f32 0.5, %v971_v6  ;;  %v786_v32 = vpop.xlane.xlu0 %785  ;;  %v627_v15 = vpop.xlane.xlu1 %626 }
 0x1f7   : > { %v782_v46 = vpop.xlane.xlu2 %781  ;;  %v1248_v53 = vmul.f32 %v1216_v12, %v6658_v56  ;;  %v681_v47 = vmul.f32 %v6522_v13, %v627_v15  ;;  %v837_v19 = vmul.f32 %v786_v32, %v6522_v13  ;;  %v6904_v15 = vperm.slane %v585_v38, 1 }
 0x1f8   : > { %v835_v8 = vmul.f32 %v782_v46, %v6522_v13  ;;  %v973_v11 = vsub.f32 1.5, %v972_v4  ;;  %v6894_v4 = vld [vmem:[%s6485_s11 + $0xb8] sm:$0xff] }
 0x1f9   : > { %v1280_v61 = vadd.f32 %v1248_v53, %v6677_v7  ;;  %v6842_v22 = vsub.f32 %v6702_v18, %v681_v47  ;;  %v6851_v34 = vadd.f32 1e-05, %v837_v19 }
 0x1fa   : > { %v6831_v60 = vpop.eup %5723  ;;  %v6833_v16 = vadd.f32 1e-05, %v835_v8  ;;  %v974_v40 = vmul.f32 %v6808_v63, %v973_v11 }
 0x1fb   : > { %v6837_v36 = vpop.eup %5725  ;;  %v980_v21 = vmul.f32 %v6831_v60, %v6811_v17  ;;  %v745_v31 = vmul.f32 %v6842_v22, %v6842_v22  ;;  %v1308_v39 = vpack.c.bf16 %v1280_v61, %v1279_v26  ;;  %vm986_vm12 = vweird.f32 %v6831_v60 }
 0x1fc   : > { %v1000_v23 = vmul.f32 %v6837_v36, %v6813_v0  ;;  %5727 = vrsqrt.f32 %v6833_v16  ;;  %v978_v12 = vsel %vm6866_vm13, %v6808_v63, %v974_v40  ;;  %vm6889_vm14 = vmor %vm985_vm11, %vm986_vm12  ;;  %vm1006_vm0 = vweird.f32 %v6837_v36 }
 0x1fd   : > { %v981_v27 = vmul.f32 %v6831_v60, %v980_v21  ;;  %793 = vadd.xlane.f32.xlu2 %v745_v31  ;;  %1445 = vmatmul.bf16.gmra.mxu0 %v1308_v39  ;;  %5729 = vrsqrt.f32 %v6851_v34  ;;  %v1217_v63 = vmul.f32 %v978_v12, %v6608_v9  ;;  %vm995_vm1 = vweird.f32 %v6833_v16  ;;  %vm6957_vm4 = vmor %vm1005_vm15, %vm1006_vm0 }
 0x1fe   : > { %v633_v51 = vpop.xlane.xlu0 %632  ;;  %v1001_v48 = vmul.f32 %v6837_v36, %v1000_v23  ;;  %1534 = vmatmul.bf16.gmra.mxu1 %v1308_v39  ;;  %v788_v28 = vpop.xlane.xlu1 %787  ;;  %vm1015_vm5 = vweird.f32 %v6851_v34 }
 0x1ff   : > { %v982_v18 = vmul.f32 0.5, %v981_v27  ;;  %v629_v42 = vpop.xlane.xlu2 %628  ;;  %v684_v52 = vmul.f32 %v6522_v13, %v633_v51  ;;  %v838_v43 = vmul.f32 %v788_v28, %v6522_v13  ;;  %v1249_v39 = vmul.f32 %v1217_v63, %v6658_v56 }
 0x200   : > { %v682_v33 = vmul.f32 %v6522_v13, %v629_v42 }
 0x201   : > { %v983_v54 = vsub.f32 1.5, %v982_v18  ;;  %v6875_v49 = vsub.f32 %v6726_v41, %v684_v52  ;;  %v6882_v5 = vadd.f32 1e-05, %v838_v43  ;;  %v1431_v6 = vpop.f32.mrf.mxu0 }
 0x202   : > { %v6862_v55 = vpop.eup %5727  ;;  %v6872_v57 = vsub.f32 %v6729_v50, %v682_v33  ;;  %v1520_v37 = vpop.f32.mrf.mxu1  ;;  %v1002_v50 = vmul.f32 0.5, %v1001_v48  ;;  %v1432_v8 = vadd.f32 %v1431_v6, %v6877_v30  ;;  %v6937_v33 = vld [vmem:[%s6485_s11 + $0xc0] sm:$0xff] }
 0x203   : > { %v984_v1 = vmul.f32 %v6831_v60, %v983_v54  ;;  %v990_v59 = vmul.f32 %v6862_v55, %v6833_v16  ;;  %5731 = vrsqrt.f32 %v6882_v5  ;;  %v748_v53 = vmul.f32 %v6875_v49, %v6875_v49  ;;  %v6910_v61 = vpop.eup %5729 }
 0x204   : > { %v746_v32 = vmul.f32 %v6872_v57, %v6872_v57  ;;  %v1003_v11 = vsub.f32 1.5, %v1002_v50  ;;  %vm996_vm2 = vweird.f32 %v6862_v55  ;;  %v1600_v38 = vmax.f32 %v1432_v8, 0.0 }
 0x205   : > { %v991_v46 = vmul.f32 %v6862_v55, %v990_v59  ;;  %640 = vadd.xlane.f32.xlu2 %v6894_v4  ;;  %v988_v19 = vsel %vm6889_vm14, %v6831_v60, %v984_v1  ;;  %799 = vadd.xlane.f32.xlu1 %v748_v53  ;;  %vm6945_vm3 = vmor %vm995_vm1, %vm996_vm2  ;;  %v1281_v1 = vadd.f32 %v1249_v39, %v6677_v7  ;;  %v6987_v39 = vld [vmem:[%s6485_s11 + $0xd8] sm:$0xff]  ;;  %vm1025_vm6 = vweird.f32 %v6882_v5 }
 0x206   : > { %v635_v47 = vpop.xlane.xlu0 %634  ;;  %795 = vadd.xlane.f32.xlu0 %v746_v32  ;;  %v6913_v21 = vpop.xlane.xlu1 %789  ;;  %v1218_v26 = vmul.f32 %v988_v19, %v6643_v45  ;;  %v1521_v45 = vadd.f32 %v1520_v37, %v6904_v15  ;;  %v1004_v51 = vmul.f32 %v6837_v36, %v1003_v11  ;;  %vm1016_vm8 = vweird.f32 %v6910_v61 }
 0x207   : > { %v992_v17 = vmul.f32 0.5, %v991_v46  ;;  %v631_v44 = vpop.xlane.xlu2 %630  ;;  %v685_v23 = vmul.f32 %v6522_v13, %v635_v47  ;;  %vm7028_vm10 = vmor %vm1015_vm5, %vm1016_vm8 }
 0x208   : > { %v683_v9 = vmul.f32 %v6522_v13, %v631_v44  ;;  %v1250_v40 = vmul.f32 %v1218_v26, %v6658_v56  ;;  %v1601_v12 = vmax.f32 %v1521_v45, 0.0  ;;  %v1008_v44 = vsel %vm6957_vm4, %v6837_v36, %v1004_v51 }
 0x209   : > { %v993_v27 = vsub.f32 1.5, %v992_v17  ;;  %v6922_v60 = vsub.f32 %v6749_v58, %v685_v23  ;;  %v6926_v18 = vpop.eup %5731  ;;  %v1433_v42 = vpop.f32.mrf.mxu0  ;;  %v1010_v58 = vmul.f32 %v6910_v61, %v6851_v34 }
 0x20a   : > { %v6919_v31 = vsub.f32 %v6752_v62, %v683_v9  ;;  %v1522_v62 = vpop.f32.mrf.mxu1  ;;  %v1434_v48 = vadd.f32 %v1433_v42, %v6877_v30  ;;  %v1020_v16 = vmul.f32 %v6926_v18, %v6882_v5  ;;  %v1282_v59 = vadd.f32 %v1250_v40, %v6677_v7 }
 0x20b   : > { %v994_v28 = vmul.f32 %v6862_v55, %v993_v27  ;;  %v1523_v52 = vadd.f32 %v1522_v62, %v6904_v15  ;;  %v749_v6 = vmul.f32 %v6922_v60, %v6922_v60  ;;  %v1011_v50 = vmul.f32 %v6910_v61, %v1010_v58 }
 0x20c   : > { %v747_v54 = vmul.f32 %v6919_v31, %v6919_v31  ;;  %v1602_v20 = vmax.f32 %v1434_v48, 0.0  ;;  %v1309_v46 = vpack.c.bf16 %v1282_v59, %v1281_v1  ;;  %v1021_v63 = vmul.f32 %v6926_v18, %v1020_v16  ;;  %v7016_v59 = vld [vmem:[%s6485_s11 + $0xe0] sm:$0xff] }
 0x20d   : > { %v1603_v41 = vmax.f32 %v1523_v52, 0.0  ;;  %642 = vadd.xlane.f32.xlu2 %v6937_v33  ;;  %801 = vadd.xlane.f32.xlu1 %v749_v6  ;;  %v998_v8 = vsel %vm6945_vm3, %v6862_v55, %v994_v28  ;;  %v1012_v23 = vmul.f32 0.5, %v1011_v50  ;;  %v6982_v55 = vld [vmem:[%s6485_s11 + $0xc8] sm:$0xff]  ;;  %vm1026_vm7 = vweird.f32 %v6926_v18 }
 0x20e   : > { %797 = vadd.xlane.f32.xlu0 %v747_v54  ;;  %v637_v32 = vpop.xlane.xlu1 %636  ;;  %v6963_v53 = vpack.c.bf16 %v1602_v20, %v1600_v38  ;;  %1450 = vmatmul.bf16.gmra.mxu0 %v1309_v46  ;;  %v1219_v9 = vmul.f32 %v998_v8, %v6683_v10  ;;  %v1022_v26 = vmul.f32 0.5, %v1021_v63  ;;  %v7010_v20 = vld [vmem:[%s6485_s11 + $0xd0] sm:$0xff]  ;;  %vm7020_vm9 = vmor %vm1025_vm6, %vm1026_vm7 }
 0x20f   : > { %v686_v0 = vmul.f32 %v6522_v13, %v637_v32  ;;  %v6967_v17 = vpack.c.bf16 %v1603_v41, %v1601_v12  ;;  %1539 = vmatmul.bf16.gmra.mxu1 %v1309_v46  ;;  %v1013_v10 = vsub.f32 1.5, %v1012_v23 }
 0x210   : > { %1901 = vmatmul.bf16.vlgmr.msra.gmra.mxu2 %v6963_v53  ;;  %v1251_v40 = vmul.f32 %v1219_v9, %v6658_v56  ;;  %v1023_v45 = vsub.f32 1.5, %v1022_v26 }
 0x211   : > { %v6976_v47 = vsub.f32 %v6764_v2, %v686_v0  ;;  %1990 = vmatmul.bf16.vlgmr.msra.gmra.mxu3 %v6967_v17  ;;  %v1436_v19 = vpop.f32.mrf.mxu0  ;;  %v1220_v2 = vmul.f32 %v1008_v44, %v6629_v35  ;;  %v1014_v54 = vmul.f32 %v6910_v61, %v1013_v10  ;;  %v7059_v10 = vld [vmem:[%s6485_s11 + $0xf0] sm:$0xff] }
 0x212   : > { %v1525_v11 = vpop.f32.mrf.mxu1  ;;  %v1437_v51 = vadd.f32 %v1436_v19, %v6877_v30  ;;  %v1283_v52 = vadd.f32 %v1251_v40, %v6677_v7  ;;  %v1024_v43 = vmul.f32 %v6926_v18, %v1023_v45  ;;  %v7047_v19 = vld [vmem:[%s6485_s11 + $0xe8] sm:$0xff] }
 0x213   : > { %v750_v27 = vmul.f32 %v6976_v47, %v6976_v47  ;;  %v1252_v62 = vmul.f32 %v1220_v2, %v6658_v56  ;;  %v1526_v58 = vadd.f32 %v1525_v11, %v6904_v15  ;;  %v1018_v34 = vsel %vm7028_vm10, %v6910_v61, %v1014_v54 }
 0x214   : > { %v1604_v37 = vmax.f32 %v1437_v51, 0.0  ;;  %v1028_v0 = vsel %vm7020_vm9, %v6926_v18, %v1024_v43  ;;  %v1221_v9 = vmul.f32 %v1018_v34, %v6675_v25 }
 0x215   : > { %803 = vadd.xlane.f32.xlu2 %v750_v27  ;;  %648 = vadd.xlane.f32.xlu1 %v6987_v39  ;;  %v1284_v1 = vadd.f32 %v1252_v62, %v6677_v7  ;;  %v1605_v12 = vmax.f32 %v1526_v58, 0.0  ;;  %v1222_v11 = vmul.f32 %v1028_v0, %v6719_v29 }
 0x216   : > { %644 = vadd.xlane.f32.xlu0 %v6982_v55  ;;  %v639_v36 = vpop.xlane.xlu1 %638  ;;  %v1253_v23 = vmul.f32 %v1221_v9, %v6658_v56 }
 0x217   : > { %v687_v42 = vmul.f32 %v6522_v13, %v639_v36  ;;  %v1310_v5 = vpack.c.bf16 %v1284_v1, %v1283_v52  ;;  %v1254_v18 = vmul.f32 %v1222_v11, %v6658_v56 }
 0x218   : > { %v1285_v29 = vadd.f32 %v1253_v23, %v6677_v7 }
 0x219   : > { %v7001_v35 = vsub.f32 %v6773_v14, %v687_v42  ;;  %v1438_v38 = vpop.f32.mrf.mxu0  ;;  %v1286_v25 = vadd.f32 %v1254_v18, %v6677_v7 }
 0x21a   : > { %v1527_v48 = vpop.f32.mrf.mxu1  ;;  %v1439_v28 = vadd.f32 %v1438_v38, %v6877_v30 }
 0x21b   : > { %v1528_v16 = vadd.f32 %v1527_v48, %v6904_v15  ;;  %v751_v14 = vmul.f32 %v7001_v35, %v7001_v35  ;;  %v1311_v58 = vpack.c.bf16 %v1286_v25, %v1285_v29 }
 0x21c   : > { %v1606_v41 = vmax.f32 %v1439_v28, 0.0  ;;  %v839_v28 = vmul.f32 %v6913_v21, %v6522_v13 }
 0x21d   : > { %v1607_v50 = vmax.f32 %v1528_v16, 0.0  ;;  %805 = vadd.xlane.f32.xlu2 %v751_v14  ;;  %650 = vadd.xlane.f32.xlu1 %v7016_v59 }
 0x21e   : > { %646 = vadd.xlane.f32.xlu0 %v7010_v20  ;;  %v7034_v32 = vpack.c.bf16 %v1606_v41, %v1604_v37  ;;  %1455 = vmatmul.bf16.gmra.mxu0 %v1310_v5  ;;  %v871_v16 = vadd.f32 1e-05, %v839_v28 }
 0x21f   : > { %v7036_v63 = vpack.c.bf16 %v1607_v50, %v1605_v12  ;;  %1544 = vmatmul.bf16.gmra.mxu1 %v1310_v5 }
 0x220   : > { %1906 = vmatmul.bf16.gmra.mxu2 %v7034_v32  ;;  %5733 = vrsqrt.f32 %v871_v16  ;;  %vm1035_vm11 = vweird.f32 %v871_v16 }
 0x221   : > { %1995 = vmatmul.bf16.gmra.mxu3 %v7036_v63  ;;  %v1441_v8 = vpop.f32.mrf.mxu0 }
 0x222   : > { %v1530_v44 = vpop.f32.mrf.mxu1  ;;  %v1442_v61 = vadd.f32 %v1441_v8, %v6877_v30 }
 0x223   : > { %v1531_v26 = vadd.f32 %v1530_v44, %v6904_v15 }
 0x224   : > { %v1608_v45 = vmax.f32 %v1442_v61, 0.0 }
 0x225   : > { %652 = vadd.xlane.f32.xlu2 %v7047_v19  ;;  %v1609_v42 = vmax.f32 %v1531_v26, 0.0 }
 0x226   : > { %v5734_v52 = vpop.eup %5733 }
 0x227   : > { %v1030_v54 = vmul.f32 %v5734_v52, %v871_v16  ;;  %vm1036_vm12 = vweird.f32 %v5734_v52 }
 0x228   : > { %vm7077_vm13 = vmor %vm1035_vm11, %vm1036_vm12 }
 0x229   : > { %v1443_v27 = vpop.f32.mrf.mxu0  ;;  %v1031_v14 = vmul.f32 %v5734_v52, %v1030_v54 }
 0x22a   : > { %v1532_v2 = vpop.f32.mrf.mxu1  ;;  %v1444_v36 = vadd.f32 %v1443_v27, %v6877_v30 }
 0x22b   : > { %v1533_v40 = vadd.f32 %v1532_v2, %v6904_v15  ;;  %v1032_v37 = vmul.f32 0.5, %v1031_v14 }
 0x22c   : > { %v1610_v62 = vmax.f32 %v1444_v36, 0.0 }
 0x22d   : > { %v1611_v51 = vmax.f32 %v1533_v40, 0.0  ;;  %654 = vadd.xlane.f32.xlu2 %v7059_v10  ;;  %v1033_v41 = vsub.f32 1.5, %v1032_v37 }
 0x22e   : > { %v7064_v38 = vpack.c.bf16 %v1610_v62, %v1608_v45  ;;  %1460 = vmatmul.bf16.gmra.mxu0 %v1311_v58 }
 0x22f   : > { %v7066_v48 = vpack.c.bf16 %v1611_v51, %v1609_v42  ;;  %1549 = vmatmul.bf16.gmra.mxu1 %v1311_v58  ;;  %v1034_v0 = vmul.f32 %v5734_v52, %v1033_v41 }
 0x230   : > { %1911 = vmatmul.bf16.gmra.mxu2 %v7064_v38 }
 0x231   : > { %2000 = vmatmul.bf16.gmra.mxu3 %v7066_v48  ;;  %v1038_v61 = vsel %vm7077_vm13, %v5734_v52, %v1034_v0 }
 0x232   : > { %v1223_v28 = vmul.f32 %v1038_v61, %v6742_v24 }
 0x234   : > { %v1255_v37 = vmul.f32 %v1223_v28, %v6658_v56 }
 0x268   : > { %v792_v43 = vpop.xlane.xlu2 %791 }
 0x269   : > { %v840_v1 = vmul.f32 %v792_v43, %v6522_v13 }
 0x26b   : > { %v872_v6 = vadd.f32 1e-05, %v840_v1 }
 0x26d   : > { %5735 = vrsqrt.f32 %v872_v6  ;;  %vm1045_vm15 = vweird.f32 %v872_v6 }
 0x270   : > { %v794_v12 = vpop.xlane.xlu2 %793 }
 0x271   : > { %v841_v50 = vmul.f32 %v794_v12, %v6522_v13 }
 0x273   : > { %v5736_v46 = vpop.eup %5735  ;;  %v7074_v5 = vadd.f32 1e-05, %v841_v50 }
 0x274   : > { %v1040_v21 = vmul.f32 %v5736_v46, %v872_v6  ;;  %vm1046_vm14 = vweird.f32 %v5736_v46 }
 0x275   : > { %5737 = vrsqrt.f32 %v7074_v5  ;;  %vm1047_vm0 = vmor %vm1045_vm15, %vm1046_vm14  ;;  %vm1055_vm4 = vweird.f32 %v7074_v5 }
 0x276   : > { %v1041_v8 = vmul.f32 %v5736_v46, %v1040_v21 }
 0x278   : > { %v1042_v44 = vmul.f32 0.5, %v1041_v8  ;;  %v641_v11 = vpop.xlane.xlu2 %640  ;;  %v800_v18 = vpop.xlane.xlu1 %799 }
 0x279   : > { %v688_v9 = vmul.f32 %v6522_v13, %v641_v11  ;;  %v796_v23 = vpop.xlane.xlu0 %795  ;;  %v844_v27 = vmul.f32 %v800_v18, %v6522_v13 }
 0x27a   : > { %v1043_v26 = vsub.f32 1.5, %v1042_v44  ;;  %v842_v2 = vmul.f32 %v796_v23, %v6522_v13  ;;  %v1446_v25 = vpop.f32.mrf.mxu0  ;;  %v1287_v23 = vadd.f32 %v1255_v37, %v6677_v7 }
 0x27b   : > { %v7086_v36 = vpop.eup %5737  ;;  %v7089_v40 = vsub.f32 %v6894_v4, %v688_v9  ;;  %v1535_v29 = vpop.f32.mrf.mxu1  ;;  %v7093_v62 = vadd.f32 1e-05, %v844_v27  ;;  %v1447_v24 = vadd.f32 %v1446_v25, %v6877_v30 }
 0x27c   : > { %v1044_v45 = vmul.f32 %v5736_v46, %v1043_v26  ;;  %v1050_v42 = vmul.f32 %v7086_v36, %v7074_v5  ;;  %v7095_v51 = vadd.f32 1e-05, %v842_v2  ;;  %v1536_v41 = vadd.f32 %v1535_v29, %v6904_v15 }
 0x27d   : > { %v752_v58 = vmul.f32 %v7089_v40, %v7089_v40  ;;  %5739 = vrsqrt.f32 %v7093_v62  ;;  %vm1056_vm1 = vweird.f32 %v7086_v36  ;;  %v1612_v26 = vmax.f32 %v1447_v24, 0.0 }
 0x27e   : > { %v1051_v4 = vmul.f32 %v7086_v36, %v1050_v42  ;;  %v1048_v16 = vsel %vm1047_vm0, %v5736_v46, %v1044_v45  ;;  %5741 = vrsqrt.f32 %v7095_v51  ;;  %vm1065_vm2 = vweird.f32 %v7095_v51  ;;  %vm7152_vm5 = vmor %vm1055_vm4, %vm1056_vm1 }
 0x27f   : > { %807 = vadd.xlane.f32.xlu0 %v752_v58  ;;  %v1224_v54 = vmul.f32 %v1048_v16, %v6818_v3  ;;  %v1613_v27 = vmax.f32 %v1536_v41, 0.0  ;;  %vm1085_vm7 = vweird.f32 %v7093_v62 }
 0x280   : > { %v643_v52 = vpop.xlane.xlu2 %642  ;;  %v1052_v43 = vmul.f32 0.5, %v1051_v4  ;;  %v802_v1 = vpop.xlane.xlu1 %801 }
 0x281   : > { %v689_v14 = vmul.f32 %v6522_v13, %v643_v52  ;;  %v798_v6 = vpop.xlane.xlu0 %797  ;;  %v845_v46 = vmul.f32 %v802_v1, %v6522_v13  ;;  %v1256_v44 = vmul.f32 %v1224_v54, %v6658_v56 }
 0x282   : > { %v843_v12 = vmul.f32 %v798_v6, %v6522_v13  ;;  %v1448_v21 = vpop.f32.mrf.mxu0  ;;  %v1053_v9 = vsub.f32 1.5, %v1052_v43 }
 0x283   : > { %v7110_v50 = vsub.f32 %v6937_v33, %v689_v14  ;;  %v1537_v3 = vpop.f32.mrf.mxu1  ;;  %v7113_v0 = vpop.eup %5739  ;;  %v1449_v8 = vadd.f32 %v1448_v21, %v6877_v30  ;;  %v7129_v56 = vadd.f32 1e-05, %v845_v46  ;;  %v1288_v42 = vadd.f32 %v1256_v44, %v6677_v7  ;;  %v7164_v21 = vld [vmem:[%s6485_s11 + $0xf8] sm:$0xff]  ;;  %s6127_s11 = scalar_lea.hbm %s8627_s10, 512 }
 0x284   : > { %v7115_v34 = vadd.f32 1e-05, %v843_v12  ;;  %v7119_v11 = vpop.eup %5741  ;;  %v1538_v18 = vadd.f32 %v1537_v3, %v6904_v15  ;;  %v1080_v25 = vmul.f32 %v7113_v0, %v7093_v62  ;;  %v1054_v28 = vmul.f32 %v7086_v36, %v1053_v9  ;;  %v4961_v62 = vld [vmem:[#allocation10 + $0xf8] sm:$0xf0]  ;;  %p6129_p9 = scmp.lt.s32.totalorder %s6127_s11, %s6123_s15 }
 0x285   : > { %v753_v33 = vmul.f32 %v7110_v50, %v7110_v50  ;;  %v1060_v61 = vmul.f32 %v7119_v11, %v7095_v51  ;;  %v1614_v2 = vmax.f32 %v1449_v8, 0.0  ;;  %vm1066_vm3 = vweird.f32 %v7119_v11 }
 0x286   : > { %5743 = vrsqrt.f32 %v7115_v34  ;;  %v1615_v45 = vmax.f32 %v1538_v18, 0.0  ;;  %v1312_v14 = vpack.c.bf16 %v1288_v42, %v1287_v23  ;;  %v1081_v12 = vmul.f32 %v7113_v0, %v1080_v25  ;;  %vm7172_vm6 = vmor %vm1065_vm2, %vm1066_vm3  ;;  %v587_v18 = vld [vmem:[#allocation7 + $0x3] ss:$8 sm:$0x3]  ;;  %p6130_p4 = por %p6129_p9, %p6128_p7 }
 0x287   : > { %809 = vadd.xlane.f32.xlu0 %v753_v33  ;;  %v1061_v29 = vmul.f32 %v7119_v11, %v1060_v61  ;;  %v7139_v54 = vpack.c.bf16 %v1614_v2, %v1612_v26  ;;  %5745 = vrsqrt.f32 %v7129_v56  ;;  %v1058_v51 = vsel %vm7152_vm5, %v7086_v36, %v1054_v28 }
 0x288   : > { %v804_v58 = vpop.xlane.xlu2 %803  ;;  %v649_v16 = vpop.xlane.xlu1 %648  ;;  %v7148_v37 = vpack.c.bf16 %v1615_v45, %v1613_v27  ;;  %1465 = vmatmul.bf16.gmra.mxu0 %v1312_v14  ;;  %1554 = vmatmul.bf16.gmra.mxu1 %v1312_v14  ;;  %v1082_v23 = vmul.f32 0.5, %v1081_v12  ;;  %v7198_v45 = vperm.slane %v587_v18, 0  ;;  %v1225_v42 = vmul.f32 %v1058_v51, %v6842_v22  ;;  %v7219_v18 = vld [vmem:[#allocation7] ss:$0 sm:$0xff]  ;;  %p6131_p8 = pnand %p6130_p4, %p6126_p13 }
 0x289   : > { %v846_v4 = vmul.f32 %v804_v58, %v6522_v13  ;;  %v645_v52 = vpop.xlane.xlu0 %644  ;;  %v1062_v43 = vmul.f32 0.5, %v1061_v29  ;;  %v692_v1 = vmul.f32 %v6522_v13, %v649_v16  ;;  %1916 = vmatmul.bf16.gmra.mxu2 %v7139_v54  ;;  %v5389_v58 = vld [vmem:[#allocation10 + $0x74] sm:$0xf]  ;;  %vm1086_vm8 = vweird.f32 %v7113_v0 }
 0x28a   : > { %v690_v6 = vmul.f32 %v6522_v13, %v645_v52  ;;  %2005 = vmatmul.bf16.gmra.mxu3 %v7148_v37  ;;  %v4897_v52 = vld [vmem:[#allocation10 + $0x78] sm:$0xf0]  ;;  %vm1075_vm9 = vweird.f32 %v7115_v34  ;;  %v1083_v22 = vsub.f32 1.5, %v1082_v23  ;;  %v1257_v51 = vmul.f32 %v7219_v18, %v1225_v42  ;;  %vm7258_vm12 = vmor %vm1085_vm7, %vm1086_vm8 }
 0x28b   : > { %v7145_v7 = vadd.f32 1e-05, %v846_v4  ;;  %v1063_v41 = vsub.f32 1.5, %v1062_v43  ;;  %v7158_v5 = vsub.f32 %v6987_v39, %v692_v1  ;;  %v1451_v39 = vpop.f32.mrf.mxu0  ;;  %v4900_v1 = vor.u32 %v5389_v58, %v4897_v52 }
 0x28c   : > { %v7161_v46 = vsub.f32 %v6982_v55, %v690_v6  ;;  %v7166_v3 = vpop.eup %5743  ;;  %v1540_v44 = vpop.f32.mrf.mxu1  ;;  %v1452_v4 = vadd.f32 %v1451_v39, %v6877_v30  ;;  %vm1095_vm13 = vweird.f32 %v7129_v56 }
 0x28d   : > { %5747 = vrsqrt.f32 %v7145_v7  ;;  %v1064_v55 = vmul.f32 %v7119_v11, %v1063_v41  ;;  %v1070_v9 = vmul.f32 %v7166_v3, %v7115_v34  ;;  %v756_v33 = vmul.f32 %v7158_v5, %v7158_v5  ;;  %v7195_v25 = vpop.eup %5745  ;;  %2071 = vmatpush.bf16.msrb.mxu0 %v4900_v1 }
 0x28e   : > { %v754_v26 = vmul.f32 %v7161_v46, %v7161_v46  ;;  %v1541_v24 = vadd.f32 %v1540_v44, %v6904_v15  ;;  %v1090_v39 = vmul.f32 %v7195_v25, %v7129_v56  ;;  %vm1076_vm10 = vweird.f32 %v7166_v3 }
 0x28f   : > { %656 = vadd.xlane.f32.xlu0 %v7164_v21  ;;  %v1071_v61 = vmul.f32 %v7166_v3, %v1070_v9  ;;  %v1068_v2 = vsel %vm7172_vm6, %v7119_v11, %v1064_v55  ;;  %815 = vadd.xlane.f32.xlu2 %v756_v33  ;;  %v1616_v44 = vmax.f32 %v1452_v4, 0.0  ;;  %vm7237_vm11 = vmor %vm1075_vm9, %vm1076_vm10  ;;  %vm1105_vm14 = vweird.f32 %v7145_v7 }
 0x290   : > { %v7190_v27 = vpop.xlane.xlu2 %805  ;;  %v651_v36 = vpop.xlane.xlu1 %650  ;;  %811 = vadd.xlane.f32.xlu1 %v754_v26  ;;  %v1226_v14 = vmul.f32 %v1068_v2, %v6872_v57  ;;  %vm1096_vm0 = vweird.f32 %v7195_v25 }
 0x291   : > { %v647_v29 = vpop.xlane.xlu0 %646  ;;  %v1072_v28 = vmul.f32 0.5, %v1071_v61  ;;  %v693_v16 = vmul.f32 %v6522_v13, %v651_v36  ;;  %vm1097_vm2 = vmor %vm1095_vm13, %vm1096_vm0 }
 0x292   : > { %v691_v11 = vmul.f32 %v6522_v13, %v647_v29  ;;  %v1258_v26 = vmul.f32 %v7219_v18, %v1226_v14  ;;  %v1617_v29 = vmax.f32 %v1541_v24, 0.0 }
 0x293   : > { %v7204_v43 = vpop.eup %5747  ;;  %v1073_v6 = vsub.f32 1.5, %v1072_v28  ;;  %v7211_v12 = vsub.f32 %v7016_v59, %v693_v16  ;;  %v1902_v41 = vpop.f32.mrf.mxu2 }
 0x294   : > { %v1991_v8 = vpop.f32.mrf.mxu3  ;;  %v7217_v55 = vsub.f32 %v7010_v20, %v691_v11  ;;  %v1453_v9 = vpop.f32.mrf.mxu0  ;;  %v1100_v59 = vmul.f32 %v7204_v43, %v7145_v7  ;;  %v1903_v61 = vadd.f32 %v1902_v41, %v7198_v45  ;;  %v7243_v11 = vld [vmem:[#allocation7 + $0x1] ss:$0 sm:$0xff]  ;;  %vm1106_vm15 = vweird.f32 %v7204_v43 }
 0x295   : > { %v1542_v57 = vpop.f32.mrf.mxu1  ;;  %v1454_v33 = vadd.f32 %v1453_v9, %v6877_v30  ;;  %v757_v20 = vmul.f32 %v7211_v12, %v7211_v12  ;;  %v1074_v36 = vmul.f32 %v7166_v3, %v1073_v6  ;;  %v1289_v52 = vadd.f32 %v7243_v11, %v1257_v51  ;;  %vm7307_vm1 = vmor %vm1105_vm14, %vm1106_vm15 }
 0x296   : > { %v1543_v23 = vadd.f32 %v1542_v57, %v6904_v15  ;;  %v755_v2 = vmul.f32 %v7217_v55, %v7217_v55  ;;  %v7241_v16 = vadd.f32 %v1991_v8, %v1903_v61  ;;  %v1290_v14 = vadd.f32 %v7243_v11, %v1258_v26 }
 0x297   : > { %v1618_v42 = vmax.f32 %v1454_v33, 0.0  ;;  %817 = vadd.xlane.f32.xlu0 %v757_v20  ;;  %v1084_v6 = vmul.f32 %v7113_v0, %v1083_v22  ;;  %v1101_v24 = vmul.f32 %v7204_v43, %v1100_v59  ;;  %v1078_v59 = vsel %vm7237_vm11, %v7166_v3, %v1074_v36 }
 0x298   : > { %v1619_v58 = vmax.f32 %v1543_v23, 0.0  ;;  %v653_v28 = vpop.xlane.xlu2 %652  ;;  %813 = vadd.xlane.f32.xlu1 %v755_v2  ;;  %v1313_v9 = vpack.c.bf16 %v1290_v14, %v1289_v52  ;;  %v1091_v33 = vmul.f32 %v7195_v25, %v1090_v39  ;;  %v1227_v3 = vmul.f32 %v1078_v59, %v6919_v31  ;;  %v5403_v14 = vld [vmem:[#allocation10 + $0xe4] sm:$0xf] }
 0x299   : > { %v694_v1 = vmul.f32 %v6522_v13, %v653_v28  ;;  %v7250_v34 = vpack.c.bf16 %v1618_v42, %v1616_v44  ;;  %v5405_v44 = vld [vmem:[#allocation10 + $0xf4] sm:$0xf]  ;;  %v1088_v26 = vsel %vm7258_vm12, %v7113_v0, %v1084_v6  ;;  %v4889_v28 = vld [vmem:[#allocation10 + $0x68] sm:$0xf0] }
 0x29a   : > { %v7252_v41 = vpack.c.bf16 %v1619_v58, %v1617_v29  ;;  %1470 = vmatmul.bf16.gmra.mxu0 %v1313_v9  ;;  %1559 = vmatmul.bf16.gmra.mxu1 %v1313_v9  ;;  %v4964_v2 = vor.u32 %v5405_v44, %v4961_v62  ;;  %v1092_v29 = vmul.f32 0.5, %v1091_v33  ;;  %v1228_v42 = vmul.f32 %v1088_v26, %v6875_v49  ;;  %v5387_v58 = vld [vmem:[#allocation10 + $0x64] sm:$0xf]  ;;  %v5385_v6 = vld [vmem:[#allocation10 + $0x54] sm:$0xf] }
 0x29b   : > { %v7263_v57 = vsub.f32 %v7047_v19, %v694_v1  ;;  %1921 = vmatmul.bf16.gmra.mxu2 %v7250_v34  ;;  %v7266_v22 = vpop.f32.mrf.mxu2  ;;  %v1102_v19 = vmul.f32 0.5, %v1101_v24  ;;  %v4892_v52 = vor.u32 %v5387_v58, %v4889_v28  ;;  %v4953_v1 = vld [vmem:[#allocation10 + $0xe8] sm:$0xf0]  ;;  %v1259_v0 = vmul.f32 %v7219_v18, %v1227_v3  ;;  %v4881_v24 = vld [vmem:[#allocation10 + $0x58] sm:$0xf0] }
 0x29c   : > { %v7268_v51 = vpop.f32.mrf.mxu3  ;;  %v1456_v23 = vpop.f32.mrf.mxu0  ;;  %2010 = vmatmul.bf16.gmra.mxu3 %v7252_v41  ;;  %2160 = vmatpush.bf16.msrb.mxu1 %v4964_v2  ;;  %v5401_v49 = vld [vmem:[#allocation10 + $0xd4] sm:$0xf]  ;;  %v4956_v62 = vor.u32 %v5403_v14, %v4953_v1  ;;  %v4884_v33 = vor.u32 %v5385_v6, %v4881_v24 }
 0x29d   : > { %v1545_v61 = vpop.f32.mrf.mxu1  ;;  %v758_v20 = vmul.f32 %v7263_v57, %v7263_v57  ;;  %v1103_v4 = vsub.f32 1.5, %v1102_v19  ;;  %v1457_v8 = vadd.f32 %v1456_v23, %v6877_v30  ;;  %2072 = vmatpush.bf16.msrb.mxu0 %v4892_v52  ;;  %v4945_v19 = vld [vmem:[#allocation10 + $0xd8] sm:$0xf0]  ;;  %v1291_v28 = vadd.f32 %v7243_v11, %v1259_v0 }
 0x29e   : > { %v1546_v9 = vadd.f32 %v1545_v61, %v6904_v15 }
 0x29f   : > { %v1620_v52 = vmax.f32 %v1457_v8, 0.0 }
 0x2a0   : > { %v655_v36 = vpop.xlane.xlu2 %654  ;;  %819 = vadd.xlane.f32.xlu1 %v758_v20  ;;  %v1093_v20 = vsub.f32 1.5, %v1092_v29  ;;  %2161 = vmatpush.bf16.msrb.mxu1 %v4956_v62  ;;  %v1104_v29 = vmul.f32 %v7204_v43, %v1103_v4  ;;  %v1621_v14 = vmax.f32 %v1546_v9, 0.0 }
 0x2a1   : > { %v695_v39 = vmul.f32 %v6522_v13, %v655_v36  ;;  %v1260_v36 = vmul.f32 %v7219_v18, %v1228_v42  ;;  %2073 = vmatpush.bf16.msrb.mxu0 %v4884_v33 }
 0x2a2   : > { %v1094_v24 = vmul.f32 %v7195_v25, %v1093_v20 }
 0x2a3   : > { %v7286_v31 = vsub.f32 %v7059_v10, %v695_v39  ;;  %v1907_v59 = vpop.f32.mrf.mxu2  ;;  %v4948_v39 = vor.u32 %v5401_v49, %v4945_v19  ;;  %v1292_v4 = vadd.f32 %v7243_v11, %v1260_v36 }
 0x2a4   : > { %v1996_v44 = vpop.f32.mrf.mxu3  ;;  %v1458_v26 = vpop.f32.mrf.mxu0  ;;  %v1908_v10 = vadd.f32 %v1907_v59, %v7198_v45  ;;  %v1108_v59 = vsel %vm7307_vm1, %v7204_v43, %v1104_v29  ;;  %v1098_v56 = vsel %vm1097_vm2, %v7195_v25, %v1094_v24  ;;  %v847_v24 = vmul.f32 %v7190_v27, %v6522_v13 }
 0x2a5   : > { %v1547_v2 = vpop.f32.mrf.mxu1  ;;  %v759_v3 = vmul.f32 %v7286_v31, %v7286_v31  ;;  %v1459_v23 = vadd.f32 %v1458_v26, %v6877_v30  ;;  %2162 = vmatpush.bf16.msrb.mxu1 %v4948_v39  ;;  %v1314_v8 = vpack.c.bf16 %v1292_v4, %v1291_v28  ;;  %v1230_v33 = vmul.f32 %v1108_v59, %v6976_v47 }
 0x2a6   : > { %v1548_v61 = vadd.f32 %v1547_v2, %v6904_v15  ;;  %v7300_v58 = vadd.f32 %v1996_v44, %v1908_v10  ;;  %v1229_v19 = vmul.f32 %v1098_v56, %v6922_v60 }
 0x2a7   : > { %821 = vadd.xlane.f32.xlu2 %v759_v3  ;;  %v1622_v42 = vmax.f32 %v1459_v23, 0.0  ;;  %v1262_v20 = vmul.f32 %v7219_v18, %v1230_v33 }
 0x2a8   : > { %v1623_v1 = vmax.f32 %v1548_v61, 0.0  ;;  %v1261_v23 = vmul.f32 %v7219_v18, %v1229_v19 }
 0x2a9   : > { %v7313_v49 = vpack.c.bf16 %v1622_v42, %v1620_v52  ;;  %v1294_v60 = vadd.f32 %v7243_v11, %v1262_v20 }
 0x2aa   : > { %v7315_v0 = vpack.c.bf16 %v1623_v1, %v1621_v14  ;;  %1475 = vmatmul.bf16.gmra.mxu0 %v1314_v8  ;;  %1564 = vmatmul.bf16.gmra.mxu1 %v1314_v8  ;;  %v1293_v42 = vadd.f32 %v7243_v11, %v1261_v23  ;;  %v879_v8 = vadd.f32 1e-05, %v847_v24 }
 0x2ab   : > { %1926 = vmatmul.bf16.gmra.mxu2 %v7313_v49  ;;  %v7322_v7 = vpop.f32.mrf.mxu2 }
 0x2ac   : > { %v7324_v9 = vpop.f32.mrf.mxu3  ;;  %v1461_v44 = vpop.f32.mrf.mxu0  ;;  %2015 = vmatmul.bf16.gmra.mxu3 %v7315_v0  ;;  %v1315_v4 = vpack.c.bf16 %v1294_v60, %v1293_v42  ;;  %5749 = vrsqrt.f32 %v879_v8  ;;  %vm1115_vm3 = vweird.f32 %v879_v8  ;;  %v4873_v42 = vld [vmem:[#allocation10 + $0x48] sm:$0xf0] }
 0x2ad   : > { %v1550_v62 = vpop.f32.mrf.mxu1  ;;  %v1462_v26 = vadd.f32 %v1461_v44, %v6877_v30 }
 0x2ae   : > { %v1551_v2 = vadd.f32 %v1550_v62, %v6904_v15 }
 0x2af   : > { %v1624_v29 = vmax.f32 %v1462_v26, 0.0 }
 0x2b0   : > { %v1625_v28 = vmax.f32 %v1551_v2, 0.0 }
 0x2b2   : > { %v5750_v59 = vpop.eup %5749 }
 0x2b3   : > { %v1912_v10 = vpop.f32.mrf.mxu2  ;;  %v1110_v44 = vmul.f32 %v5750_v59, %v879_v8  ;;  %vm1116_vm4 = vweird.f32 %v5750_v59 }
 0x2b4   : > { %v1463_v43 = vpop.f32.mrf.mxu0  ;;  %v1913_v36 = vadd.f32 %v1912_v10, %v7198_v45  ;;  %v2001_v47 = vpop.f32.mrf.mxu3  ;;  %vm7356_vm5 = vmor %vm1115_vm3, %vm1116_vm4 }
 0x2b5   : > { %v1552_v3 = vpop.f32.mrf.mxu1  ;;  %v1464_v61 = vadd.f32 %v1463_v43, %v6877_v30  ;;  %v1111_v62 = vmul.f32 %v5750_v59, %v1110_v44 }
 0x2b6   : > { %v1553_v25 = vadd.f32 %v1552_v3, %v6904_v15  ;;  %v7340_v39 = vadd.f32 %v2001_v47, %v1913_v36 }
 0x2b7   : > { %v1626_v52 = vmax.f32 %v1464_v61, 0.0  ;;  %v1112_v20 = vmul.f32 0.5, %v1111_v62 }
 0x2b8   : > { %8694 = vst [vmem:[#allocation30_spill] sm:$0xff] %v7340_v39  ;;  %v1627_v14 = vmax.f32 %v1553_v25, 0.0 }
 0x2b9   : > { %v7344_v1 = vpack.c.bf16 %v1626_v52, %v1624_v29  ;;  %v1113_v26 = vsub.f32 1.5, %v1112_v20 }
 0x2ba   : > { %v7346_v6 = vpack.c.bf16 %v1627_v14, %v1625_v28  ;;  %1480 = vmatmul.bf16.gmra.mxu0 %v1315_v4  ;;  %1569 = vmatmul.bf16.gmra.mxu1 %v1315_v4  ;;  %v5383_v14 = vld [vmem:[#allocation10 + $0x44] sm:$0xf] }
 0x2bb   : > { %1931 = vmatmul.bf16.gmra.mxu2 %v7344_v1  ;;  %v1114_v27 = vmul.f32 %v5750_v59, %v1113_v26  ;;  %v4876_v62 = vor.u32 %v5383_v14, %v4873_v42  ;;  %v7371_v20 = vpop.f32.mrf.mxu2 }
 0x2bc   : > { %2020 = vmatmul.bf16.gmra.mxu3 %v7346_v6  ;;  %8697 = vst [vmem:[#allocation31_spill] sm:$0xff] %v7371_v20  ;;  %v7381_v23 = vpop.f32.mrf.mxu3 }
 0x2bd   : > { %v1118_v60 = vsel %vm7356_vm5, %v5750_v59, %v1114_v27  ;;  %2074 = vmatpush.bf16.msrb.mxu0 %v4876_v62  ;;  %8698 = vst [vmem:[#allocation32_spill] sm:$0xff] %v7381_v23 }
 0x2be   : > { %v1231_v59 = vmul.f32 %v1118_v60, %v7001_v35 }
 0x2f2   : > { %v808_v56 = vpop.xlane.xlu0 %807 }
 0x2f3   : > { %v848_v33 = vmul.f32 %v808_v56, %v6522_v13  ;;  %v5399_v56 = vld [vmem:[#allocation10 + $0xc4] sm:$0xf] }
 0x2f5   : > { %v880_v19 = vadd.f32 1e-05, %v848_v33  ;;  %v4937_v33 = vld [vmem:[#allocation10 + $0xc8] sm:$0xf0] }
 0x2f7   : > { %5751 = vrsqrt.f32 %v880_v19  ;;  %vm1125_vm7 = vweird.f32 %v880_v19 }
 0x2fa   : > { %v810_v2 = vpop.xlane.xlu0 %809 }
 0x2fb   : > { %v849_v10 = vmul.f32 %v810_v2, %v6522_v13 }
 0x2fd   : > { %v5752_v43 = vpop.eup %5751  ;;  %v7354_v3 = vadd.f32 1e-05, %v849_v10 }
 0x2fe   : > { %v1120_v36 = vmul.f32 %v5752_v43, %v880_v19  ;;  %vm1126_vm6 = vweird.f32 %v5752_v43 }
 0x2ff   : > { %5753 = vrsqrt.f32 %v7354_v3  ;;  %vm1127_vm8 = vmor %vm1125_vm7, %vm1126_vm6  ;;  %vm1135_vm10 = vweird.f32 %v7354_v3 }
 0x300   : > { %v1121_v61 = vmul.f32 %v5752_v43, %v1120_v36  ;;  %v4940_v36 = vor.u32 %v5399_v56, %v4937_v33 }
 0x302   : > { %v1122_v25 = vmul.f32 0.5, %v1121_v61  ;;  %v657_v47 = vpop.xlane.xlu0 %656  ;;  %v816_v52 = vpop.xlane.xlu2 %815  ;;  %2163 = vmatpush.bf16.msrb.mxu1 %v4940_v36 }
 0x303   : > { %v696_v29 = vmul.f32 %v6522_v13, %v657_v47  ;;  %v852_v24 = vmul.f32 %v816_v52, %v6522_v13  ;;  %v812_v8 = vpop.xlane.xlu1 %811 }
 0x304   : > { %v1123_v28 = vsub.f32 1.5, %v1122_v25  ;;  %v850_v10 = vmul.f32 %v812_v8, %v6522_v13 }
 0x305   : > { %v7364_v4 = vpop.eup %5753  ;;  %v7368_v44 = vsub.f32 %v7164_v21, %v696_v29  ;;  %v7377_v27 = vadd.f32 1e-05, %v852_v24  ;;  %v1466_v25 = vpop.f32.mrf.mxu0  ;;  %v1263_v29 = vmul.f32 %v7219_v18, %v1231_v59 }
 0x306   : > { %v1124_v26 = vmul.f32 %v5752_v43, %v1123_v28  ;;  %v1130_v2 = vmul.f32 %v7364_v4, %v7354_v3  ;;  %v7384_v61 = vadd.f32 1e-05, %v850_v10  ;;  %v1555_v47 = vpop.f32.mrf.mxu1  ;;  %v1467_v62 = vadd.f32 %v1466_v25, %v6877_v30 }
 0x307   : > { %v760_v21 = vmul.f32 %v7368_v44, %v7368_v44  ;;  %5755 = vrsqrt.f32 %v7377_v27  ;;  %vm1136_vm9 = vweird.f32 %v7364_v4  ;;  %v1556_v36 = vadd.f32 %v1555_v47, %v6904_v15 }
 0x308   : > { %v1131_v35 = vmul.f32 %v7364_v4, %v1130_v2  ;;  %v1128_v19 = vsel %vm1127_vm8, %v5752_v43, %v1124_v26  ;;  %5757 = vrsqrt.f32 %v7384_v61  ;;  %v1295_v43 = vadd.f32 %v7243_v11, %v1263_v29  ;;  %vm7414_vm12 = vmor %vm1135_vm10, %vm1136_vm9 }
 0x309   : > { %823 = vadd.xlane.f32.xlu0 %v760_v21  ;;  %v1232_v60 = vmul.f32 %v1128_v19, %v7089_v40  ;;  %vm1145_vm11 = vweird.f32 %v7384_v61  ;;  %vm1165_vm1 = vweird.f32 %v7377_v27 }
 0x30a   : > { %v1132_v28 = vmul.f32 0.5, %v1131_v35  ;;  %v818_v42 = vpop.xlane.xlu0 %817 }
 0x30b   : > { %v1264_v52 = vmul.f32 %v7219_v18, %v1232_v60  ;;  %v814_v24 = vpop.xlane.xlu1 %813  ;;  %v853_v40 = vmul.f32 %v818_v42, %v6522_v13 }
 0x30c   : > { %v1133_v14 = vsub.f32 1.5, %v1132_v28  ;;  %v851_v56 = vmul.f32 %v814_v24, %v6522_v13  ;;  %v1917_v33 = vpop.f32.mrf.mxu2 }
 0x30d   : > { %v1296_v8 = vadd.f32 %v7243_v11, %v1264_v52  ;;  %v7396_v59 = vpop.eup %5755  ;;  %v1918_v26 = vadd.f32 %v1917_v33, %v7198_v45  ;;  %v2006_v19 = vpop.f32.mrf.mxu3  ;;  %v1628_v52 = vmax.f32 %v1467_v62, 0.0  ;;  %v7410_v47 = vadd.f32 1e-05, %v853_v40 }
 0x30e   : > { %v5758_v10 = vpop.eup %5757  ;;  %v1134_v21 = vmul.f32 %v7364_v4, %v1133_v14  ;;  %v7402_v35 = vadd.f32 1e-05, %v851_v56  ;;  %v1160_v25 = vmul.f32 %v7396_v59, %v7377_v27  ;;  %v1468_v29 = vpop.f32.mrf.mxu0  ;;  %v4865_v56 = vld [vmem:[#allocation10 + $0x38] sm:$0xf0]  ;;  %v1629_v40 = vmax.f32 %v1556_v36, 0.0 }
 0x30f   : > { %v1316_v2 = vpack.c.bf16 %v1296_v8, %v1295_v43  ;;  %v1140_v60 = vmul.f32 %v5758_v10, %v7384_v61  ;;  %v1557_v28 = vpop.f32.mrf.mxu1  ;;  %v1469_v42 = vadd.f32 %v1468_v29, %v6877_v30  ;;  %v7420_v43 = vadd.f32 %v2006_v19, %v1918_v26  ;;  %v5381_v8 = vld [vmem:[#allocation10 + $0x34] sm:$0xf]  ;;  %v4929_v61 = vld [vmem:[#allocation10 + $0xb8] sm:$0xf0] }
 0x310   : > { %5759 = vrsqrt.f32 %v7402_v35  ;;  %v1558_v24 = vadd.f32 %v1557_v28, %v6904_v15  ;;  %v1138_v62 = vsel %vm7414_vm12, %v7364_v4, %v1134_v21  ;;  %vm1146_vm13 = vweird.f32 %v5758_v10 }
 0x311   : > { %1485 = vmatmul.bf16.gmra.mxu0 %v1316_v2  ;;  %1574 = vmatmul.bf16.gmra.mxu1 %v1316_v2  ;;  %v1141_v14 = vmul.f32 %v5758_v10, %v1140_v60  ;;  %8701 = vst [vmem:[#allocation33_spill] sm:$0xff] %v7420_v43  ;;  %v4868_v33 = vor.u32 %v5381_v8, %v4865_v56  ;;  %v1630_v23 = vmax.f32 %v1469_v42, 0.0  ;;  %5761 = vrsqrt.f32 %v7410_v47  ;;  %vm1147_vm14 = vmor %vm1145_vm11, %vm1146_vm13 }
 0x312   : > { %v1161_v2 = vmul.f32 %v7396_v59, %v1160_v25  ;;  %v1631_v60 = vmax.f32 %v1558_v24, 0.0  ;;  %v1233_v36 = vmul.f32 %v1138_v62, %v7110_v50  ;;  %vm1155_vm15 = vweird.f32 %v7402_v35 }
 0x313   : > { %v1142_v39 = vmul.f32 0.5, %v1141_v14  ;;  %v820_v20 = vpop.xlane.xlu1 %819  ;;  %2075 = vmatpush.bf16.msrb.mxu0 %v4868_v33  ;;  %v7430_v19 = vpack.c.bf16 %v1630_v23, %v1628_v52  ;;  %v5397_v14 = vld [vmem:[#allocation10 + $0xb4] sm:$0xf]  ;;  %vm1166_vm2 = vweird.f32 %v7396_v59  ;;  %vm1175_vm7 = vweird.f32 %v7410_v47 }
 0x314   : > { %v854_v29 = vmul.f32 %v820_v20, %v6522_v13  ;;  %v7427_v28 = vpop.f32.mrf.mxu2  ;;  %v7432_v4 = vpack.c.bf16 %v1631_v60, %v1629_v40  ;;  %v1162_v3 = vmul.f32 0.5, %v1161_v2  ;;  %v1265_v56 = vmul.f32 %v7219_v18, %v1233_v36  ;;  %v5414_v60 = vld [vmem:[#allocation11 + $0x38] sm:$0xff]  ;;  %vm7481_vm4 = vmor %vm1165_vm1, %vm1166_vm2 }
 0x315   : > { %v1143_v26 = vsub.f32 1.5, %v1142_v39  ;;  %v7442_v20 = vpop.f32.mrf.mxu3  ;;  %1936 = vmatmul.bf16.gmra.mxu2 %v7430_v19  ;;  %v4932_v2 = vor.u32 %v5397_v14, %v4929_v61 }
 0x316   : > { %v7434_v21 = vpop.eup %5759  ;;  %v7440_v25 = vadd.f32 1e-05, %v854_v29  ;;  %8702 = vst [vmem:[#allocation34_spill] sm:$0xff] %v7442_v20  ;;  %2025 = vmatmul.bf16.gmra.mxu3 %v7432_v4  ;;  %v1163_v40 = vsub.f32 1.5, %v1162_v3  ;;  %v5422_v29 = vld [vmem:[#allocation11 + $0x78] sm:$0xff]  ;;  %2473 = vmatpush.bf16.msrb.mxu2 %v5414_v60  ;;  %v1297_v14 = vadd.f32 %v7243_v11, %v1265_v56 }
 0x317   : > { %v1144_v39 = vmul.f32 %v5758_v10, %v1143_v26  ;;  %v1150_v23 = vmul.f32 %v7434_v21, %v7402_v35  ;;  %v1471_v50 = vpop.f32.mrf.mxu0  ;;  %v1560_v52 = vpop.f32.mrf.mxu1  ;;  %vm1156_vm0 = vweird.f32 %v7434_v21  ;;  %2164 = vmatpush.bf16.msrb.mxu1 %v4932_v2  ;;  %2562 = vmatpush.bf16.msrb.mxu3 %v5422_v29 }
 0x318   : > { %5763 = vrsqrt.f32 %v7440_v25  ;;  %v7453_v62 = vpop.eup %5761  ;;  %vm7463_vm3 = vmor %vm1155_vm15, %vm1156_vm0  ;;  %v1561_v56 = vadd.f32 %v1560_v52, %v6904_v15  ;;  %vm1185_vm5 = vweird.f32 %v7440_v25 }
 0x319   : > { %v1148_v42 = vsel %vm1147_vm14, %v5758_v10, %v1144_v39  ;;  %v1151_v24 = vmul.f32 %v7434_v21, %v1150_v23  ;;  %v1170_v39 = vmul.f32 %v7453_v62, %v7410_v47  ;;  %vm1176_vm8 = vweird.f32 %v7453_v62 }
 0x31a   : > { %v1234_v8 = vmul.f32 %v1148_v42, %v7161_v46  ;;  %v1164_v42 = vmul.f32 %v7396_v59, %v1163_v40  ;;  %v1633_v3 = vmax.f32 %v1561_v56, 0.0  ;;  %vm7533_vm10 = vmor %vm1175_vm7, %vm1176_vm8 }
 0x31b   : > { %v1152_v33 = vmul.f32 0.5, %v1151_v24  ;;  %v1171_v27 = vmul.f32 %v7453_v62, %v1170_v39 }
 0x31c   : > { %v1266_v26 = vmul.f32 %v7219_v18, %v1234_v8  ;;  %v1472_v8 = vadd.f32 %v1471_v50, %v6877_v30  ;;  %v1168_v52 = vsel %vm7481_vm4, %v7396_v59, %v1164_v42 }
 0x31d   : > { %v1153_v46 = vsub.f32 1.5, %v1152_v33  ;;  %v1236_v39 = vmul.f32 %v1168_v52, %v7158_v5 }
 0x31e   : > { %v1922_v10 = vpop.f32.mrf.mxu2  ;;  %v7459_v36 = vpop.eup %5763  ;;  %v1298_v61 = vadd.f32 %v7243_v11, %v1266_v26 }
 0x31f   : > { %v1923_v23 = vadd.f32 %v1922_v10, %v7198_v45  ;;  %v1154_v24 = vmul.f32 %v7434_v21, %v1153_v46  ;;  %v1180_v35 = vmul.f32 %v7459_v36, %v7440_v25  ;;  %v2011_v33 = vpop.f32.mrf.mxu3  ;;  %v1473_v60 = vpop.f32.mrf.mxu0  ;;  %v1268_v56 = vmul.f32 %v7219_v18, %v1236_v39  ;;  %v5393_v39 = vld [vmem:[#allocation10 + $0x94] sm:$0xf] }
 0x320   : > { %v1562_v40 = vpop.f32.mrf.mxu1  ;;  %v1317_v26 = vpack.c.bf16 %v1298_v61, %v1297_v14  ;;  %v1474_v10 = vadd.f32 %v1473_v60, %v6877_v30  ;;  %v1172_v60 = vmul.f32 0.5, %v1171_v27  ;;  %vm1186_vm6 = vweird.f32 %v7459_v36 }
 0x321   : > { %v7486_v29 = vadd.f32 %v2011_v33, %v1923_v23  ;;  %v1158_v50 = vsel %vm7463_vm3, %v7434_v21, %v1154_v24  ;;  %v1181_v46 = vmul.f32 %v7459_v36, %v1180_v35  ;;  %v1563_v43 = vadd.f32 %v1562_v40, %v6904_v15  ;;  %vm7523_vm9 = vmor %vm1185_vm5, %vm1186_vm6 }
 0x322   : > { %1490 = vmatmul.bf16.gmra.mxu0 %v1317_v26  ;;  %1579 = vmatmul.bf16.gmra.mxu1 %v1317_v26  ;;  %v1632_v23 = vmax.f32 %v1472_v8, 0.0  ;;  %v1634_v14 = vmax.f32 %v1474_v10, 0.0  ;;  %v1235_v61 = vmul.f32 %v1158_v50, %v7217_v55  ;;  %v1173_v8 = vsub.f32 1.5, %v1172_v60  ;;  %v5379_v26 = vld [vmem:[#allocation10 + $0x24] sm:$0xf] }
 0x323   : > { %8707 = vst [vmem:[#allocation35_spill] sm:$0xff] %v7486_v29  ;;  %v1635_v21 = vmax.f32 %v1563_v43, 0.0  ;;  %v1182_v24 = vmul.f32 0.5, %v1181_v46  ;;  %v4857_v50 = vld [vmem:[#allocation10 + $0x28] sm:$0xf0] }
 0x324   : > { %v7499_v35 = vpack.c.bf16 %v1634_v14, %v1632_v23  ;;  %v1267_v43 = vmul.f32 %v7219_v18, %v1235_v61  ;;  %v4860_v5 = vor.u32 %v5379_v26, %v4857_v50  ;;  %v5395_v46 = vld [vmem:[#allocation10 + $0xa4] sm:$0xf]  ;;  %v4921_v10 = vld [vmem:[#allocation10 + $0xa8] sm:$0xf0]  ;;  %v5413_v23 = vld [vmem:[#allocation11 + $0x30] sm:$0xff]  ;;  %v1174_v26 = vmul.f32 %v7453_v62, %v1173_v8 }
 0x325   : > { %v7504_v40 = vpack.c.bf16 %v1635_v21, %v1633_v3  ;;  %v1183_v42 = vsub.f32 1.5, %v1182_v24  ;;  %v4924_v52 = vor.u32 %v5395_v46, %v4921_v10  ;;  %v5421_v14 = vld [vmem:[#allocation11 + $0x70] sm:$0xff]  ;;  %v4849_v24 = vld [vmem:[#allocation10 + $0x18] sm:$0xf0]  ;;  %v1300_v46 = vadd.f32 %v7243_v11, %v1268_v56  ;;  %2474 = vmatpush.bf16.msrb.mxu2 %v5413_v23  ;;  %v5412_v29 = vld [vmem:[#allocation11 + $0x28] sm:$0xff] }
 0x326   : > { %v7501_v33 = vpop.f32.mrf.mxu2  ;;  %1941 = vmatmul.bf16.gmra.mxu2 %v7499_v35  ;;  %v1299_v27 = vadd.f32 %v7243_v11, %v1267_v43  ;;  %v5377_v61 = vld [vmem:[#allocation10 + $0x14] sm:$0xf]  ;;  %2076 = vmatpush.bf16.msrb.mxu0 %v4860_v5  ;;  %v4913_v60 = vld [vmem:[#allocation10 + $0x98] sm:$0xf0] }
 0x327   : > { %8708 = vst [vmem:[#allocation36_spill] sm:$0xff] %v7501_v33  ;;  %v7507_v2 = vpop.f32.mrf.mxu3  ;;  %2030 = vmatmul.bf16.gmra.mxu3 %v7504_v40  ;;  %v1476_v59 = vpop.f32.mrf.mxu0  ;;  %v1184_v3 = vmul.f32 %v7459_v36, %v1183_v42  ;;  %2165 = vmatpush.bf16.msrb.mxu1 %v4924_v52  ;;  %v4852_v10 = vor.u32 %v5377_v61, %v4849_v24  ;;  %v5420_v33 = vld [vmem:[#allocation11 + $0x68] sm:$0xff] }
 0x328   : > { %8709 = vst [vmem:[#allocation37_spill] sm:$0xff] %v7507_v2  ;;  %v1565_v55 = vpop.f32.mrf.mxu1  ;;  %v1477_v25 = vadd.f32 %v1476_v59, %v6877_v30  ;;  %2563 = vmatpush.bf16.msrb.mxu3 %v5421_v14  ;;  %v1318_v2 = vpack.c.bf16 %v1300_v46, %v1299_v27 }
 0x329   : > { %v1566_v8 = vadd.f32 %v1565_v55, %v6904_v15  ;;  %v1188_v47 = vsel %vm7523_vm9, %v7459_v36, %v1184_v3  ;;  %v1178_v55 = vsel %vm7533_vm10, %v7453_v62, %v1174_v26  ;;  %2475 = vmatpush.bf16.msrb.mxu2 %v5412_v29 }
 0x32a   : > { %2077 = vmatpush.bf16.msrb.mxu0 %v4852_v10  ;;  %v1636_v14 = vmax.f32 %v1477_v25, 0.0  ;;  %v1237_v50 = vmul.f32 %v1178_v55, %v7211_v12 }
 0x32b   : > { %v1637_v61 = vmax.f32 %v1566_v8, 0.0 }
 0x32c   : > { %2564 = vmatpush.bf16.msrb.mxu3 %v5420_v33 }
 0x32e   : > { %v1927_v21 = vpop.f32.mrf.mxu2 }
 0x32f   : > { %v1928_v43 = vadd.f32 %v1927_v21, %v7198_v45  ;;  %v2016_v5 = vpop.f32.mrf.mxu3  ;;  %v4916_v21 = vor.u32 %v5393_v39, %v4913_v60  ;;  %v1478_v56 = vpop.f32.mrf.mxu0  ;;  %v1238_v39 = vmul.f32 %v1188_v47, %v7263_v57  ;;  %v1269_v57 = vmul.f32 %v7219_v18, %v1237_v50 }
 0x330   : > { %v1567_v52 = vpop.f32.mrf.mxu1  ;;  %v1479_v20 = vadd.f32 %v1478_v56, %v6877_v30 }
 0x331   : > { %v7539_v23 = vadd.f32 %v2016_v5, %v1928_v43  ;;  %v1568_v59 = vadd.f32 %v1567_v52, %v6904_v15  ;;  %2166 = vmatpush.bf16.msrb.mxu1 %v4916_v21  ;;  %v1270_v29 = vmul.f32 %v7219_v18, %v1238_v39  ;;  %v1301_v46 = vadd.f32 %v7243_v11, %v1269_v57 }
 0x332   : > { %1495 = vmatmul.bf16.gmra.mxu0 %v1318_v2  ;;  %1584 = vmatmul.bf16.gmra.mxu1 %v1318_v2  ;;  %v1638_v24 = vmax.f32 %v1479_v20, 0.0 }
 0x333   : > { %v1639_v27 = vmax.f32 %v1568_v59, 0.0  ;;  %v1302_v33 = vadd.f32 %v7243_v11, %v1270_v29  ;;  %v5391_v29 = vld [vmem:[#allocation10 + $0x84] sm:$0xf] }
 0x334   : > { %v7550_v36 = vpack.c.bf16 %v1638_v24, %v1636_v14 }
 0x335   : > { %v7552_v3 = vpack.c.bf16 %v1639_v27, %v1637_v61  ;;  %v1319_v21 = vpack.c.bf16 %v1302_v33, %v1301_v46  ;;  %v822_v27 = vpop.xlane.xlu2 %821  ;;  %v4905_v33 = vld [vmem:[#allocation10 + $0x88] sm:$0xf0] }
 0x336   : > { %v7554_v60 = vpop.f32.mrf.mxu2  ;;  %1946 = vmatmul.bf16.gmra.mxu2 %v7550_v36  ;;  %v855_v39 = vmul.f32 %v822_v27, %v6522_v13 }
 0x337   : > { %v7558_v62 = vpop.f32.mrf.mxu3  ;;  %2035 = vmatmul.bf16.gmra.mxu3 %v7552_v3  ;;  %v1481_v20 = vpop.f32.mrf.mxu0 }
 0x338   : > { %v1570_v2 = vpop.f32.mrf.mxu1  ;;  %v1482_v12 = vadd.f32 %v1481_v20, %v6877_v30  ;;  %v887_v50 = vadd.f32 1e-05, %v855_v39  ;;  %v5375_v20 = vld [vmem:[#allocation10 + $0x4] sm:$0xf] }
 0x339   : > { %v1571_v42 = vadd.f32 %v1570_v2, %v6904_v15  ;;  %v4841_v2 = vld [vmem:[#allocation10 + $0x8] sm:$0xf0] }
 0x33a   : > { %v1640_v47 = vmax.f32 %v1482_v12, 0.0  ;;  %5765 = vrsqrt.f32 %v887_v50  ;;  %v4844_v57 = vor.u32 %v5375_v20, %v4841_v2  ;;  %vm1195_vm11 = vweird.f32 %v887_v50 }
 0x33b   : > { %v1641_v59 = vmax.f32 %v1571_v42, 0.0 }
 0x33c   : > { %2078 = vmatpush.bf16.msrb.mxu0 %v4844_v57 }
 0x33e   : > { %v1932_v26 = vpop.f32.mrf.mxu2 }
 0x33f   : > { %v1933_v43 = vadd.f32 %v1932_v26, %v7198_v45  ;;  %v2021_v25 = vpop.f32.mrf.mxu3  ;;  %v1483_v8 = vpop.f32.mrf.mxu0 }
 0x340   : > { %v1572_v5 = vpop.f32.mrf.mxu1  ;;  %v1484_v56 = vadd.f32 %v1483_v8, %v6877_v30  ;;  %v5766_v26 = vpop.eup %5765 }
 0x341   : > { %v7568_v10 = vadd.f32 %v2021_v25, %v1933_v43  ;;  %v1573_v52 = vadd.f32 %v1572_v5, %v6904_v15  ;;  %v4908_v43 = vor.u32 %v5391_v29, %v4905_v33  ;;  %v1190_v46 = vmul.f32 %v5766_v26, %v887_v50 }
 0x342   : > { %1500 = vmatmul.bf16.gmra.mxu0 %v1319_v21  ;;  %1589 = vmatmul.bf16.gmra.mxu1 %v1319_v21  ;;  %v1642_v55 = vmax.f32 %v1484_v56, 0.0  ;;  %v5411_v21 = vld [vmem:[#allocation11 + $0x20] sm:$0xff]  ;;  %vm1196_vm12 = vweird.f32 %v5766_v26 }
 0x343   : > { %v1643_v14 = vmax.f32 %v1573_v52, 0.0  ;;  %2167 = vmatpush.bf16.msrb.mxu1 %v4908_v43  ;;  %v1191_v12 = vmul.f32 %v5766_v26, %v1190_v46  ;;  %v5419_v56 = vld [vmem:[#allocation11 + $0x60] sm:$0xff]  ;;  %2476 = vmatpush.bf16.msrb.mxu2 %v5411_v21  ;;  %vm1197_vm13 = vmor %vm1195_vm11, %vm1196_vm12 }
 0x344   : > { %v7572_v61 = vpack.c.bf16 %v1642_v55, %v1640_v47  ;;  %2565 = vmatpush.bf16.msrb.mxu3 %v5419_v56 }
 0x345   : > { %v7574_v24 = vpack.c.bf16 %v1643_v14, %v1641_v59  ;;  %v1192_v5 = vmul.f32 0.5, %v1191_v12 }
 0x346   : > { %1951 = vmatmul.bf16.gmra.mxu2 %v7572_v61  ;;  %v7583_v46 = vpop.f32.mrf.mxu2 }
 0x347   : > { %2040 = vmatmul.bf16.gmra.mxu3 %v7574_v24  ;;  %v1193_v52 = vsub.f32 1.5, %v1192_v5  ;;  %v7585_v12 = vpop.f32.mrf.mxu3 }
 0x349   : > { %v1194_v59 = vmul.f32 %v5766_v26, %v1193_v52 }
 0x34b   : > { %v1198_v27 = vsel %vm1197_vm13, %v5766_v26, %v1194_v59 }
 0x34c   : > { %v1239_v29 = vmul.f32 %v1198_v27, %v7286_v31 }
 0x34e   : > { %v1271_v43 = vmul.f32 %v7219_v18, %v1239_v29 }
 0x37c   : > { %v824_v42 = vpop.xlane.xlu0 %823 }
 0x37d   : > { %v856_v25 = vmul.f32 %v824_v42, %v6522_v13 }
 0x37f   : > { %v888_v8 = vadd.f32 1e-05, %v856_v25 }
 0x381   : > { %5767 = vrsqrt.f32 %v888_v8  ;;  %vm1205_vm15 = vweird.f32 %v888_v8 }
 0x387   : > { %v5768_v47 = vpop.eup %5767 }
 0x388   : > { %v1200_v55 = vmul.f32 %v5768_v47, %v888_v8  ;;  %vm1206_vm14 = vweird.f32 %v5768_v47 }
 0x389   : > { %vm1207_vm0 = vmor %vm1205_vm15, %vm1206_vm14 }
 0x38a   : > { %v1201_v14 = vmul.f32 %v5768_v47, %v1200_v55 }
 0x38c   : > { %v1202_v39 = vmul.f32 0.5, %v1201_v14 }
 0x38e   : > { %v1203_v20 = vsub.f32 1.5, %v1202_v39  ;;  %v1486_v13 = vpop.f32.mrf.mxu0  ;;  %v1575_v2 = vpop.f32.mrf.mxu1 }
 0x38f   : > { %v1487_v26 = vadd.f32 %v1486_v13, %v6877_v30  ;;  %v1576_v42 = vadd.f32 %v1575_v2, %v6904_v15 }
 0x390   : > { %v1204_v57 = vmul.f32 %v5768_v47, %v1203_v20 }
 0x391   : > { %v1644_v52 = vmax.f32 %v1487_v26, 0.0 }
 0x392   : > { %v1208_v33 = vsel %vm1207_vm0, %v5768_v47, %v1204_v57  ;;  %v1645_v47 = vmax.f32 %v1576_v42, 0.0  ;;  %v5410_v57 = vld [vmem:[#allocation11 + $0x18] sm:$0xff] }
 0x393   : > { %v1240_v50 = vmul.f32 %v1208_v33, %v7368_v44  ;;  %v1303_v44 = vadd.f32 %v7243_v11, %v1271_v43  ;;  %v5418_v33 = vld [vmem:[#allocation11 + $0x58] sm:$0xff]  ;;  %2477 = vmatpush.bf16.msrb.mxu2 %v5410_v57 }
 0x394   : > { %2566 = vmatpush.bf16.msrb.mxu3 %v5418_v33 }
 0x395   : > { %v1272_v25 = vmul.f32 %v7219_v18, %v1240_v50 }
 0x396   : > { %v1488_v5 = vpop.f32.mrf.mxu0  ;;  %v1577_v31 = vpop.f32.mrf.mxu1 }
 0x397   : > { %v1489_v8 = vadd.f32 %v1488_v5, %v6877_v30  ;;  %v1578_v21 = vadd.f32 %v1577_v31, %v6904_v15  ;;  %v1304_v56 = vadd.f32 %v7243_v11, %v1272_v25 }
 0x398   : > { %v1937_v39 = vpop.f32.mrf.mxu2 }
 0x399   : > { %v1646_v59 = vmax.f32 %v1489_v8, 0.0  ;;  %v1647_v55 = vmax.f32 %v1578_v21, 0.0  ;;  %v1320_v14 = vpack.c.bf16 %v1304_v56, %v1303_v44  ;;  %v2026_v20 = vpop.f32.mrf.mxu3  ;;  %v1938_v13 = vadd.f32 %v1937_v39, %v7198_v45 }
 0x39b   : > { %1505 = vmatmul.bf16.gmra.mxu0 %v1320_v14  ;;  %1594 = vmatmul.bf16.gmra.mxu1 %v1320_v14  ;;  %v7594_v27 = vpack.c.bf16 %v1646_v59, %v1644_v52  ;;  %v7596_v18 = vpack.c.bf16 %v1647_v55, %v1645_v47  ;;  %v7601_v11 = vadd.f32 %v2026_v20, %v1938_v13 }
 0x39d   : > { %1956 = vmatmul.bf16.gmra.mxu2 %v7594_v27  ;;  %2045 = vmatmul.bf16.gmra.mxu3 %v7596_v18 }
 0x39f   : > { %v1491_v2 = vpop.f32.mrf.mxu0  ;;  %v1580_v29 = vpop.f32.mrf.mxu1 }
 0x3a0   : > { %v7603_v50 = vpop.f32.mrf.mxu2  ;;  %v1492_v26 = vadd.f32 %v1491_v2, %v6877_v30  ;;  %v1581_v42 = vadd.f32 %v1580_v29, %v6904_v15 }
 0x3a1   : > { %v7605_v43 = vpop.f32.mrf.mxu3 }
 0x3a2   : > { %v1648_v21 = vmax.f32 %v1492_v26, 0.0  ;;  %v1649_v44 = vmax.f32 %v1581_v42, 0.0  ;;  %v5409_v42 = vld [vmem:[#allocation11 + $0x10] sm:$0xff] }
 0x3a3   : > { %2478 = vmatpush.bf16.msrb.mxu2 %v5409_v42 }
 0x3a7   : > { %v1493_v25 = vpop.f32.mrf.mxu0  ;;  %v1582_v5 = vpop.f32.mrf.mxu1 }
 0x3a8   : > { %v1494_v31 = vadd.f32 %v1493_v25, %v6877_v30  ;;  %v1583_v8 = vadd.f32 %v1582_v5, %v6904_v15  ;;  %v5417_v25 = vld [vmem:[#allocation11 + $0x50] sm:$0xff] }
 0x3a9   : > { %v1942_v47 = vpop.f32.mrf.mxu2  ;;  %2567 = vmatpush.bf16.msrb.mxu3 %v5417_v25 }
 0x3aa   : > { %v1650_v56 = vmax.f32 %v1494_v31, 0.0  ;;  %v1651_v52 = vmax.f32 %v1583_v8, 0.0  ;;  %v1943_v59 = vadd.f32 %v1942_v47, %v7198_v45  ;;  %v2031_v55 = vpop.f32.mrf.mxu3 }
 0x3ab   : > { %2079 = vmatmul.bf16.vlgmr.msrb.gmra.mxu0 %v6963_v53  ;;  %2168 = vmatmul.bf16.vlgmr.msrb.gmra.mxu1 %v6967_v17 }
 0x3ac   : > { %v7614_v14 = vpack.c.bf16 %v1650_v56, %v1648_v21  ;;  %v7616_v39 = vpack.c.bf16 %v1651_v52, %v1649_v44  ;;  %v7618_v20 = vadd.f32 %v2031_v55, %v1943_v59 }
 0x3ae   : > { %1961 = vmatmul.bf16.gmra.mxu2 %v7614_v14  ;;  %2050 = vmatmul.bf16.gmra.mxu3 %v7616_v39 }
 0x3af   : > { %v1496_v53 = vpop.f32.mrf.mxu0  ;;  %v1585_v17 = vpop.f32.mrf.mxu1 }
 0x3b0   : > { %v1497_v29 = vadd.f32 %v1496_v53, %v6877_v30  ;;  %v1586_v57 = vadd.f32 %v1585_v17, %v6904_v15 }
 0x3b1   : > { %v7622_v13 = vpop.f32.mrf.mxu2 }
 0x3b2   : > { %v7624_v2 = vpop.f32.mrf.mxu3  ;;  %v1652_v8 = vmax.f32 %v1497_v29, 0.0  ;;  %v1653_v21 = vmax.f32 %v1586_v57, 0.0 }
 0x3b7   : > { %v1498_v33 = vpop.f32.mrf.mxu0  ;;  %v1587_v26 = vpop.f32.mrf.mxu1 }
 0x3b8   : > { %v1499_v5 = vadd.f32 %v1498_v33, %v6877_v30  ;;  %v1588_v31 = vadd.f32 %v1587_v26, %v6904_v15 }
 0x3b9   : > { %v1947_v52 = vpop.f32.mrf.mxu2 }
 0x3ba   : > { %v1654_v44 = vmax.f32 %v1499_v5, 0.0  ;;  %v1655_v56 = vmax.f32 %v1588_v31, 0.0  ;;  %v1948_v47 = vadd.f32 %v1947_v52, %v7198_v45  ;;  %v2036_v59 = vpop.f32.mrf.mxu3 }
 0x3bb   : > { %2084 = vmatmul.bf16.gmra.mxu0 %v7034_v32  ;;  %2173 = vmatmul.bf16.gmra.mxu1 %v7036_v63 }
 0x3bc   : > { %v7633_v55 = vpack.c.bf16 %v1654_v44, %v1652_v8  ;;  %v7635_v53 = vpack.c.bf16 %v1655_v56, %v1653_v21  ;;  %v7637_v17 = vadd.f32 %v2036_v59, %v1948_v47  ;;  %v5408_v8 = vld [vmem:[#allocation11 + $0x8] sm:$0xff] }
 0x3bd   : > { %v5416_v21 = vld [vmem:[#allocation11 + $0x48] sm:$0xff]  ;;  %2479 = vmatpush.bf16.msrb.mxu2 %v5408_v8 }
 0x3be   : > { %8714 = vst [vmem:[#allocation38_spill] sm:$0xff] %v7637_v17  ;;  %1966 = vmatmul.bf16.gmra.mxu2 %v7633_v55  ;;  %2055 = vmatmul.bf16.gmra.mxu3 %v7635_v53 }
 0x3bf   : > { %v1501_v32 = vpop.f32.mrf.mxu0  ;;  %v1590_v63 = vpop.f32.mrf.mxu1  ;;  %2568 = vmatpush.bf16.msrb.mxu3 %v5416_v21 }
 0x3c0   : > { %v1502_v33 = vadd.f32 %v1501_v32, %v6877_v30  ;;  %v1591_v26 = vadd.f32 %v1590_v63, %v6904_v15 }
 0x3c1   : > { %v7641_v29 = vpop.f32.mrf.mxu2 }
 0x3c2   : > { %v7643_v57 = vpop.f32.mrf.mxu3  ;;  %v1656_v44 = vmax.f32 %v1502_v33, 0.0  ;;  %v1657_v56 = vmax.f32 %v1591_v26, 0.0 }
 0x3c7   : > { %v1503_v42 = vpop.f32.mrf.mxu0  ;;  %v1592_v25 = vpop.f32.mrf.mxu1 }
 0x3c8   : > { %v1504_v5 = vadd.f32 %v1503_v42, %v6877_v30  ;;  %v1593_v31 = vadd.f32 %v1592_v25, %v6904_v15 }
 0x3c9   : > { %v1952_v59 = vpop.f32.mrf.mxu2 }
 0x3ca   : > { %v1658_v52 = vmax.f32 %v1504_v5, 0.0  ;;  %v1659_v47 = vmax.f32 %v1593_v31, 0.0  ;;  %v1953_v32 = vadd.f32 %v1952_v59, %v7198_v45  ;;  %v2041_v63 = vpop.f32.mrf.mxu3  ;;  %v1905_v59 = vadd.f32 %v7266_v22, %v7198_v45 }
 0x3cb   : > { %2089 = vmatmul.bf16.gmra.mxu0 %v7064_v38  ;;  %2178 = vmatmul.bf16.gmra.mxu1 %v7066_v48  ;;  %v5407_v38 = vld [vmem:[#allocation11] sm:$0xff] }
 0x3cc   : > { %v7652_v17 = vpack.c.bf16 %v1658_v52, %v1656_v44  ;;  %v7654_v42 = vpack.c.bf16 %v1659_v47, %v1657_v56  ;;  %v7656_v25 = vadd.f32 %v2041_v63, %v1953_v32  ;;  %2480 = vmatpush.bf16.msrb.mxu2 %v5407_v38  ;;  %v5415_v48 = vld [vmem:[#allocation11 + $0x40] sm:$0xff]  ;;  %v5835_v38 = vld [vmem:[#allocation7 + $0x3] ss:$8 sm:$0x3] }
 0x3cd   : > { %2569 = vmatpush.bf16.msrb.mxu3 %v5415_v48  ;;  %v7693_v48 = vperm.slane %v5835_v38, 1  ;;  %v5437_v38 = vld [vmem:[#allocation13 + $0x74] sm:$0xf] }
 0x3ce   : > { %1971 = vmatmul.bf16.gmra.mxu2 %v7652_v17  ;;  %2060 = vmatmul.bf16.gmra.mxu3 %v7654_v42 }
 0x3d1   : > { %v7668_v26 = vpop.f32.mrf.mxu2 }
 0x3db   : > { %2094 = vmatmul.bf16.gmra.mxu0 %v7139_v54  ;;  %2183 = vmatmul.bf16.gmra.mxu1 %v7148_v37  ;;  %v7670_v37 = vpop.f32.mrf.mxu3 }
 0x3eb   : > { %2099 = vmatmul.bf16.gmra.mxu0 %v7250_v34  ;;  %2188 = vmatmul.bf16.gmra.mxu1 %v7252_v41 }
 0x3fb   : > { %2104 = vmatmul.bf16.gmra.mxu0 %v7313_v49  ;;  %2193 = vmatmul.bf16.gmra.mxu1 %v7315_v0 }
 0x40b   : > { %2109 = vmatmul.bf16.gmra.mxu0 %v7344_v1  ;;  %2198 = vmatmul.bf16.gmra.mxu1 %v7346_v6 }
 0x418   : > { %v1506_v33 = vpop.f32.mrf.mxu0  ;;  %v1595_v54 = vpop.f32.mrf.mxu1 }
 0x419   : > { %v1507_v34 = vadd.f32 %v1506_v33, %v6877_v30  ;;  %v1596_v41 = vadd.f32 %v1595_v54, %v6904_v15  ;;  %v1994_v33 = vadd.f32 %v7268_v51, %v1905_v59  ;;  %v1910_v59 = vadd.f32 %v7322_v7, %v7198_v45 }
 0x41b   : > { %2114 = vmatmul.bf16.gmra.mxu0 %v7430_v19  ;;  %2203 = vmatmul.bf16.gmra.mxu1 %v7432_v4  ;;  %v1660_v21 = vmax.f32 %v1507_v34, 0.0  ;;  %v1661_v44 = vmax.f32 %v1596_v41, 0.0 }
 0x420   : > { %v1508_v49 = vpop.f32.mrf.mxu0  ;;  %v1597_v0 = vpop.f32.mrf.mxu1 }
 0x421   : > { %v1509_v1 = vadd.f32 %v1508_v49, %v6877_v30  ;;  %v1598_v6 = vadd.f32 %v1597_v0, %v6904_v15  ;;  %v1957_v5 = vpop.f32.mrf.mxu2  ;;  %v2046_v31 = vpop.f32.mrf.mxu3  ;;  %v2251_v49 = vmax.f32 %v1994_v33, 0.0  ;;  %v5153_v33 = vld [vmem:[#allocation13 + $0x78] sm:$0xf0] }
 0x422   : > { %v1958_v8 = vadd.f32 %v1957_v5, %v7198_v45 }
 0x423   : > { %v1662_v56 = vmax.f32 %v1509_v1, 0.0  ;;  %v1663_v19 = vmax.f32 %v1598_v6, 0.0  ;;  %v2249_v1 = vmax.f32 %v7241_v16, 0.0 }
 0x424   : > { %v7679_v52 = vadd.f32 %v2046_v31, %v1958_v8 }
 0x425   : > { %v7681_v4 = vpack.c.bf16 %v1662_v56, %v1660_v21  ;;  %v7683_v47 = vpack.c.bf16 %v1663_v19, %v1661_v44 }
 0x427   : > { %1976 = vmatmul.bf16.gmra.mxu2 %v7681_v4  ;;  %2065 = vmatmul.bf16.gmra.mxu3 %v7683_v47 }
 0x428   : > { %v2080_v30 = vpop.f32.mrf.mxu0  ;;  %v2169_v15 = vpop.f32.mrf.mxu1 }
 0x429   : > { %v7689_v32 = vpop.f32.mrf.mxu2  ;;  %v7691_v63 = vpop.f32.mrf.mxu3  ;;  %v2081_v54 = vadd.f32 %v2080_v30, %v7693_v48  ;;  %v5151_v30 = vld [vmem:[#allocation13 + $0x70] sm:$0xf] }
 0x42b   : > { %2119 = vmatmul.bf16.gmra.mxu0 %v7499_v35  ;;  %2208 = vmatmul.bf16.gmra.mxu1 %v7504_v40  ;;  %v2170_v0 = vadd.f32 %v2169_v15, %v2081_v54  ;;  %v2313_v35 = vpack.c.bf16 %v2251_v49, %v2249_v1  ;;  %v5438_v15 = vld [vmem:[#allocation13 + $0x74] sm:$0xf0]  ;;  %v5156_v54 = vor.u32 %v5437_v38, %v5153_v33  ;;  %v8716_v38 = vld [vmem:[#allocation32_spill] sm:$0xff] }
 0x42c   : > { %v5152_v16 = vor.u32 %v5438_v15, %v5151_v30  ;;  %v1999_v49 = vadd.f32 %v7324_v9, %v1910_v59 }
 0x42d   : > { %v2250_v21 = vmax.f32 %v2170_v0, 0.0  ;;  %3340 = vmatpush.bf16.msra.mxu1 %v5156_v54 }
 0x42e   : > { %3251 = vmatpush.bf16.msra.mxu0 %v5152_v16  ;;  %v2255_v1 = vmax.f32 %v1999_v49, 0.0 }
 0x430   : > { %v2082_v34 = vpop.f32.mrf.mxu0  ;;  %v2171_v41 = vpop.f32.mrf.mxu1 }
 0x431   : > { %v2083_v22 = vadd.f32 %v2082_v34, %v7693_v48  ;;  %v1962_v6 = vpop.f32.mrf.mxu2  ;;  %v2051_v5 = vpop.f32.mrf.mxu3 }
 0x432   : > { %v1963_v8 = vadd.f32 %v1962_v6, %v7198_v45 }
 0x433   : > { %v2172_v31 = vadd.f32 %v2171_v41, %v2083_v22 }
 0x434   : > { %v7702_v44 = vadd.f32 %v2051_v5, %v1963_v8 }
 0x435   : > { %v2252_v40 = vmax.f32 %v2172_v31, 0.0  ;;  %v2253_v31 = vmax.f32 %v7300_v58, 0.0 }
 0x437   : > { %v2314_v51 = vpack.c.bf16 %v2252_v40, %v2250_v21  ;;  %2481 = vmatmul.bf16.vlgmr.msrb.gmra.mxu2 %v2313_v35 }
 0x438   : > { %v2085_v56 = vpop.f32.mrf.mxu0  ;;  %v2174_v19 = vpop.f32.mrf.mxu1 }
 0x439   : > { %2570 = vmatmul.bf16.vlgmr.msrb.gmra.mxu3 %v2314_v51  ;;  %v7706_v34 = vpop.f32.mrf.mxu2  ;;  %v7708_v41 = vpop.f32.mrf.mxu3  ;;  %v2086_v0 = vadd.f32 %v2085_v56, %v7693_v48  ;;  %v2315_v51 = vpack.c.bf16 %v2255_v1, %v2253_v31 }
 0x43b   : > { %2124 = vmatmul.bf16.gmra.mxu0 %v7550_v36  ;;  %2213 = vmatmul.bf16.gmra.mxu1 %v7552_v3  ;;  %v2175_v6 = vadd.f32 %v2174_v19, %v2086_v0  ;;  %v8715_v19 = vld [vmem:[#allocation31_spill] sm:$0xff] }
 0x43c   : > { %v1915_v59 = vadd.f32 %v8715_v19, %v7198_v45  ;;  %v5145_v19 = vld [vmem:[#allocation13 + $0x68] sm:$0xf0] }
 0x43d   : > { %v2254_v3 = vmax.f32 %v2175_v6, 0.0  ;;  %v8717_v6 = vld [vmem:[#allocation30_spill] sm:$0xff] }
 0x43e   : > { %v2004_v33 = vadd.f32 %v8716_v38, %v1915_v59 }
 0x440   : > { %v2087_v7 = vpop.f32.mrf.mxu0  ;;  %v2176_v22 = vpop.f32.mrf.mxu1 }
 0x441   : > { %v2088_v5 = vadd.f32 %v2087_v7, %v7693_v48  ;;  %v1967_v8 = vpop.f32.mrf.mxu2  ;;  %v2056_v35 = vpop.f32.mrf.mxu3  ;;  %v2259_v7 = vmax.f32 %v2004_v33, 0.0 }
 0x442   : > { %v1968_v36 = vadd.f32 %v1967_v8, %v7198_v45 }
 0x443   : > { %v2177_v21 = vadd.f32 %v2176_v22, %v2088_v5  ;;  %v2257_v5 = vmax.f32 %v8717_v6, 0.0 }
 0x444   : > { %v7717_v30 = vadd.f32 %v2056_v35, %v1968_v36 }
 0x445   : > { %v2256_v40 = vmax.f32 %v2177_v21, 0.0 }
 0x447   : > { %2486 = vmatmul.bf16.gmra.mxu2 %v2315_v51  ;;  %v2316_v9 = vpack.c.bf16 %v2256_v40, %v2254_v3  ;;  %v5143_v3 = vld [vmem:[#allocation13 + $0x60] sm:$0xf]  ;;  %v5436_v40 = vld [vmem:[#allocation13 + $0x64] sm:$0xf0] }
 0x448   : > { %v2090_v56 = vpop.f32.mrf.mxu0  ;;  %v2179_v15 = vpop.f32.mrf.mxu1 }
 0x449   : > { %2575 = vmatmul.bf16.gmra.mxu3 %v2316_v9  ;;  %v7721_v16 = vpop.f32.mrf.mxu2  ;;  %v7723_v58 = vpop.f32.mrf.mxu3  ;;  %v2091_v54 = vadd.f32 %v2090_v56, %v7693_v48  ;;  %v5144_v9 = vor.u32 %v5436_v40, %v5143_v3  ;;  %v5435_v56 = vld [vmem:[#allocation13 + $0x64] sm:$0xf]  ;;  %v8720_v3 = vld [vmem:[#allocation36_spill] sm:$0xff] }
 0x44a   : > { %v5148_v59 = vor.u32 %v5435_v56, %v5145_v19  ;;  %v1925_v40 = vadd.f32 %v8720_v3, %v7198_v45 }
 0x44b   : > { %2129 = vmatmul.bf16.gmra.mxu0 %v7572_v61  ;;  %2218 = vmatmul.bf16.gmra.mxu1 %v7574_v24  ;;  %v2180_v22 = vadd.f32 %v2179_v15, %v2091_v54  ;;  %v2317_v24 = vpack.c.bf16 %v2259_v7, %v2257_v5  ;;  %v1920_v54 = vadd.f32 %v7427_v28, %v7198_v45 }
 0x44c   : > { %3252 = vmatpush.bf16.msra.mxu0 %v5144_v9  ;;  %3341 = vmatpush.bf16.msra.mxu1 %v5148_v59  ;;  %v8721_v9 = vld [vmem:[#allocation37_spill] sm:$0xff] }
 0x44d   : > { %v2258_v21 = vmax.f32 %v2180_v22, 0.0  ;;  %v2014_v56 = vadd.f32 %v8721_v9, %v1925_v40 }
 0x450   : > { %v2092_v49 = vpop.f32.mrf.mxu0  ;;  %v2181_v0 = vpop.f32.mrf.mxu1 }
 0x451   : > { %v2093_v1 = vadd.f32 %v2092_v49, %v7693_v48  ;;  %v1972_v31 = vpop.f32.mrf.mxu2  ;;  %v2061_v61 = vpop.f32.mrf.mxu3  ;;  %v8718_v49 = vld [vmem:[#allocation34_spill] sm:$0xff] }
 0x452   : > { %v1973_v35 = vadd.f32 %v1972_v31, %v7198_v45 }
 0x453   : > { %v2182_v8 = vadd.f32 %v2181_v0, %v2093_v1  ;;  %v2009_v0 = vadd.f32 %v8718_v49, %v1920_v54  ;;  %v8722_v49 = vld [vmem:[#allocation35_spill] sm:$0xff] }
 0x454   : > { %v7732_v51 = vadd.f32 %v2061_v61, %v1973_v35 }
 0x455   : > { %v2260_v36 = vmax.f32 %v2182_v8, 0.0  ;;  %v2263_v6 = vmax.f32 %v2009_v0, 0.0  ;;  %v8719_v8 = vld [vmem:[#allocation33_spill] sm:$0xff]  ;;  %v2265_v0 = vmax.f32 %v8722_v49, 0.0 }
 0x456   : > { %v2261_v35 = vmax.f32 %v8719_v8, 0.0  ;;  %v5137_v8 = vld [vmem:[#allocation13 + $0x58] sm:$0xf0] }
 0x457   : > { %2491 = vmatmul.bf16.gmra.mxu2 %v2317_v24  ;;  %v2318_v15 = vpack.c.bf16 %v2260_v36, %v2258_v21 }
 0x458   : > { %v2095_v38 = vpop.f32.mrf.mxu0  ;;  %v2184_v33 = vpop.f32.mrf.mxu1  ;;  %v2319_v36 = vpack.c.bf16 %v2263_v6, %v2261_v35 }
 0x459   : > { %2580 = vmatmul.bf16.gmra.mxu3 %v2318_v15  ;;  %v2096_v7 = vadd.f32 %v2095_v38, %v7693_v48  ;;  %v2267_v38 = vmax.f32 %v2014_v56, 0.0 }
 0x45b   : > { %2134 = vmatmul.bf16.gmra.mxu0 %v7594_v27  ;;  %2223 = vmatmul.bf16.gmra.mxu1 %v7596_v18  ;;  %v2185_v5 = vadd.f32 %v2184_v33, %v2096_v7  ;;  %v2321_v6 = vpack.c.bf16 %v2267_v38, %v2265_v0 }
 0x45d   : > { %v2262_v28 = vmax.f32 %v2185_v5, 0.0  ;;  %v5135_v5 = vld [vmem:[#allocation13 + $0x50] sm:$0xf] }
 0x460   : > { %v2097_v22 = vpop.f32.mrf.mxu0  ;;  %v2186_v1 = vpop.f32.mrf.mxu1 }
 0x461   : > { %v2098_v31 = vadd.f32 %v2097_v22, %v7693_v48 }
 0x463   : > { %v2187_v21 = vadd.f32 %v2186_v1, %v2098_v31 }
 0x465   : > { %v2264_v61 = vmax.f32 %v2187_v21, 0.0 }
 0x467   : > { %2496 = vmatmul.bf16.gmra.mxu2 %v2319_v36  ;;  %v2320_v27 = vpack.c.bf16 %v2264_v61, %v2262_v28  ;;  %v1930_v36 = vadd.f32 %v7554_v60, %v7198_v45 }
 0x468   : > { %v2100_v24 = vpop.f32.mrf.mxu0  ;;  %v2189_v18 = vpop.f32.mrf.mxu1 }
 0x469   : > { %2585 = vmatmul.bf16.gmra.mxu3 %v2320_v27  ;;  %v2101_v19 = vadd.f32 %v2100_v24, %v7693_v48  ;;  %v2019_v27 = vadd.f32 %v7558_v62, %v1930_v36  ;;  %v1935_v62 = vadd.f32 %v7583_v46, %v7198_v45  ;;  %v1940_v36 = vadd.f32 %v7603_v50, %v7198_v45 }
 0x46a   : > { %v2277_v50 = vmax.f32 %v7601_v11, 0.0 }
 0x46b   : > { %2139 = vmatmul.bf16.gmra.mxu0 %v7614_v14  ;;  %2228 = vmatmul.bf16.gmra.mxu1 %v7616_v39  ;;  %v2190_v33 = vadd.f32 %v2189_v18, %v2101_v19  ;;  %v5434_v14 = vld [vmem:[#allocation13 + $0x54] sm:$0xf0]  ;;  %v5433_v39 = vld [vmem:[#allocation13 + $0x54] sm:$0xf]  ;;  %v2271_v40 = vmax.f32 %v2019_v27, 0.0  ;;  %v2269_v19 = vmax.f32 %v7539_v23, 0.0 }
 0x46c   : > { %v5136_v31 = vor.u32 %v5434_v14, %v5135_v5  ;;  %v5140_v21 = vor.u32 %v5433_v39, %v5137_v8  ;;  %v5127_v39 = vld [vmem:[#allocation13 + $0x40] sm:$0xf] }
 0x46d   : > { %v2266_v22 = vmax.f32 %v2190_v33, 0.0  ;;  %v2323_v38 = vpack.c.bf16 %v2271_v40, %v2269_v19  ;;  %v7775_v19 = vpop.f32.mrf.mxu3 }
 0x46e   : > { %3253 = vmatpush.bf16.msra.mxu0 %v5136_v31  ;;  %3342 = vmatpush.bf16.msra.mxu1 %v5140_v21 }
 0x470   : > { %v2102_v15 = vpop.f32.mrf.mxu0  ;;  %v2191_v59 = vpop.f32.mrf.mxu1 }
 0x471   : > { %v2103_v54 = vadd.f32 %v2102_v15, %v7693_v48 }
 0x473   : > { %v2192_v7 = vadd.f32 %v2191_v59, %v2103_v54  ;;  %v2024_v54 = vadd.f32 %v7585_v12, %v1935_v62  ;;  %v5431_v12 = vld [vmem:[#allocation13 + $0x44] sm:$0xf] }
 0x475   : > { %v2268_v1 = vmax.f32 %v2192_v7, 0.0  ;;  %v2275_v7 = vmax.f32 %v2024_v54, 0.0 }
 0x477   : > { %2501 = vmatmul.bf16.gmra.mxu2 %v2321_v6  ;;  %v2322_v35 = vpack.c.bf16 %v2268_v1, %v2266_v22  ;;  %v2273_v6 = vmax.f32 %v7568_v10, 0.0  ;;  %v2029_v10 = vadd.f32 %v7605_v43, %v1940_v36 }
 0x478   : > { %v2105_v28 = vpop.f32.mrf.mxu0  ;;  %v2194_v61 = vpop.f32.mrf.mxu1 }
 0x479   : > { %2590 = vmatmul.bf16.gmra.mxu3 %v2322_v35  ;;  %v2106_v24 = vadd.f32 %v2105_v28, %v7693_v48  ;;  %v2325_v31 = vpack.c.bf16 %v2275_v7, %v2273_v6  ;;  %v5129_v35 = vld [vmem:[#allocation13 + $0x48] sm:$0xf0] }
 0x47b   : > { %2144 = vmatmul.bf16.gmra.mxu0 %v7633_v55  ;;  %2233 = vmatmul.bf16.gmra.mxu1 %v7635_v53  ;;  %v2195_v9 = vadd.f32 %v2194_v61, %v2106_v24  ;;  %v5132_v61 = vor.u32 %v5431_v12, %v5129_v35  ;;  %v2651_v12 = vlaneseq }
 0x47d   : > { %v2270_v60 = vmax.f32 %v2195_v9, 0.0  ;;  %3343 = vmatpush.bf16.msra.mxu1 %v5132_v61 }
 0x480   : > { %v2107_v18 = vpop.f32.mrf.mxu0  ;;  %v2196_v3 = vpop.f32.mrf.mxu1 }
 0x481   : > { %v2108_v56 = vadd.f32 %v2107_v18, %v7693_v48 }
 0x483   : > { %v2197_v15 = vadd.f32 %v2196_v3, %v2108_v56  ;;  %v2279_v3 = vmax.f32 %v2029_v10, 0.0  ;;  %v7773_v56 = vpop.f32.mrf.mxu2 }
 0x485   : > { %v2272_v59 = vmax.f32 %v2197_v15, 0.0 }
 0x487   : > { %2506 = vmatmul.bf16.gmra.mxu2 %v2323_v38  ;;  %v2324_v55 = vpack.c.bf16 %v2272_v59, %v2270_v60 }
 0x488   : > { %v2110_v33 = vpop.f32.mrf.mxu0  ;;  %v2199_v53 = vpop.f32.mrf.mxu1 }
 0x489   : > { %2595 = vmatmul.bf16.gmra.mxu3 %v2324_v55  ;;  %v2111_v23 = vadd.f32 %v2110_v33, %v7693_v48  ;;  %v1945_v55 = vadd.f32 %v7622_v13, %v7198_v45 }
 0x48b   : > { %2149 = vmatmul.bf16.gmra.mxu0 %v7652_v17  ;;  %2238 = vmatmul.bf16.gmra.mxu1 %v7654_v42  ;;  %v2200_v22 = vadd.f32 %v2199_v53, %v2111_v23  ;;  %v5432_v17 = vld [vmem:[#allocation13 + $0x44] sm:$0xf0]  ;;  %v2034_v54 = vadd.f32 %v7624_v2, %v1945_v55 }
 0x48c   : > { %v5128_v8 = vor.u32 %v5432_v17, %v5127_v39 }
 0x48d   : > { %v2274_v14 = vmax.f32 %v2200_v22, 0.0  ;;  %v2283_v7 = vmax.f32 %v2034_v54, 0.0  ;;  %v5279_v54 = vld [vmem:[#allocation14 + $0xf0] sm:$0xf] }
 0x48e   : > { %3254 = vmatpush.bf16.msra.mxu0 %v5128_v8  ;;  %v5119_v8 = vld [vmem:[#allocation13 + $0x30] sm:$0xf] }
 0x490   : > { %v2112_v49 = vpop.f32.mrf.mxu0  ;;  %v2201_v0 = vpop.f32.mrf.mxu1 }
 0x491   : > { %v2113_v1 = vadd.f32 %v2112_v49, %v7693_v48 }
 0x493   : > { %v2202_v5 = vadd.f32 %v2201_v0, %v2113_v1 }
 0x495   : > { %v2276_v46 = vmax.f32 %v2202_v5, 0.0  ;;  %v2281_v5 = vmax.f32 %v7618_v20, 0.0  ;;  %v1950_v20 = vadd.f32 %v7641_v29, %v7198_v45 }
 0x497   : > { %2511 = vmatmul.bf16.gmra.mxu2 %v2325_v31  ;;  %v2326_v42 = vpack.c.bf16 %v2276_v46, %v2274_v14  ;;  %v2329_v2 = vpack.c.bf16 %v2283_v7, %v2281_v5 }
 0x498   : > { %v2115_v21 = vpop.f32.mrf.mxu0  ;;  %v2204_v28 = vpop.f32.mrf.mxu1 }
 0x499   : > { %2600 = vmatmul.bf16.gmra.mxu3 %v2326_v42  ;;  %v2116_v27 = vadd.f32 %v2115_v21, %v7693_v48  ;;  %v5430_v42 = vld [vmem:[#allocation13 + $0x34] sm:$0xf0]  ;;  %v5429_v21 = vld [vmem:[#allocation13 + $0x34] sm:$0xf] }
 0x49a   : > { %v5120_v35 = vor.u32 %v5430_v42, %v5119_v8 }
 0x49b   : > { %2154 = vmatmul.bf16.gmra.mxu0 %v7681_v4  ;;  %2243 = vmatmul.bf16.gmra.mxu1 %v7683_v47  ;;  %v2205_v40 = vadd.f32 %v2204_v28, %v2116_v27  ;;  %v2327_v47 = vpack.c.bf16 %v2279_v3, %v2277_v50  ;;  %v5121_v28 = vld [vmem:[#allocation13 + $0x38] sm:$0xf0]  ;;  %v7788_v3 = vld [vmem:[#allocation7 + $0x4] ss:$0 sm:$0xff]  ;;  %v7792_v50 = vand.u32 127, %v2651_v12  ;;  %v1955_v12 = vadd.f32 %v7668_v26, %v7198_v45 }
 0x49c   : > { %v5124_v27 = vor.u32 %v5429_v21, %v5121_v28  ;;  %3255 = vmatpush.bf16.msra.mxu0 %v5120_v35 }
 0x49d   : > { %v2278_v4 = vmax.f32 %v2205_v40, 0.0  ;;  %vm2653_vm1 = vcmp.ge.s32.totalorder %v7792_v50, 64 }
 0x49e   : > { %3344 = vmatpush.bf16.msra.mxu1 %v5124_v27 }
 0x4a0   : > { %v2117_v24 = vpop.f32.mrf.mxu0  ;;  %v2206_v18 = vpop.f32.mrf.mxu1 }
 0x4a1   : > { %v2118_v9 = vadd.f32 %v2117_v24, %v7693_v48 }
 0x4a3   : > { %v2207_v15 = vadd.f32 %v2206_v18, %v2118_v9 }
 0x4a5   : > { %v2280_v60 = vmax.f32 %v2207_v15, 0.0 }
 0x4a7   : > { %2516 = vmatmul.bf16.gmra.mxu2 %v2327_v47  ;;  %v2328_v43 = vpack.c.bf16 %v2280_v60, %v2278_v4  ;;  %v2039_v4 = vadd.f32 %v7643_v57, %v1950_v20 }
 0x4a8   : > { %v2120_v59 = vpop.f32.mrf.mxu0  ;;  %v2209_v38 = vpop.f32.mrf.mxu1 }
 0x4a9   : > { %2605 = vmatmul.bf16.gmra.mxu3 %v2328_v43  ;;  %v2121_v11 = vadd.f32 %v2120_v59, %v7693_v48  ;;  %v5215_v59 = vld [vmem:[#allocation14 + $0x70] sm:$0xf]  ;;  %v2287_v55 = vmax.f32 %v2039_v4, 0.0 }
 0x4aa   : > { %v1977_v33 = vpop.f32.mrf.mxu2  ;;  %v2066_v53 = vpop.f32.mrf.mxu3 }
 0x4ab   : > { %v1978_v62 = vadd.f32 %v1977_v33, %v7198_v45  ;;  %v2210_v22 = vadd.f32 %v2209_v38, %v2121_v11  ;;  %v5454_v38 = vld [vmem:[#allocation14 + $0x74] sm:$0xf0] }
 0x4ac   : > { %v5470_v11 = vld [vmem:[#allocation14 + $0xf4] sm:$0xf0] }
 0x4ad   : > { %v2067_v23 = vadd.f32 %v2066_v53, %v1978_v62  ;;  %v2282_v31 = vmax.f32 %v2210_v22, 0.0  ;;  %v5216_v62 = vor.u32 %v5454_v38, %v5215_v59  ;;  %v8723_v22 = vld [vmem:[#allocation38_spill] sm:$0xff] }
 0x4af   : > { %v2309_v61 = vmax.f32 %v2067_v23, 0.0  ;;  %3722 = vmatpush.bf16.msra.mxu2 %v5216_v62  ;;  %v5428_v62 = vld [vmem:[#allocation13 + $0x24] sm:$0xf0] }
 0x4b0   : > { %v2122_v49 = vpop.f32.mrf.mxu0  ;;  %v2211_v0 = vpop.f32.mrf.mxu1 }
 0x4b1   : > { %v2123_v1 = vadd.f32 %v2122_v49, %v7693_v48 }
 0x4b2   : > { %v1979_v6 = vpop.f32.mrf.mxu2  ;;  %v2068_v46 = vpop.f32.mrf.mxu3 }
 0x4b3   : > { %v2212_v13 = vadd.f32 %v2211_v0, %v2123_v1  ;;  %v1980_v14 = vadd.f32 %v1979_v6, %v7198_v45  ;;  %v5280_v0 = vor.u32 %v5470_v11, %v5279_v54  ;;  %v2285_v1 = vmax.f32 %v8723_v22, 0.0  ;;  %v5427_v11 = vld [vmem:[#allocation13 + $0x24] sm:$0xf] }
 0x4b5   : > { %v2284_v39 = vmax.f32 %v2212_v13, 0.0  ;;  %v2069_v17 = vadd.f32 %v2068_v46, %v1980_v14  ;;  %3811 = vmatpush.bf16.msra.mxu3 %v5280_v0 }
 0x4b7   : > { %v2311_v36 = vmax.f32 %v2069_v17, 0.0  ;;  %2521 = vmatmul.bf16.gmra.mxu2 %v2329_v2  ;;  %v2330_v10 = vpack.c.bf16 %v2284_v39, %v2282_v31  ;;  %v2331_v39 = vpack.c.bf16 %v2287_v55, %v2285_v1 }
 0x4b8   : > { %v2125_v24 = vpop.f32.mrf.mxu0  ;;  %v2214_v18 = vpop.f32.mrf.mxu1 }
 0x4b9   : > { %2610 = vmatmul.bf16.gmra.mxu3 %v2330_v10  ;;  %v7790_v40 = vpack.c.bf16 %v2311_v36, %v2309_v61  ;;  %v2126_v47 = vadd.f32 %v2125_v24, %v7693_v48  ;;  %v2044_v36 = vadd.f32 %v7670_v37, %v1955_v12  ;;  %v2289_v37 = vmax.f32 %v7656_v25, 0.0 }
 0x4ba   : > { %v2482_v9 = vpop.f32.mrf.mxu2  ;;  %v1960_v25 = vadd.f32 %v7689_v32, %v7198_v45 }
 0x4bb   : > { %v2483_v15 = vadd.f32 %v2482_v9, %v7788_v3  ;;  %v2215_v23 = vadd.f32 %v2214_v18, %v2126_v47  ;;  %v2291_v18 = vmax.f32 %v2044_v36, 0.0 }
 0x4bc   : > { %v2571_v60 = vpop.f32.mrf.mxu3 }
 0x4bd   : > { %v2572_v29 = vadd.f32 %v2571_v60, %v2483_v15  ;;  %v2286_v14 = vmax.f32 %v2215_v23, 0.0  ;;  %v5113_v23 = vld [vmem:[#allocation13 + $0x28] sm:$0xf0] }
 0x4bf   : > { %v5029_v43 = vclamps-f32 %v2572_v29, 10.0 }
 0x4c0   : > { %v2127_v33 = vpop.f32.mrf.mxu0  ;;  %v2216_v53 = vpop.f32.mrf.mxu1 }
 0x4c1   : > { %v2128_v49 = vadd.f32 %v2127_v33, %v7693_v48  ;;  %v7801_v57 = vsel %vm2653_vm1, %v5029_v43, %v2572_v29  ;;  %v2333_v33 = vpack.c.bf16 %v2291_v18, %v2289_v37 }
 0x4c2   : > { %v2484_v7 = vpop.f32.mrf.mxu2  ;;  %2782 = vrot.lane.b32.xlu1 %v7801_v57, %s6239_s29  ;;  %2750 = vst [vmem:[%s7806_s7] sm:$0xff] %v7801_v57 }
 0x4c3   : > { %v2217_v6 = vadd.f32 %v2216_v53, %v2128_v49  ;;  %v2485_v5 = vadd.f32 %v2484_v7, %v7788_v3  ;;  %v5111_v53 = vld [vmem:[#allocation13 + $0x20] sm:$0xf]  ;;  %v5116_v7 = vor.u32 %v5427_v11, %v5113_v23 }
 0x4c4   : > { %v2573_v13 = vpop.f32.mrf.mxu3  ;;  %v5112_v54 = vor.u32 %v5428_v62, %v5111_v53 }
 0x4c5   : > { %v2288_v46 = vmax.f32 %v2217_v6, 0.0  ;;  %v2574_v31 = vadd.f32 %v2573_v13, %v2485_v5  ;;  %3345 = vmatpush.bf16.msra.mxu1 %v5116_v7 }
 0x4c6   : > { %3256 = vmatpush.bf16.msra.mxu0 %v5112_v54 }
 0x4c7   : > { %v5030_v17 = vclamps-f32 %v2574_v31, 10.0  ;;  %2526 = vmatmul.bf16.gmra.mxu2 %v2331_v39  ;;  %v2332_v2 = vpack.c.bf16 %v2288_v46, %v2286_v14  ;;  %v2049_v14 = vadd.f32 %v7691_v63, %v1960_v25 }
 0x4c8   : > { %v2130_v8 = vpop.f32.mrf.mxu0  ;;  %v2219_v42 = vpop.f32.mrf.mxu1 }
 0x4c9   : > { %2615 = vmatmul.bf16.gmra.mxu3 %v2332_v2  ;;  %v7816_v35 = vsel %vm2653_vm1, %v5030_v17, %v2574_v31  ;;  %v2131_v10 = vadd.f32 %v2130_v8, %v7693_v48  ;;  %v5207_v17 = vld [vmem:[#allocation14 + $0x60] sm:$0xf]  ;;  %v5452_v2 = vld [vmem:[#allocation14 + $0x64] sm:$0xf0]  ;;  %v2295_v8 = vmax.f32 %v2049_v14, 0.0 }
 0x4ca   : > { %v2487_v21 = vpop.f32.mrf.mxu2  ;;  %2784 = vrot.lane.b32.xlu2 %v7816_v35, %s6239_s29  ;;  %2751 = vst [vmem:[%s7806_s7 + $0x8] sm:$0xff] %v7816_v35 }
 0x4cb   : > { %v2488_v28 = vadd.f32 %v2487_v21, %v7788_v3  ;;  %v2220_v9 = vadd.f32 %v2219_v42, %v2131_v10  ;;  %v5208_v21 = vor.u32 %v5452_v2, %v5207_v17  ;;  %v5103_v2 = vld [vmem:[#allocation13 + $0x10] sm:$0xf] }
 0x4cc   : > { %v2576_v61 = vpop.f32.mrf.mxu3 }
 0x4cd   : > { %v2577_v26 = vadd.f32 %v2576_v61, %v2488_v28  ;;  %v2290_v59 = vmax.f32 %v2220_v9, 0.0  ;;  %v5271_v28 = vld [vmem:[#allocation14 + $0xe0] sm:$0xf]  ;;  %v5468_v61 = vld [vmem:[#allocation14 + $0xe4] sm:$0xf0]  ;;  %3723 = vmatpush.bf16.msra.mxu2 %v5208_v21 }
 0x4ce   : > { %v5105_v21 = vld [vmem:[#allocation13 + $0x18] sm:$0xf0] }
 0x4cf   : > { %v5031_v27 = vclamps-f32 %v2577_v26, 10.0 }
 0x4d0   : > { %v2132_v20 = vpop.f32.mrf.mxu0  ;;  %v2221_v24 = vpop.f32.mrf.mxu1 }
 0x4d1   : > { %v2133_v15 = vadd.f32 %v2132_v20, %v7693_v48  ;;  %v7828_v4 = vsel %vm2653_vm1, %v5031_v27, %v2577_v26  ;;  %v5272_v26 = vor.u32 %v5468_v61, %v5271_v28  ;;  %v2293_v20 = vmax.f32 %v7679_v52, 0.0 }
 0x4d2   : > { %v2489_v60 = vpop.f32.mrf.mxu2  ;;  %2786 = vrot.lane.b32.xlu0 %v7828_v4, %s6239_s29  ;;  %2752 = vst [vmem:[%s7806_s7 + $0x10] sm:$0xff] %v7828_v4 }
 0x4d3   : > { %v2222_v47 = vadd.f32 %v2221_v24, %v2133_v15  ;;  %v2490_v29 = vadd.f32 %v2489_v60, %v7788_v3  ;;  %3812 = vmatpush.bf16.msra.mxu3 %v5272_v26 }
 0x4d4   : > { %v2578_v43 = vpop.f32.mrf.mxu3 }
 0x4d5   : > { %v2292_v38 = vmax.f32 %v2222_v47, 0.0  ;;  %v2579_v55 = vadd.f32 %v2578_v43, %v2490_v29  ;;  %v2335_v47 = vpack.c.bf16 %v2295_v8, %v2293_v20  ;;  %v5426_v8 = vld [vmem:[#allocation13 + $0x14] sm:$0xf0] }
 0x4d7   : > { %v5032_v49 = vclamps-f32 %v2579_v55, 10.0  ;;  %2531 = vmatmul.bf16.gmra.mxu2 %v2333_v33  ;;  %v2334_v0 = vpack.c.bf16 %v2292_v38, %v2290_v59 }
 0x4d8   : > { %v2135_v22 = vpop.f32.mrf.mxu0  ;;  %v2224_v1 = vpop.f32.mrf.mxu1 }
 0x4d9   : > { %2620 = vmatmul.bf16.gmra.mxu3 %v2334_v0  ;;  %v7840_v6 = vsel %vm2653_vm1, %v5032_v49, %v2579_v55  ;;  %v2136_v46 = vadd.f32 %v2135_v22, %v7693_v48  ;;  %v1965_v55 = vadd.f32 %v7706_v34, %v7198_v45 }
 0x4da   : > { %v2492_v5 = vpop.f32.mrf.mxu2  ;;  %2753 = vst [vmem:[%s7806_s7 + $0x18] sm:$0xff] %v7840_v6  ;;  %2788 = vrot.lane.b32.xlu2 %v7840_v6, %s6239_s29 }
 0x4db   : > { %v2493_v13 = vadd.f32 %v2492_v5, %v7788_v3  ;;  %v2225_v36 = vadd.f32 %v2224_v1, %v2136_v46  ;;  %v2054_v54 = vadd.f32 %v7708_v41, %v1965_v55  ;;  %v2297_v41 = vmax.f32 %v7702_v44, 0.0  ;;  %v5263_v55 = vld [vmem:[#allocation14 + $0xd0] sm:$0xf] }
 0x4dc   : > { %v2581_v32 = vpop.f32.mrf.mxu3  ;;  %v1970_v44 = vadd.f32 %v7721_v16, %v7198_v45 }
 0x4dd   : > { %v2582_v31 = vadd.f32 %v2581_v32, %v2493_v13  ;;  %v2294_v15 = vmax.f32 %v2225_v36, 0.0  ;;  %v2299_v7 = vmax.f32 %v2054_v54, 0.0 }
 0x4df   : > { %v5033_v39 = vclamps-f32 %v2582_v31, 10.0  ;;  %v2337_v17 = vpack.c.bf16 %v2299_v7, %v2297_v41 }
 0x4e0   : > { %v2137_v42 = vpop.f32.mrf.mxu0  ;;  %v2226_v12 = vpop.f32.mrf.mxu1 }
 0x4e1   : > { %v2138_v10 = vadd.f32 %v2137_v42, %v7693_v48  ;;  %v7852_v63 = vsel %vm2653_vm1, %v5033_v39, %v2582_v31  ;;  %v5104_v42 = vor.u32 %v5426_v8, %v5103_v2 }
 0x4e2   : > { %v2494_v27 = vpop.f32.mrf.mxu2  ;;  %2754 = vst [vmem:[%s7806_s7 + $0x20] sm:$0xff] %v7852_v63  ;;  %2790 = vrot.lane.b32.xlu1 %v7852_v63, %s6239_s29 }
 0x4e3   : > { %v2227_v24 = vadd.f32 %v2226_v12, %v2138_v10  ;;  %v2495_v18 = vadd.f32 %v2494_v27, %v7788_v3  ;;  %v5425_v12 = vld [vmem:[#allocation13 + $0x14] sm:$0xf]  ;;  %3257 = vmatpush.bf16.msra.mxu0 %v5104_v42 }
 0x4e4   : > { %v2583_v9 = vpop.f32.mrf.mxu3  ;;  %v5108_v36 = vor.u32 %v5425_v12, %v5105_v21 }
 0x4e5   : > { %v2296_v60 = vmax.f32 %v2227_v24, 0.0  ;;  %v2584_v37 = vadd.f32 %v2583_v9, %v2495_v18  ;;  %v2059_v18 = vadd.f32 %v7723_v58, %v1970_v44  ;;  %v2305_v44 = vmax.f32 %v7732_v51, 0.0  ;;  %v5097_v51 = vld [vmem:[#allocation13 + $0x8] sm:$0xf0] }
 0x4e6   : > { %3346 = vmatpush.bf16.msra.mxu1 %v5108_v36 }
 0x4e7   : > { %v5034_v29 = vclamps-f32 %v2584_v37, 10.0  ;;  %2536 = vmatmul.bf16.gmra.mxu2 %v2335_v47  ;;  %v2336_v43 = vpack.c.bf16 %v2296_v60, %v2294_v15  ;;  %v5450_v47 = vld [vmem:[#allocation14 + $0x54] sm:$0xf0] }
 0x4e8   : > { %v2140_v59 = vpop.f32.mrf.mxu0  ;;  %v2229_v38 = vpop.f32.mrf.mxu1 }
 0x4e9   : > { %2625 = vmatmul.bf16.gmra.mxu3 %v2336_v43  ;;  %v7864_v52 = vsel %vm2653_vm1, %v5034_v29, %v2584_v37  ;;  %v2141_v11 = vadd.f32 %v2140_v59, %v7693_v48  ;;  %v5199_v37 = vld [vmem:[#allocation14 + $0x50] sm:$0xf]  ;;  %v2303_v29 = vmax.f32 %v2059_v18, 0.0  ;;  %v5095_v18 = vld [vmem:[#allocation13] sm:$0xf] }
 0x4ea   : > { %v2497_v33 = vpop.f32.mrf.mxu2  ;;  %2755 = vst [vmem:[%s7806_s7 + $0x28] sm:$0xff] %v7864_v52  ;;  %2792 = vrot.lane.b32.xlu0 %v7864_v52, %s6239_s29 }
 0x4eb   : > { %v2498_v53 = vadd.f32 %v2497_v33, %v7788_v3  ;;  %v2230_v25 = vadd.f32 %v2229_v38, %v2141_v11  ;;  %v5200_v38 = vor.u32 %v5450_v47, %v5199_v37  ;;  %v5466_v33 = vld [vmem:[#allocation14 + $0xd4] sm:$0xf0] }
 0x4ec   : > { %v2586_v62 = vpop.f32.mrf.mxu3  ;;  %v5264_v54 = vor.u32 %v5466_v33, %v5263_v55 }
 0x4ed   : > { %v2587_v34 = vadd.f32 %v2586_v62, %v2498_v53  ;;  %v2298_v46 = vmax.f32 %v2230_v25, 0.0  ;;  %3724 = vmatpush.bf16.msra.mxu2 %v5200_v38 }
 0x4ee   : > { %3813 = vmatpush.bf16.msra.mxu3 %v5264_v54 }
 0x4ef   : > { %v5035_v23 = vclamps-f32 %v2587_v34, 10.0 }
 0x4f0   : > { %v2142_v49 = vpop.f32.mrf.mxu0  ;;  %v2231_v0 = vpop.f32.mrf.mxu1 }
 0x4f1   : > { %v2143_v22 = vadd.f32 %v2142_v49, %v7693_v48  ;;  %v7876_v1 = vsel %vm2653_vm1, %v5035_v23, %v2587_v34  ;;  %v2301_v34 = vmax.f32 %v7717_v30, 0.0 }
 0x4f2   : > { %v2499_v5 = vpop.f32.mrf.mxu2  ;;  %2756 = vst [vmem:[%s7806_s7 + $0x30] sm:$0xff] %v7876_v1  ;;  %2794 = vrot.lane.b32.xlu2 %v7876_v1, %s6239_s29 }
 0x4f3   : > { %v2232_v13 = vadd.f32 %v2231_v0, %v2143_v22  ;;  %v2500_v14 = vadd.f32 %v2499_v5, %v7788_v3  ;;  %v2339_v5 = vpack.c.bf16 %v2303_v29, %v2301_v34 }
 0x4f4   : > { %v2588_v32 = vpop.f32.mrf.mxu3 }
 0x4f5   : > { %v2300_v31 = vmax.f32 %v2232_v13, 0.0  ;;  %v2589_v39 = vadd.f32 %v2588_v32, %v2500_v14  ;;  %v1975_v14 = vadd.f32 %v7773_v56, %v7198_v45 }
 0x4f7   : > { %v5036_v28 = vclamps-f32 %v2589_v39, 10.0  ;;  %2541 = vmatmul.bf16.gmra.mxu2 %v2337_v17  ;;  %v2338_v61 = vpack.c.bf16 %v2300_v31, %v2298_v46  ;;  %v2064_v17 = vadd.f32 %v7775_v19, %v1975_v14 }
 0x4f8   : > { %v2145_v10 = vpop.f32.mrf.mxu0  ;;  %v2234_v26 = vpop.f32.mrf.mxu1 }
 0x4f9   : > { %2630 = vmatmul.bf16.gmra.mxu3 %v2338_v61  ;;  %v7888_v27 = vsel %vm2653_vm1, %v5036_v28, %v2589_v39  ;;  %v2146_v9 = vadd.f32 %v2145_v10, %v7693_v48  ;;  %v2307_v42 = vmax.f32 %v2064_v17, 0.0 }
 0x4fa   : > { %v2502_v20 = vpop.f32.mrf.mxu2  ;;  %2757 = vst [vmem:[%s7806_s7 + $0x38] sm:$0xff] %v7888_v27  ;;  %2796 = vrot.lane.b32.xlu1 %v7888_v27, %s6239_s29 }
 0x4fb   : > { %v2503_v24 = vadd.f32 %v2502_v20, %v7788_v3  ;;  %v2235_v53 = vadd.f32 %v2234_v26, %v2146_v9  ;;  %v5423_v9 = vld [vmem:[#allocation13 + $0x4] sm:$0xf] }
 0x4fc   : > { %v2591_v16 = vpop.f32.mrf.mxu3  ;;  %v5100_v29 = vor.u32 %v5423_v9, %v5097_v51  ;;  %v5217_v9 = vld [vmem:[#allocation14 + $0x78] sm:$0xf0] }
 0x4fd   : > { %v2592_v15 = vadd.f32 %v2591_v16, %v2503_v24  ;;  %v2302_v7 = vmax.f32 %v2235_v53, 0.0  ;;  %v2341_v24 = vpack.c.bf16 %v2307_v42, %v2305_v44  ;;  %v5424_v16 = vld [vmem:[#allocation13 + $0x4] sm:$0xf0]  ;;  %v5281_v51 = vld [vmem:[#allocation14 + $0xf8] sm:$0xf0] }
 0x4fe   : > { %v5096_v47 = vor.u32 %v5424_v16, %v5095_v18  ;;  %3347 = vmatpush.bf16.msra.mxu1 %v5100_v29  ;;  %v5453_v16 = vld [vmem:[#allocation14 + $0x74] sm:$0xf] }
 0x4ff   : > { %v5037_v60 = vclamps-f32 %v2592_v15, 10.0 }
 0x500   : > { %v2147_v43 = vpop.f32.mrf.mxu0  ;;  %v2236_v59 = vpop.f32.mrf.mxu1  ;;  %3258 = vmatpush.bf16.msra.mxu0 %v5096_v47  ;;  %v5220_v47 = vor.u32 %v5453_v16, %v5217_v9 }
 0x501   : > { %v2148_v62 = vadd.f32 %v2147_v43, %v7693_v48  ;;  %v7900_v58 = vsel %vm2653_vm1, %v5037_v60, %v2592_v15 }
 0x502   : > { %v2504_v11 = vpop.f32.mrf.mxu2  ;;  %2758 = vst [vmem:[%s7806_s7 + $0x40] sm:$0xff] %v7900_v58  ;;  %2798 = vrot.lane.b32.xlu0 %v7900_v58, %s6239_s29 }
 0x503   : > { %v2237_v23 = vadd.f32 %v2236_v59, %v2148_v62  ;;  %v2505_v49 = vadd.f32 %v2504_v11, %v7788_v3 }
 0x504   : > { %v2593_v0 = vpop.f32.mrf.mxu3  ;;  %3900 = vmatpush.bf16.msrb.mxu0 %v5220_v47 }
 0x505   : > { %v2304_v25 = vmax.f32 %v2237_v23, 0.0  ;;  %v2594_v22 = vadd.f32 %v2593_v0, %v2505_v49 }
 0x507   : > { %v5038_v41 = vclamps-f32 %v2594_v22, 10.0  ;;  %2546 = vmatmul.bf16.gmra.mxu2 %v2339_v5  ;;  %v2340_v13 = vpack.c.bf16 %v2304_v25, %v2302_v7 }
 0x508   : > { %v2150_v32 = vpop.f32.mrf.mxu0  ;;  %v2239_v46 = vpop.f32.mrf.mxu1 }
 0x509   : > { %2635 = vmatmul.bf16.gmra.mxu3 %v2340_v13  ;;  %v7912_v30 = vsel %vm2653_vm1, %v5038_v41, %v2594_v22  ;;  %v2151_v45 = vadd.f32 %v2150_v32, %v7693_v48 }
 0x50a   : > { %v2507_v31 = vpop.f32.mrf.mxu2  ;;  %2759 = vst [vmem:[%s7806_s7 + $0x48] sm:$0xff] %v7912_v30  ;;  %2800 = vrot.lane.b32.xlu2 %v7912_v30, %s6239_s29 }
 0x50b   : > { %v2508_v39 = vadd.f32 %v2507_v31, %v7788_v3  ;;  %v2240_v28 = vadd.f32 %v2239_v46, %v2151_v45  ;;  %v5464_v45 = vld [vmem:[#allocation14 + $0xc4] sm:$0xf0] }
 0x50c   : > { %v2596_v2 = vpop.f32.mrf.mxu3 }
 0x50d   : > { %v2597_v56 = vadd.f32 %v2596_v2, %v2508_v39  ;;  %v2306_v15 = vmax.f32 %v2240_v28, 0.0  ;;  %v5448_v39 = vld [vmem:[#allocation14 + $0x44] sm:$0xf0]  ;;  %v5255_v2 = vld [vmem:[#allocation14 + $0xc0] sm:$0xf] }
 0x50e   : > { %v5256_v42 = vor.u32 %v5464_v45, %v5255_v2 }
 0x50f   : > { %v5039_v8 = vclamps-f32 %v2597_v56, 10.0 }
 0x510   : > { %v2152_v12 = vpop.f32.mrf.mxu0  ;;  %v2241_v21 = vpop.f32.mrf.mxu1  ;;  %3814 = vmatpush.bf16.msra.mxu3 %v5256_v42 }
 0x511   : > { %v2153_v61 = vadd.f32 %v2152_v12, %v7693_v48  ;;  %v7924_v36 = vsel %vm2653_vm1, %v5039_v8, %v2597_v56 }
 0x512   : > { %v2509_v10 = vpop.f32.mrf.mxu2  ;;  %2760 = vst [vmem:[%s7806_s7 + $0x50] sm:$0xff] %v7924_v36  ;;  %2802 = vrot.lane.b32.xlu1 %v7924_v36, %s6239_s29 }
 0x513   : > { %v2242_v19 = vadd.f32 %v2241_v21, %v2153_v61  ;;  %v2510_v26 = vadd.f32 %v2509_v10, %v7788_v3 }
 0x514   : > { %v2598_v20 = vpop.f32.mrf.mxu3 }
 0x515   : > { %v2308_v60 = vmax.f32 %v2242_v19, 0.0  ;;  %v2599_v37 = vadd.f32 %v2598_v20, %v2510_v26 }
 0x517   : > { %v5040_v43 = vclamps-f32 %v2599_v37, 10.0  ;;  %2551 = vmatmul.bf16.gmra.mxu2 %v2341_v24  ;;  %v2342_v59 = vpack.c.bf16 %v2308_v60, %v2306_v15  ;;  %v5469_v15 = vld [vmem:[#allocation14 + $0xf4] sm:$0xf] }
 0x518   : > { %v2155_v38 = vpop.f32.mrf.mxu0  ;;  %v2244_v55 = vpop.f32.mrf.mxu1 }
 0x519   : > { %2640 = vmatmul.bf16.gmra.mxu3 %v2342_v59  ;;  %v7934_v33 = vsel %vm2653_vm1, %v5040_v43, %v2599_v37  ;;  %v2156_v11 = vadd.f32 %v2155_v38, %v7693_v48  ;;  %v5284_v59 = vor.u32 %v5469_v15, %v5281_v51 }
 0x51a   : > { %v2512_v53 = vpop.f32.mrf.mxu2  ;;  %2761 = vst [vmem:[%s7806_s7 + $0x58] sm:$0xff] %v7934_v33  ;;  %2804 = vrot.lane.b32.xlu0 %v7934_v33, %s6239_s29 }
 0x51b   : > { %v2513_v62 = vadd.f32 %v2512_v53, %v7788_v3  ;;  %v2245_v0 = vadd.f32 %v2244_v55, %v2156_v11  ;;  %3989 = vmatpush.bf16.msrb.mxu1 %v5284_v59  ;;  %v5490_v11 = vld [vmem:[%s6493_s27] sm:$0xff]  }
 0x51c   : > { %v2601_v54 = vpop.f32.mrf.mxu3 }
 0x51d   : > { %v2602_v34 = vadd.f32 %v2601_v54, %v2513_v62  ;;  %v2310_v32 = vmax.f32 %v2245_v0, 0.0 }
 0x51f   : > { %v5041_v23 = vclamps-f32 %v2602_v34, 10.0 }
 0x520   : > { %v2157_v49 = vpop.f32.mrf.mxu0  ;;  %v2246_v22 = vpop.f32.mrf.mxu1 }
 0x521   : > { %v2158_v7 = vadd.f32 %v2157_v49, %v7693_v48  ;;  %v7945_v25 = vsel %vm2653_vm1, %v5041_v23, %v2602_v34  ;;  %v5191_v48 = vld [vmem:[#allocation14 + $0x40] sm:$0xf] }
 0x522   : > { %v2514_v5 = vpop.f32.mrf.mxu2  ;;  %2762 = vst [vmem:[%s7806_s7 + $0x60] sm:$0xff] %v7945_v25  ;;  %2806 = vrot.lane.b32.xlu2 %v7945_v25, %s6239_s29  ;;  %v5192_v17 = vor.u32 %v5448_v39, %v5191_v48 }
 0x523   : > { %v2247_v41 = vadd.f32 %v2246_v22, %v2158_v7  ;;  %v2515_v13 = vadd.f32 %v2514_v5, %v7788_v3  ;;  %v5492_v22 = vunpack.c.h.bf16 %v5490_v11 }
 0x524   : > { %v2603_v14 = vpop.f32.mrf.mxu3  ;;  %3725 = vmatpush.bf16.msra.mxu2 %v5192_v17  ;;  %v2785_v12 = vpop.permute.xlu2 %2784 }
 0x525   : > { %v2312_v46 = vmax.f32 %v2247_v41, 0.0  ;;  %v2604_v31 = vadd.f32 %v2603_v14, %v2515_v13  ;;  %v5491_v14 = vunpack.c.l.bf16 %v5490_v11 }
 0x527   : > { %v5042_v56 = vclamps-f32 %v2604_v31, 10.0  ;;  %2556 = vmatmul.bf16.gmra.mxu2 %v7790_v40  ;;  %v2344_v8 = vpack.c.bf16 %v2312_v46, %v2310_v32  ;;  %v5062_v40 = vclamps-f32 %v2785_v12, 10.0  ;;  %v5183_v46 = vld [vmem:[#allocation14 + $0x30] sm:$0xf] }
 0x528   : > { %v5247_v12 = vld [vmem:[#allocation14 + $0xb0] sm:$0xf] }
 0x529   : > { %2645 = vmatmul.bf16.gmra.mxu3 %v2344_v8  ;;  %v7955_v21 = vsel %vm2653_vm1, %v5042_v56, %v2604_v31  ;;  %v2911_v26 = vmul.f32 0.5, %v5062_v40  ;;  %v5446_v31 = vld [vmem:[#allocation14 + $0x34] sm:$0xf0] }
 0x52a   : > { %v2517_v28 = vpop.f32.mrf.mxu2  ;;  %2763 = vst [vmem:[%s7806_s7 + $0x68] sm:$0xff] %v7955_v21  ;;  %2808 = vrot.lane.b32.xlu1 %v7955_v21, %s6239_s29  ;;  %v5184_v48 = vor.u32 %v5446_v31, %v5183_v46 }
 0x52b   : > { %v2518_v61 = vadd.f32 %v2517_v28, %v7788_v3  ;;  %v2944_v60 = vmul.f32 1.442695, %v2911_v26  ;;  %v5462_v28 = vld [vmem:[#allocation14 + $0xb4] sm:$0xf0] }
 0x52c   : > { %v2606_v44 = vpop.f32.mrf.mxu3  ;;  %3726 = vmatpush.bf16.msra.mxu2 %v5184_v48 }
 0x52d   : > { %v2607_v10 = vadd.f32 %v2606_v44, %v2518_v61  ;;  %5769 = vpow2.f32 %v2944_v60  ;;  %v5248_v44 = vor.u32 %v5462_v28, %v5247_v12 }
 0x52f   : > { %v5043_v19 = vclamps-f32 %v2607_v10, 10.0  ;;  %3815 = vmatpush.bf16.msra.mxu3 %v5248_v44 }
 0x531   : > { %v7964_v20 = vsel %vm2653_vm1, %v5043_v19, %v2607_v10 }
 0x532   : > { %v2519_v24 = vpop.f32.mrf.mxu2  ;;  %2764 = vst [vmem:[%s7806_s7 + $0x70] sm:$0xff] %v7964_v20  ;;  %2810 = vrot.lane.b32.xlu0 %v7964_v20, %s6239_s29 }
 0x533   : > { %v2520_v18 = vadd.f32 %v2519_v24, %v7788_v3  ;;  %v5770_v41 = vpop.eup %5769 }
 0x534   : > { %v2608_v37 = vpop.f32.mrf.mxu3  ;;  %v2783_v43 = vpop.permute.xlu1 %2782  ;;  %v3071_v39 = vmul.f32 %v5770_v41, %v5492_v22 }
 0x535   : > { %v2609_v29 = vadd.f32 %v2608_v37, %v2520_v18  ;;  %v5061_v38 = vclamps-f32 %v2783_v43, 10.0  ;;  %v2789_v53 = vpop.permute.xlu2 %2788  ;;  %v5553_v37 = vld [vmem:[%s6493_s27 + $0x8] sm:$0xff]  }
 0x536   : > { %v5064_v49 = vclamps-f32 %v2789_v53, 10.0  ;;  %v3103_v10 = vadd.f32 %v3071_v39, %v7816_v35  ;;  %v5496_v51 = vunpack.c.h.bf16 %v5553_v37  ;;  %v5495_v59 = vunpack.c.l.bf16 %v5553_v37 }
 0x537   : > { %v5044_v55 = vclamps-f32 %v2609_v29, 10.0  ;;  %v2910_v62 = vmul.f32 0.5, %v5061_v38 }
 0x538   : > { %v2913_v13 = vmul.f32 0.5, %v5064_v49  ;;  %v5451_v49 = vld [vmem:[#allocation14 + $0x64] sm:$0xf] }
 0x539   : > { %v7973_v54 = vsel %vm2653_vm1, %v5044_v55, %v2609_v29  ;;  %v2942_v34 = vmul.f32 1.442695, %v2910_v62 }
 0x53a   : > { %v2522_v23 = vpop.f32.mrf.mxu2  ;;  %2765 = vst [vmem:[%s7806_s7 + $0x78] sm:$0xff] %v7973_v54  ;;  %2812 = vrot.lane.b32.xlu2 %v7973_v54, %s6239_s29  ;;  %v2948_v56 = vmul.f32 1.442695, %v2913_v13 }
 0x53b   : > { %v2523_v0 = vadd.f32 %v2522_v23, %v7788_v3  ;;  %5771 = vpow2.f32 %v2942_v34 }
 0x53c   : > { %v2611_v7 = vpop.f32.mrf.mxu3  ;;  %5773 = vpow2.f32 %v2948_v56 }
 0x53d   : > { %v2612_v5 = vadd.f32 %v2611_v7, %v2523_v0  ;;  %v5209_v0 = vld [vmem:[#allocation14 + $0x68] sm:$0xf0]  ;;  %v5467_v7 = vld [vmem:[#allocation14 + $0xe4] sm:$0xf] }
 0x53f   : > { %v5045_v32 = vclamps-f32 %v2612_v5, 10.0 }
 0x541   : > { %v7983_v17 = vsel %vm2653_vm1, %v5045_v32, %v2612_v5  ;;  %v5772_v2 = vpop.eup %5771  ;;  %v5273_v32 = vld [vmem:[#allocation14 + $0xe8] sm:$0xf0] }
 0x542   : > { %v2524_v45 = vpop.f32.mrf.mxu2  ;;  %2766 = vst [vmem:[%s7806_s7 + $0x80] sm:$0xff] %v7983_v17  ;;  %2814 = vrot.lane.b32.xlu1 %v7983_v17, %s6239_s29  ;;  %v3070_v8 = vmul.f32 %v5772_v2, %v5491_v14  ;;  %v5774_v29 = vpop.eup %5773  ;;  %v5212_v14 = vor.u32 %v5451_v49, %v5209_v0  ;;  %v5276_v48 = vor.u32 %v5467_v7, %v5273_v32 }
 0x543   : > { %v2525_v42 = vadd.f32 %v2524_v45, %v7788_v3  ;;  %v3073_v55 = vmul.f32 %v5774_v29, %v5496_v51 }
 0x544   : > { %v2613_v61 = vpop.f32.mrf.mxu3  ;;  %v2787_v40 = vpop.permute.xlu0 %2786  ;;  %v3102_v19 = vadd.f32 %v3070_v8, %v7801_v57  ;;  %3901 = vmatpush.bf16.msrb.mxu0 %v5212_v14  ;;  %3990 = vmatpush.bf16.msrb.mxu1 %v5276_v48 }
 0x545   : > { %v2614_v26 = vadd.f32 %v2613_v61, %v2525_v42  ;;  %v5063_v24 = vclamps-f32 %v2787_v40, 10.0  ;;  %v3105_v13 = vadd.f32 %v3073_v55, %v7840_v6 }
 0x546   : > { %v3134_v9 = vpack.c.bf16 %v3103_v10, %v3102_v19  ;;  %v5175_v10 = vld [vmem:[#allocation14 + $0x20] sm:$0xf]  ;;  %v5444_v19 = vld [vmem:[#allocation14 + $0x24] sm:$0xf0] }
 0x547   : > { %v5046_v18 = vclamps-f32 %v2614_v26, 10.0  ;;  %v2912_v16 = vmul.f32 0.5, %v5063_v24  ;;  %v5176_v24 = vor.u32 %v5444_v19, %v5175_v10 }
 0x548   : > { %3259 = vmatmul.bf16.vlgmr.msra.gmra.mxu0 %v3134_v9  ;;  %3348 = vmatmul.bf16.vlgmr.msra.gmra.mxu1 %v3134_v9  ;;  %v5554_v9 = vld [vmem:[%s6493_s27 + $0x10] sm:$0xff]  }
 0x549   : > { %v2946_v15 = vmul.f32 1.442695, %v2912_v16  ;;  %v7994_v60 = vsel %vm2653_vm1, %v5046_v18, %v2614_v26  ;;  %3727 = vmatpush.bf16.msra.mxu2 %v5176_v24  ;;  %v5499_v29 = vunpack.c.l.bf16 %v5554_v9  ;;  %v5500_v55 = vunpack.c.h.bf16 %v5554_v9 }
 0x54a   : > { %v2527_v47 = vpop.f32.mrf.mxu2  ;;  %2767 = vst [vmem:[%s7806_s7 + $0x88] sm:$0xff] %v7994_v60  ;;  %2816 = vrot.lane.b32.xlu0 %v7994_v60, %s6239_s29 }
 0x54b   : > { %5775 = vpow2.f32 %v2946_v15  ;;  %v2528_v57 = vadd.f32 %v2527_v47, %v7788_v3 }
 0x54c   : > { %v2616_v35 = vpop.f32.mrf.mxu3  ;;  %v2795_v26 = vpop.permute.xlu2 %2794 }
 0x54d   : > { %v2617_v43 = vadd.f32 %v2616_v35, %v2528_v57  ;;  %v5067_v37 = vclamps-f32 %v2795_v26, 10.0  ;;  %v5239_v57 = vld [vmem:[#allocation14 + $0xa0] sm:$0xf]  ;;  %v5460_v35 = vld [vmem:[#allocation14 + $0xa4] sm:$0xf0] }
 0x54e   : > { %v5265_v26 = vld [vmem:[#allocation14 + $0xd8] sm:$0xf0] }
 0x54f   : > { %v5047_v38 = vclamps-f32 %v2617_v43, 10.0 }
 0x551   : > { %v5776_v53 = vpop.eup %5775  ;;  %v8004_v62 = vsel %vm2653_vm1, %v5047_v38, %v2617_v43  ;;  %v5240_v43 = vor.u32 %v5460_v35, %v5239_v57 }
 0x552   : > { %v2529_v11 = vpop.f32.mrf.mxu2  ;;  %2768 = vst [vmem:[%s7806_s7 + $0x90] sm:$0xff] %v8004_v62  ;;  %2818 = vrot.lane.b32.xlu2 %v8004_v62, %s6239_s29  ;;  %v3072_v34 = vmul.f32 %v5776_v53, %v5495_v59  ;;  %v2916_v53 = vmul.f32 0.5, %v5067_v37 }
 0x553   : > { %v2530_v23 = vadd.f32 %v2529_v11, %v7788_v3  ;;  %3816 = vmatpush.bf16.msra.mxu3 %v5240_v43 }
 0x554   : > { %v2618_v22 = vpop.f32.mrf.mxu3  ;;  %v2791_v5 = vpop.permute.xlu1 %2790  ;;  %v3104_v41 = vadd.f32 %v3072_v34, %v7828_v4 }
 0x555   : > { %v2619_v46 = vadd.f32 %v2618_v22, %v2530_v23  ;;  %v5065_v31 = vclamps-f32 %v2791_v5, 10.0  ;;  %v2954_v22 = vmul.f32 1.442695, %v2916_v53 }
 0x556   : > { %v3135_v39 = vpack.c.bf16 %v3105_v13, %v3104_v41 }
 0x557   : > { %v5048_v2 = vclamps-f32 %v2619_v46, 10.0  ;;  %v2914_v45 = vmul.f32 0.5, %v5065_v31 }
 0x558   : > { %3264 = vmatmul.bf16.gmra.mxu0 %v3135_v39  ;;  %3353 = vmatmul.bf16.gmra.mxu1 %v3135_v39 }
 0x559   : > { %v8015_v56 = vsel %vm2653_vm1, %v5048_v2, %v2619_v46  ;;  %v2950_v6 = vmul.f32 1.442695, %v2914_v45 }
 0x55a   : > { %v2532_v4 = vpop.f32.mrf.mxu2  ;;  %2769 = vst [vmem:[%s7806_s7 + $0x98] sm:$0xff] %v8015_v56  ;;  %2820 = vrot.lane.b32.xlu1 %v8015_v56, %s6239_s29 }
 0x55b   : > { %v2533_v8 = vadd.f32 %v2532_v4, %v7788_v3  ;;  %5777 = vpow2.f32 %v2950_v6 }
 0x55c   : > { %v2621_v42 = vpop.f32.mrf.mxu3  ;;  %v2793_v12 = vpop.permute.xlu0 %2792 }
 0x55d   : > { %v2622_v28 = vadd.f32 %v2621_v42, %v2533_v8  ;;  %v5066_v61 = vclamps-f32 %v2793_v12, 10.0  ;;  %v5555_v8 = vld [vmem:[%s6493_s27 + $0x18] sm:$0xff]   ;;  %v5449_v12 = vld [vmem:[#allocation14 + $0x54] sm:$0xf] }
 0x55e   : > { %v5503_v10 = vunpack.c.l.bf16 %v5555_v8  ;;  %v5504_v37 = vunpack.c.h.bf16 %v5555_v8 }
 0x55f   : > { %v5049_v40 = vclamps-f32 %v2622_v28, 10.0  ;;  %v2915_v44 = vmul.f32 0.5, %v5066_v61  ;;  %v5465_v61 = vld [vmem:[#allocation14 + $0xd4] sm:$0xf] }
 0x561   : > { %v2952_v18 = vmul.f32 1.442695, %v2915_v44  ;;  %v8024_v16 = vsel %vm2653_vm1, %v5049_v40, %v2622_v28  ;;  %v5778_v59 = vpop.eup %5777  ;;  %v5201_v28 = vld [vmem:[#allocation14 + $0x58] sm:$0xf0] }
 0x562   : > { %v2534_v15 = vpop.f32.mrf.mxu2  ;;  %2770 = vst [vmem:[%s7806_s7 + $0xa0] sm:$0xff] %v8024_v16  ;;  %2822 = vrot.lane.b32.xlu0 %v8024_v16, %s6239_s29  ;;  %v3074_v34 = vmul.f32 %v5778_v59, %v5499_v29  ;;  %v5204_v19 = vor.u32 %v5449_v12, %v5201_v28 }
 0x563   : > { %5779 = vpow2.f32 %v2952_v18  ;;  %v2535_v47 = vadd.f32 %v2534_v15, %v7788_v3  ;;  %v5268_v15 = vor.u32 %v5465_v61, %v5265_v26 }
 0x564   : > { %v2623_v51 = vpop.f32.mrf.mxu3  ;;  %v3106_v14 = vadd.f32 %v3074_v34, %v7852_v63  ;;  %5781 = vpow2.f32 %v2954_v22  ;;  %v2801_v39 = vpop.permute.xlu2 %2800  ;;  %3902 = vmatpush.bf16.msrb.mxu0 %v5204_v19 }
 0x565   : > { %v2624_v38 = vadd.f32 %v2623_v51, %v2535_v47  ;;  %v5070_v42 = vclamps-f32 %v2801_v39, 10.0  ;;  %3991 = vmatpush.bf16.msrb.mxu1 %v5268_v15  ;;  %v5231_v39 = vld [vmem:[#allocation14 + $0x90] sm:$0xf] }
 0x567   : > { %v5050_v11 = vclamps-f32 %v2624_v38, 10.0  ;;  %v2919_v47 = vmul.f32 0.5, %v5070_v42 }
 0x569   : > { %v5780_v23 = vpop.eup %5779  ;;  %v8034_v49 = vsel %vm2653_vm1, %v5050_v11, %v2624_v38  ;;  %v2960_v53 = vmul.f32 1.442695, %v2919_v47 }
 0x56a   : > { %v2537_v0 = vpop.f32.mrf.mxu2  ;;  %2771 = vst [vmem:[%s7806_s7 + $0xa8] sm:$0xff] %v8034_v49  ;;  %2824 = vrot.lane.b32.xlu2 %v8034_v49, %s6239_s29  ;;  %v3075_v7 = vmul.f32 %v5780_v23, %v5500_v55  ;;  %v5782_v24 = vpop.eup %5781 }
 0x56b   : > { %v2538_v5 = vadd.f32 %v2537_v0, %v7788_v3  ;;  %v3076_v51 = vmul.f32 %v5782_v24, %v5503_v10 }
 0x56c   : > { %v2626_v41 = vpop.f32.mrf.mxu3  ;;  %v2797_v13 = vpop.permute.xlu1 %2796  ;;  %v3107_v32 = vadd.f32 %v3075_v7, %v7864_v52 }
 0x56d   : > { %v2627_v46 = vadd.f32 %v2626_v41, %v2538_v5  ;;  %v5068_v31 = vclamps-f32 %v2797_v13, 10.0  ;;  %v3108_v23 = vadd.f32 %v3076_v51, %v7876_v1  ;;  %v5167_v41 = vld [vmem:[#allocation14 + $0x10] sm:$0xf]  ;;  %v5442_v13 = vld [vmem:[#allocation14 + $0x14] sm:$0xf0] }
 0x56e   : > { %v3136_v48 = vpack.c.bf16 %v3107_v32, %v3106_v14  ;;  %v5168_v14 = vor.u32 %v5442_v13, %v5167_v41  ;;  %v5257_v41 = vld [vmem:[#allocation14 + $0xc8] sm:$0xf0] }
 0x56f   : > { %v5051_v2 = vclamps-f32 %v2627_v46, 10.0  ;;  %v2917_v45 = vmul.f32 0.5, %v5068_v31  ;;  %v8073_v31 = vld [vmem:[#allocation7 + $0x4] ss:$0 sm:$0xff] }
 0x570   : > { %3269 = vmatmul.bf16.gmra.mxu0 %v3136_v48  ;;  %3358 = vmatmul.bf16.gmra.mxu1 %v3136_v48 }
 0x571   : > { %v2956_v4 = vmul.f32 1.442695, %v2917_v45  ;;  %v8045_v6 = vsel %vm2653_vm1, %v5051_v2, %v2627_v46  ;;  %3728 = vmatpush.bf16.msra.mxu2 %v5168_v14  ;;  %v5458_v2 = vld [vmem:[#allocation14 + $0x94] sm:$0xf0] }
 0x572   : > { %v2539_v63 = vpop.f32.mrf.mxu2  ;;  %2772 = vst [vmem:[%s7806_s7 + $0xb0] sm:$0xff] %v8045_v6  ;;  %2826 = vrot.lane.b32.xlu1 %v8045_v6, %s6239_s29  ;;  %v5232_v42 = vor.u32 %v5458_v2, %v5231_v39 }
 0x573   : > { %5783 = vpow2.f32 %v2956_v4  ;;  %v2540_v52 = vadd.f32 %v2539_v63, %v7788_v3 }
 0x574   : > { %v2628_v40 = vpop.f32.mrf.mxu3  ;;  %v2799_v44 = vpop.permute.xlu0 %2798  ;;  %3817 = vmatpush.bf16.msra.mxu3 %v5232_v42 }
 0x575   : > { %v2629_v18 = vadd.f32 %v2628_v40, %v2540_v52  ;;  %v5069_v9 = vclamps-f32 %v2799_v44, 10.0 }
 0x577   : > { %v5052_v57 = vclamps-f32 %v2629_v18, 10.0  ;;  %v2918_v35 = vmul.f32 0.5, %v5069_v9 }
 0x579   : > { %v5784_v29 = vpop.eup %5783  ;;  %v2958_v43 = vmul.f32 1.442695, %v2918_v35  ;;  %v8055_v59 = vsel %vm2653_vm1, %v5052_v57, %v2629_v18 }
 0x57a   : > { %v2542_v38 = vpop.f32.mrf.mxu2  ;;  %2773 = vst [vmem:[%s7806_s7 + $0xb8] sm:$0xff] %v8055_v59  ;;  %2828 = vrot.lane.b32.xlu0 %v8055_v59, %s6239_s29  ;;  %v3077_v55 = vmul.f32 %v5784_v29, %v5504_v37 }
 0x57b   : > { %v2543_v11 = vadd.f32 %v2542_v38, %v7788_v3  ;;  %5785 = vpow2.f32 %v2958_v43  ;;  %v5556_v3 = vld [vmem:[%s6493_s27 + $0x20] sm:$0xff]  }
 0x57c   : > { %v2631_v34 = vpop.f32.mrf.mxu3  ;;  %v3109_v0 = vadd.f32 %v3077_v55, %v7888_v27  ;;  %5787 = vpow2.f32 %v2960_v53  ;;  %v5507_v1 = vunpack.c.l.bf16 %v5556_v3  ;;  %v5508_v8 = vunpack.c.h.bf16 %v5556_v3  ;;  %v2807_v51 = vpop.permute.xlu2 %2806  ;;  %v5557_v55 = vld [vmem:[%s6493_s27 + $0x28] sm:$0xff]  }
 0x57d   : > { %v2632_v7 = vadd.f32 %v2631_v34, %v2543_v11  ;;  %v5073_v53 = vclamps-f32 %v2807_v51, 10.0  ;;  %v5447_v34 = vld [vmem:[#allocation14 + $0x44] sm:$0xf]  ;;  %v5223_v51 = vld [vmem:[#allocation14 + $0x80] sm:$0xf] }
 0x57e   : > { %v3137_v22 = vpack.c.bf16 %v3109_v0, %v3108_v23  ;;  %v5193_v23 = vld [vmem:[#allocation14 + $0x48] sm:$0xf0]  ;;  %v5463_v0 = vld [vmem:[#allocation14 + $0xc4] sm:$0xf] }
 0x57f   : > { %v5053_v5 = vclamps-f32 %v2632_v7, 10.0  ;;  %v5260_v3 = vor.u32 %v5463_v0, %v5257_v41 }
 0x580   : > { %3274 = vmatmul.bf16.gmra.mxu0 %v3137_v22  ;;  %3363 = vmatmul.bf16.gmra.mxu1 %v3137_v22  ;;  %v5511_v22 = vunpack.c.l.bf16 %v5557_v55 }
 0x581   : > { %v8066_v32 = vsel %vm2653_vm1, %v5053_v5, %v2632_v7  ;;  %v5786_v27 = vpop.eup %5785  ;;  %v5196_v5 = vor.u32 %v5447_v34, %v5193_v23  ;;  %3992 = vmatpush.bf16.msrb.mxu1 %v5260_v3 }
 0x582   : > { %v2544_v46 = vpop.f32.mrf.mxu2  ;;  %2774 = vst [vmem:[%s7806_s7 + $0xc0] sm:$0xff] %v8066_v32  ;;  %2830 = vrot.lane.b32.xlu2 %v8066_v32, %s6239_s29  ;;  %v5788_v63 = vpop.eup %5787  ;;  %v3078_v28 = vmul.f32 %v5786_v27, %v5507_v1  ;;  %v2922_v1 = vmul.f32 0.5, %v5073_v53 }
 0x583   : > { %v2545_v48 = vadd.f32 %v8073_v31, %v2544_v46  ;;  %v3079_v44 = vmul.f32 %v5788_v63, %v5508_v8  ;;  %v5512_v46 = vunpack.c.h.bf16 %v5557_v55  ;;  %3903 = vmatpush.bf16.msrb.mxu0 %v5196_v5  ;;  %v5159_v63 = vld [vmem:[#allocation14] sm:$0xf] }
 0x584   : > { %v2633_v45 = vpop.f32.mrf.mxu3  ;;  %v2803_v4 = vpop.permute.xlu1 %2802  ;;  %v3110_v26 = vadd.f32 %v3078_v28, %v7900_v58  ;;  %v2966_v8 = vmul.f32 1.442695, %v2922_v1 }
 0x585   : > { %v2634_v52 = vadd.f32 %v2633_v45, %v2545_v48  ;;  %v5071_v12 = vclamps-f32 %v2803_v4, 10.0  ;;  %v3111_v37 = vadd.f32 %v3079_v44, %v7912_v30 }
 0x587   : > { %v5054_v61 = vclamps-f32 %v2634_v52, 10.0  ;;  %v2920_v40 = vmul.f32 0.5, %v5071_v12  ;;  %v3138_v35 = vpack.c.bf16 %v3111_v37, %v3110_v26 }
 0x589   : > { %v8078_v10 = vsel %vm2653_vm1, %v5054_v61, %v2634_v52  ;;  %v2962_v24 = vmul.f32 1.442695, %v2920_v40  ;;  %v5440_v52 = vld [vmem:[#allocation14 + $0x4] sm:$0xf0] }
 0x58a   : > { %v2547_v19 = vpop.f32.mrf.mxu2  ;;  %2775 = vst [vmem:[%s7806_s7 + $0xc8] sm:$0xff] %v8078_v10  ;;  %2832 = vrot.lane.b32.xlu1 %v8078_v10, %s6239_s29  ;;  %v5160_v44 = vor.u32 %v5440_v52, %v5159_v63  ;;  %v5559_v52 = vld [vmem:[%s6493_s27 + $0x38] sm:$0xff]  }
 0x58b   : > { %v2548_v18 = vadd.f32 %v8073_v31, %v2547_v19  ;;  %5789 = vpow2.f32 %v2962_v24 }
 0x58c   : > { %v2636_v9 = vpop.f32.mrf.mxu3  ;;  %v2805_v15 = vpop.permute.xlu0 %2804  ;;  %3729 = vmatpush.bf16.msra.mxu2 %v5160_v44  ;;  %v5461_v44 = vld [vmem:[#allocation14 + $0xb4] sm:$0xf] }
 0x58d   : > { %v2637_v47 = vadd.f32 %v2636_v9, %v2548_v18  ;;  %v5072_v57 = vclamps-f32 %v2805_v15, 10.0 }
 0x58f   : > { %v5055_v29 = vclamps-f32 %v2637_v47, 10.0  ;;  %v2921_v43 = vmul.f32 0.5, %v5072_v57 }
 0x590   : > { %3279 = vmatmul.bf16.gmra.mxu0 %v3138_v35  ;;  %3368 = vmatmul.bf16.gmra.mxu1 %v3138_v35 }
 0x591   : > { %v2964_v38 = vmul.f32 1.442695, %v2921_v43  ;;  %v8089_v58 = vsel %vm2653_vm1, %v5055_v29, %v2637_v47  ;;  %v5790_v13 = vpop.eup %5789  ;;  %v5456_v29 = vld [vmem:[#allocation14 + $0x84] sm:$0xf0] }
 0x592   : > { %v2549_v11 = vpop.f32.mrf.mxu2  ;;  %2776 = vst [vmem:[%s7806_s7 + $0xd0] sm:$0xff] %v8089_v58  ;;  %2834 = vrot.lane.b32.xlu0 %v8089_v58, %s6239_s29  ;;  %v3080_v48 = vmul.f32 %v5790_v13, %v5511_v22  ;;  %v5224_v53 = vor.u32 %v5456_v29, %v5223_v51 }
 0x593   : > { %5791 = vpow2.f32 %v2964_v38  ;;  %v2550_v30 = vadd.f32 %v8073_v31, %v2549_v11 }
 0x594   : > { %v2638_v7 = vpop.f32.mrf.mxu3  ;;  %v3112_v61 = vadd.f32 %v3080_v48, %v7924_v36  ;;  %5793 = vpow2.f32 %v2966_v8  ;;  %v2813_v15 = vpop.permute.xlu2 %2812  ;;  %v5558_v36 = vld [vmem:[%s6493_s27 + $0x30] sm:$0xff]   ;;  %3818 = vmatpush.bf16.msra.mxu3 %v5224_v53 }
 0x595   : > { %v2639_v14 = vadd.f32 %v2638_v7, %v2550_v30  ;;  %v5515_v55 = vunpack.c.l.bf16 %v5558_v36  ;;  %v5516_v23 = vunpack.c.h.bf16 %v5558_v36 }
 0x597   : > { %v5056_v27 = vclamps-f32 %v2639_v14, 10.0 }
 0x599   : > { %v5792_v39 = vpop.eup %5791  ;;  %v8099_v2 = vsel %vm2653_vm1, %v5056_v27, %v2639_v14 }
 0x59a   : > { %v2552_v45 = vpop.f32.mrf.mxu2  ;;  %2777 = vst [vmem:[%s7806_s7 + $0xd8] sm:$0xff] %v8099_v2  ;;  %2836 = vrot.lane.b32.xlu2 %v8099_v2, %s6239_s29  ;;  %v3081_v4 = vmul.f32 %v5792_v39, %v5512_v46  ;;  %v5794_v11 = vpop.eup %5793 }
 0x59b   : > { %v2553_v42 = vadd.f32 %v8073_v31, %v2552_v45  ;;  %v3082_v5 = vmul.f32 %v5794_v11, %v5515_v55  ;;  %v5478_v55 = vld [vmem:[#allocation16 + $0x38] sm:$0xff] }
 0x59c   : > { %v2641_v12 = vpop.f32.mrf.mxu3  ;;  %v2809_v28 = vpop.permute.xlu1 %2808  ;;  %v3113_v40 = vadd.f32 %v3081_v4, %v7934_v33  ;;  %v5076_v33 = vclamps-f32 %v2813_v15, 10.0  ;;  %4302 = vmatpush.bf16.msrb.mxu2 %v5478_v55 }
 0x59d   : > { %v2642_v19 = vadd.f32 %v2641_v12, %v2553_v42  ;;  %v5074_v26 = vclamps-f32 %v2809_v28, 10.0  ;;  %v3114_v39 = vadd.f32 %v3082_v5, %v7945_v25  ;;  %v5519_v25 = vunpack.c.l.bf16 %v5559_v52  ;;  %v5486_v5 = vld [vmem:[#allocation16 + $0x78] sm:$0xff] }
 0x59e   : > { %v3139_v24 = vpack.c.bf16 %v3113_v40, %v3112_v61  ;;  %v2925_v0 = vmul.f32 0.5, %v5076_v33  ;;  %v5445_v61 = vld [vmem:[#allocation14 + $0x34] sm:$0xf]  ;;  %v5185_v40 = vld [vmem:[#allocation14 + $0x38] sm:$0xf0]  ;;  %4391 = vmatpush.bf16.msrb.mxu3 %v5486_v5 }
 0x59f   : > { %v5057_v18 = vclamps-f32 %v2642_v19, 10.0  ;;  %v2923_v9 = vmul.f32 0.5, %v5074_v26 }
 0x5a0   : > { %3284 = vmatmul.bf16.gmra.mxu0 %v3139_v24  ;;  %3373 = vmatmul.bf16.gmra.mxu1 %v3139_v24  ;;  %v2972_v1 = vmul.f32 1.442695, %v2925_v0  ;;  %v5520_v24 = vunpack.c.h.bf16 %v5559_v52 }
 0x5a1   : > { %v2968_v37 = vmul.f32 1.442695, %v2923_v9  ;;  %v8110_v47 = vsel %vm2653_vm1, %v5057_v18, %v2642_v19  ;;  %v5188_v18 = vor.u32 %v5445_v61, %v5185_v40  ;;  %v5249_v9 = vld [vmem:[#allocation14 + $0xb8] sm:$0xf0] }
 0x5a2   : > { %v2554_v57 = vpop.f32.mrf.mxu2  ;;  %2778 = vst [vmem:[%s7806_s7 + $0xe0] sm:$0xff] %v8110_v47  ;;  %2838 = vrot.lane.b32.xlu1 %v8110_v47, %s6239_s29 }
 0x5a3   : > { %5795 = vpow2.f32 %v2968_v37  ;;  %v2555_v35 = vadd.f32 %v8073_v31, %v2554_v57  ;;  %v5252_v57 = vor.u32 %v5461_v44, %v5249_v9  ;;  %3904 = vmatpush.bf16.msrb.mxu0 %v5188_v18 }
 0x5a4   : > { %v2643_v43 = vpop.f32.mrf.mxu3  ;;  %v2811_v38 = vpop.permute.xlu0 %2810 }
 0x5a5   : > { %v2644_v30 = vadd.f32 %v2643_v43, %v2555_v35  ;;  %v5075_v34 = vclamps-f32 %v2811_v38, 10.0  ;;  %3993 = vmatpush.bf16.msrb.mxu1 %v5252_v57 }
 0x5a7   : > { %v5058_v7 = vclamps-f32 %v2644_v30, 10.0  ;;  %v2924_v22 = vmul.f32 0.5, %v5075_v34 }
 0x5a9   : > { %v5796_v41 = vpop.eup %5795  ;;  %v2970_v13 = vmul.f32 1.442695, %v2924_v22  ;;  %v8120_v14 = vsel %vm2653_vm1, %v5058_v7, %v2644_v30  ;;  %v5560_v7 = vld [vmem:[%s6493_s27 + $0x40] sm:$0xff]  }
 0x5aa   : > { %2779 = vst [vmem:[%s7806_s7 + $0xe8] sm:$0xff] %v8120_v14  ;;  %2840 = vrot.lane.b32.xlu0 %v8120_v14, %s6239_s29  ;;  %v2557_v3 = vpop.f32.mrf.mxu2  ;;  %v3083_v46 = vmul.f32 %v5796_v41, %v5516_v23  ;;  %v5523_v41 = vunpack.c.l.bf16 %v5560_v7 }
 0x5ab   : > { %v2558_v27 = vadd.f32 %v8073_v31, %v2557_v3  ;;  %5797 = vpow2.f32 %v2970_v13  ;;  %v590_v13 = vld [vmem:[#allocation7 + $0x5] ss:$8 sm:$0x3] }
 0x5ac   : > { %v2646_v48 = vpop.f32.mrf.mxu3  ;;  %v3115_v45 = vadd.f32 %v3083_v46, %v7955_v21  ;;  %5799 = vpow2.f32 %v2972_v1  ;;  %v2819_v23 = vpop.permute.xlu2 %2818 }
 0x5ad   : > { %v2647_v4 = vadd.f32 %v2646_v48, %v2558_v27  ;;  %v5079_v22 = vclamps-f32 %v2819_v23, 10.0  ;;  %v8150_v27 = vperm.slane %v590_v13, 0 }
 0x5ae   : > { %v3140_v8 = vpack.c.bf16 %v3115_v45, %v3114_v39  ;;  %v8152_v45 = vperm.slane %v590_v13, 1 }
 0x5af   : > { %v5059_v42 = vclamps-f32 %v2647_v4, 10.0  ;;  %v2928_v1 = vmul.f32 0.5, %v5079_v22 }
 0x5b0   : > { %3289 = vmatmul.bf16.gmra.mxu0 %v3140_v8  ;;  %3378 = vmatmul.bf16.gmra.mxu1 %v3140_v8 }
 0x5b1   : > { %v8131_v63 = vsel %vm2653_vm1, %v5059_v42, %v2647_v4  ;;  %v5798_v21 = vpop.eup %5797  ;;  %v2978_v8 = vmul.f32 1.442695, %v2928_v1 }
 0x5b2   : > { %v2559_v12 = vpop.f32.mrf.mxu2  ;;  %2842 = vrot.lane.b32.xlu2 %v8131_v63, %s6239_s29  ;;  %2780 = vst [vmem:[%s7806_s7 + $0xf0] sm:$0xff] %v8131_v63  ;;  %v5800_v15 = vpop.eup %5799  ;;  %v3084_v33 = vmul.f32 %v5798_v21, %v5519_v25 }
 0x5b3   : > { %v2560_v28 = vadd.f32 %v8073_v31, %v2559_v12  ;;  %v3085_v29 = vmul.f32 %v5800_v15, %v5520_v24 }
 0x5b4   : > { %v2648_v19 = vpop.f32.mrf.mxu3  ;;  %v2815_v26 = vpop.permute.xlu1 %2814  ;;  %v3116_v43 = vadd.f32 %v3084_v33, %v7964_v20 }
 0x5b5   : > { %v2649_v37 = vadd.f32 %v2648_v19, %v2560_v28  ;;  %v5077_v36 = vclamps-f32 %v2815_v26, 10.0  ;;  %v3117_v11 = vadd.f32 %v3085_v29, %v7973_v54  ;;  %v5524_v54 = vunpack.c.h.bf16 %v5560_v7  ;;  %v5177_v29 = vld [vmem:[#allocation14 + $0x28] sm:$0xf0] }
 0x5b7   : > { %v5060_v35 = vclamps-f32 %v2649_v37, 10.0  ;;  %v2926_v51 = vmul.f32 0.5, %v5077_v36  ;;  %v3141_v34 = vpack.c.bf16 %v3117_v11, %v3116_v43  ;;  %v5561_v36 = vld [vmem:[%s6493_s27 + $0x48] sm:$0xff]   ;;  %v5459_v43 = vld [vmem:[#allocation14 + $0xa4] sm:$0xf] }
 0x5b8   : > { %v5527_v55 = vunpack.c.l.bf16 %v5561_v36  ;;  %v5241_v11 = vld [vmem:[#allocation14 + $0xa8] sm:$0xf0]  ;;  %v5528_v7 = vunpack.c.h.bf16 %v5561_v36 }
 0x5b9   : > { %v8141_v31 = vsel %vm2653_vm1, %v5060_v35, %v2649_v37  ;;  %v2974_v38 = vmul.f32 1.442695, %v2926_v51  ;;  %v5443_v51 = vld [vmem:[#allocation14 + $0x24] sm:$0xf] }
 0x5ba   : > { %2844 = vrot.lane.b32.xlu1 %v8141_v31, %s6239_s29  ;;  %2781 = vst [vmem:[%s7806_s7 + $0xf8] sm:$0xff] %v8141_v31 }
 0x5bb   : > { %5801 = vpow2.f32 %v2974_v38 }
 0x5bc   : > { %v2817_v53 = vpop.permute.xlu0 %2816 }
 0x5bd   : > { %v5078_v30 = vclamps-f32 %v2817_v53, 10.0  ;;  %v5180_v53 = vor.u32 %v5443_v51, %v5177_v29 }
 0x5bf   : > { %v2927_v50 = vmul.f32 0.5, %v5078_v30  ;;  %3905 = vmatpush.bf16.msrb.mxu0 %v5180_v53 }
 0x5c0   : > { %3294 = vmatmul.bf16.gmra.mxu0 %v3141_v34  ;;  %3383 = vmatmul.bf16.gmra.mxu1 %v3141_v34 }
 0x5c1   : > { %v2976_v0 = vmul.f32 1.442695, %v2927_v50  ;;  %v5802_v20 = vpop.eup %5801  ;;  %v5244_v50 = vor.u32 %v5459_v43, %v5241_v11 }
 0x5c2   : > { %v3086_v48 = vmul.f32 %v5802_v20, %v5523_v41 }
 0x5c3   : > { %5803 = vpow2.f32 %v2976_v0  ;;  %3994 = vmatpush.bf16.msrb.mxu1 %v5244_v50 }
 0x5c4   : > { %v3118_v12 = vadd.f32 %v3086_v48, %v7983_v17  ;;  %5805 = vpow2.f32 %v2978_v8  ;;  %v2825_v19 = vpop.permute.xlu2 %2824  ;;  %v5477_v48 = vld [vmem:[#allocation16 + $0x30] sm:$0xff] }
 0x5c5   : > { %v3260_v3 = vpop.f32.mrf.mxu0  ;;  %v3349_v46 = vpop.f32.mrf.mxu1  ;;  %v5082_v57 = vclamps-f32 %v2825_v19, 10.0  ;;  %4303 = vmatpush.bf16.msrb.mxu2 %v5477_v48 }
 0x5c6   : > { %v3261_v42 = vadd.f32 %v3260_v3, %v8150_v27  ;;  %v3350_v21 = vadd.f32 %v3349_v46, %v8152_v45 }
 0x5c7   : > { %v2931_v22 = vmul.f32 0.5, %v5082_v57 }
 0x5c8   : > { %v3429_v9 = vmax.f32 %v3261_v42, 0.0  ;;  %v3430_v17 = vmax.f32 %v3350_v21, 0.0 }
 0x5c9   : > { %v5804_v39 = vpop.eup %5803  ;;  %v2984_v46 = vmul.f32 1.442695, %v2931_v22  ;;  %v5169_v22 = vld [vmem:[#allocation14 + $0x18] sm:$0xf0] }
 0x5ca   : > { %v3087_v4 = vmul.f32 %v5804_v39, %v5524_v54  ;;  %v5806_v30 = vpop.eup %5805 }
 0x5cb   : > { %v3088_v41 = vmul.f32 %v5806_v30, %v5527_v55 }
 0x5cc   : > { %v2821_v52 = vpop.permute.xlu1 %2820  ;;  %v3119_v25 = vadd.f32 %v3087_v4, %v7994_v60 }
 0x5cd   : > { %v5080_v28 = vclamps-f32 %v2821_v52, 10.0  ;;  %v3262_v61 = vpop.f32.mrf.mxu0  ;;  %v3351_v40 = vpop.f32.mrf.mxu1  ;;  %v3120_v54 = vadd.f32 %v3088_v41, %v8004_v62 }
 0x5ce   : > { %v3142_v44 = vpack.c.bf16 %v3119_v25, %v3118_v12  ;;  %v3263_v24 = vadd.f32 %v3262_v61, %v8150_v27  ;;  %v3352_v18 = vadd.f32 %v3351_v40, %v8152_v45  ;;  %v5562_v61 = vld [vmem:[%s6493_s27 + $0x50] sm:$0xff]  }
 0x5cf   : > { %v2929_v26 = vmul.f32 0.5, %v5080_v28  ;;  %v5531_v40 = vunpack.c.l.bf16 %v5562_v61 }
 0x5d0   : > { %3299 = vmatmul.bf16.gmra.mxu0 %v3142_v44  ;;  %3388 = vmatmul.bf16.gmra.mxu1 %v3142_v44  ;;  %v3431_v60 = vmax.f32 %v3263_v24, 0.0  ;;  %v3432_v37 = vmax.f32 %v3352_v18, 0.0  ;;  %v5485_v24 = vld [vmem:[#allocation16 + $0x70] sm:$0xff] }
 0x5d1   : > { %v2980_v15 = vmul.f32 1.442695, %v2929_v26  ;;  %4392 = vmatpush.bf16.msrb.mxu3 %v5485_v24 }
 0x5d2   : > { %v8161_v33 = vpack.c.bf16 %v3431_v60, %v3429_v9  ;;  %v8163_v35 = vpack.c.bf16 %v3432_v37, %v3430_v17  ;;  %v5532_v9 = vunpack.c.h.bf16 %v5562_v61 }
 0x5d3   : > { %5807 = vpow2.f32 %v2980_v15 }
 0x5d4   : > { %v2823_v38 = vpop.permute.xlu0 %2822  ;;  %3730 = vmatmul.bf16.vlgmr.msra.gmra.mxu2 %v8161_v33  ;;  %3819 = vmatmul.bf16.vlgmr.msra.gmra.mxu3 %v8163_v35 }
 0x5d5   : > { %v5081_v34 = vclamps-f32 %v2823_v38, 10.0  ;;  %v3265_v23 = vpop.f32.mrf.mxu0  ;;  %v3354_v0 = vpop.f32.mrf.mxu1 }
 0x5d6   : > { %v3266_v39 = vadd.f32 %v3265_v23, %v8150_v27  ;;  %v3355_v4 = vadd.f32 %v3354_v0, %v8152_v45  ;;  %v5563_v23 = vld [vmem:[%s6493_s27 + $0x58] sm:$0xff]  }
 0x5d7   : > { %v2930_v5 = vmul.f32 0.5, %v5081_v34  ;;  %v5535_v41 = vunpack.c.l.bf16 %v5563_v23 }
 0x5d8   : > { %v3433_v62 = vmax.f32 %v3266_v39, 0.0 }
 0x5d9   : > { %v5808_v20 = vpop.eup %5807  ;;  %v2982_v13 = vmul.f32 1.442695, %v2930_v5  ;;  %v5457_v5 = vld [vmem:[#allocation14 + $0x94] sm:$0xf] }
 0x5da   : > { %v3089_v3 = vmul.f32 %v5808_v20, %v5528_v7 }
 0x5db   : > { %5809 = vpow2.f32 %v2982_v13  ;;  %v5233_v13 = vld [vmem:[#allocation14 + $0x98] sm:$0xf0] }
 0x5dc   : > { %v3121_v1 = vadd.f32 %v3089_v3, %v8015_v56  ;;  %5811 = vpow2.f32 %v2984_v46  ;;  %v3434_v56 = vmax.f32 %v3355_v4, 0.0  ;;  %v2831_v30 = vpop.permute.xlu2 %2830 }
 0x5dd   : > { %v3267_v8 = vpop.f32.mrf.mxu0  ;;  %v3356_v42 = vpop.f32.mrf.mxu1  ;;  %v5085_v0 = vclamps-f32 %v2831_v30, 10.0 }
 0x5de   : > { %v3143_v52 = vpack.c.bf16 %v3121_v1, %v3120_v54  ;;  %v3268_v12 = vadd.f32 %v3267_v8, %v8150_v27  ;;  %v3357_v25 = vadd.f32 %v3356_v42, %v8152_v45  ;;  %v5236_v1 = vor.u32 %v5457_v5, %v5233_v13 }
 0x5df   : > { %v2934_v48 = vmul.f32 0.5, %v5085_v0  ;;  %v5536_v8 = vunpack.c.h.bf16 %v5563_v23 }
 0x5e0   : > { %3304 = vmatmul.bf16.gmra.mxu0 %v3143_v52  ;;  %3393 = vmatmul.bf16.gmra.mxu1 %v3143_v52  ;;  %v3435_v21 = vmax.f32 %v3268_v12, 0.0  ;;  %v3436_v28 = vmax.f32 %v3357_v25, 0.0 }
 0x5e1   : > { %v5810_v44 = vpop.eup %5809  ;;  %3995 = vmatpush.bf16.msrb.mxu1 %v5236_v1 }
 0x5e2   : > { %v8174_v19 = vpack.c.bf16 %v3436_v28, %v3434_v56  ;;  %v8176_v26 = vpack.c.bf16 %v3435_v21, %v3433_v62  ;;  %v5812_v17 = vpop.eup %5811  ;;  %v3090_v60 = vmul.f32 %v5810_v44, %v5531_v40  ;;  %v2990_v21 = vmul.f32 1.442695, %v2934_v48  ;;  %v5476_v44 = vld [vmem:[#allocation16 + $0x28] sm:$0xff] }
 0x5e3   : > { %v3091_v36 = vmul.f32 %v5812_v17, %v5532_v9  ;;  %4304 = vmatpush.bf16.msrb.mxu2 %v5476_v44  ;;  %v5161_v44 = vld [vmem:[#allocation14 + $0x8] sm:$0xf0] }
 0x5e4   : > { %v2827_v18 = vpop.permute.xlu1 %2826  ;;  %3824 = vmatmul.bf16.gmra.mxu3 %v8174_v19  ;;  %3735 = vmatmul.bf16.gmra.mxu2 %v8176_v26  ;;  %v3122_v57 = vadd.f32 %v3090_v60, %v8024_v16  ;;  %v5441_v16 = vld [vmem:[#allocation14 + $0x14] sm:$0xf] }
 0x5e5   : > { %v5083_v15 = vclamps-f32 %v2827_v18, 10.0  ;;  %v3123_v43 = vadd.f32 %v3091_v36, %v8034_v49  ;;  %v5172_v20 = vor.u32 %v5441_v16, %v5169_v22 }
 0x5e7   : > { %v2932_v37 = vmul.f32 0.5, %v5083_v15  ;;  %v3144_v11 = vpack.c.bf16 %v3123_v43, %v3122_v57  ;;  %3906 = vmatpush.bf16.msrb.mxu0 %v5172_v20 }
 0x5e9   : > { %v2986_v51 = vmul.f32 1.442695, %v2932_v37 }
 0x5eb   : > { %5813 = vpow2.f32 %v2986_v51  ;;  %v5564_v51 = vld [vmem:[%s6493_s27 + $0x60] sm:$0xff]  }
 0x5ec   : > { %v2829_v29 = vpop.permute.xlu0 %2828  ;;  %v5540_v16 = vunpack.c.h.bf16 %v5564_v51 }
 0x5ed   : > { %v5084_v38 = vclamps-f32 %v2829_v29, 10.0  ;;  %v3270_v55 = vpop.f32.mrf.mxu0  ;;  %v3359_v53 = vpop.f32.mrf.mxu1 }
 0x5ee   : > { %v3271_v7 = vadd.f32 %v3270_v55, %v8150_v27  ;;  %v3360_v49 = vadd.f32 %v3359_v53, %v8152_v45  ;;  %v5484_v55 = vld [vmem:[#allocation16 + $0x68] sm:$0xff] }
 0x5ef   : > { %v2933_v34 = vmul.f32 0.5, %v5084_v38  ;;  %v5539_v38 = vunpack.c.l.bf16 %v5564_v51  ;;  %4393 = vmatpush.bf16.msrb.mxu3 %v5484_v55 }
 0x5f0   : > { %3309 = vmatmul.bf16.gmra.mxu0 %v3144_v11  ;;  %3398 = vmatmul.bf16.gmra.mxu1 %v3144_v11  ;;  %v3437_v42 = vmax.f32 %v3271_v7, 0.0  ;;  %v3438_v52 = vmax.f32 %v3360_v49, 0.0 }
 0x5f1   : > { %v2988_v50 = vmul.f32 1.442695, %v2933_v34  ;;  %v5814_v3 = vpop.eup %5813 }
 0x5f2   : > { %v3092_v62 = vmul.f32 %v5814_v3, %v5535_v41 }
 0x5f3   : > { %5815 = vpow2.f32 %v2988_v50 }
 0x5f4   : > { %v3124_v18 = vadd.f32 %v3092_v62, %v8045_v6  ;;  %5817 = vpow2.f32 %v2990_v21  ;;  %v2837_v36 = vpop.permute.xlu2 %2836 }
 0x5f5   : > { %v3272_v46 = vpop.f32.mrf.mxu0  ;;  %v3361_v54 = vpop.f32.mrf.mxu1  ;;  %v5088_v43 = vclamps-f32 %v2837_v36, 10.0 }
 0x5f6   : > { %v3273_v39 = vadd.f32 %v3272_v46, %v8150_v27  ;;  %v3362_v4 = vadd.f32 %v3361_v54, %v8152_v45 }
 0x5f7   : > { %v2937_v23 = vmul.f32 0.5, %v5088_v43 }
 0x5f8   : > { %v3439_v12 = vmax.f32 %v3273_v39, 0.0  ;;  %v3440_v25 = vmax.f32 %v3362_v4, 0.0 }
 0x5f9   : > { %v5816_v56 = vpop.eup %5815  ;;  %v2996_v54 = vmul.f32 1.442695, %v2937_v23 }
 0x5fa   : > { %v8187_v28 = vpack.c.bf16 %v3440_v25, %v3438_v52  ;;  %v8189_v61 = vpack.c.bf16 %v3439_v12, %v3437_v42  ;;  %v3093_v40 = vmul.f32 %v5816_v56, %v5536_v8  ;;  %v5818_v53 = vpop.eup %5817  ;;  %v5565_v25 = vld [vmem:[%s6493_s27 + $0x68] sm:$0xff]  }
 0x5fb   : > { %v3094_v5 = vmul.f32 %v5818_v53, %v5539_v38  ;;  %v5543_v62 = vunpack.c.l.bf16 %v5565_v25  ;;  %v5544_v21 = vunpack.c.h.bf16 %v5565_v25 }
 0x5fc   : > { %3829 = vmatmul.bf16.gmra.mxu3 %v8187_v28  ;;  %v2833_v24 = vpop.permute.xlu1 %2832  ;;  %3740 = vmatmul.bf16.gmra.mxu2 %v8189_v61  ;;  %v3125_v9 = vadd.f32 %v3093_v40, %v8055_v59  ;;  %v5439_v40 = vld [vmem:[#allocation14 + $0x4] sm:$0xf] }
 0x5fd   : > { %v5086_v17 = vclamps-f32 %v2833_v24, 10.0  ;;  %v3275_v15 = vpop.f32.mrf.mxu0  ;;  %v3364_v60 = vpop.f32.mrf.mxu1  ;;  %v3126_v4 = vadd.f32 %v3094_v5, %v8066_v32  ;;  %v5455_v24 = vld [vmem:[#allocation14 + $0x84] sm:$0xf] }
 0x5fe   : > { %v3145_v37 = vpack.c.bf16 %v3125_v9, %v3124_v18  ;;  %v3276_v6 = vadd.f32 %v3275_v15, %v8150_v27  ;;  %v3365_v59 = vadd.f32 %v3364_v60, %v8152_v45  ;;  %v5225_v15 = vld [vmem:[#allocation14 + $0x88] sm:$0xf0] }
 0x5ff   : > { %v2935_v57 = vmul.f32 0.5, %v5086_v17  ;;  %v5164_v17 = vor.u32 %v5439_v40, %v5161_v44 }
 0x600   : > { %3314 = vmatmul.bf16.gmra.mxu0 %v3145_v37  ;;  %3403 = vmatmul.bf16.gmra.mxu1 %v3145_v37  ;;  %v3441_v49 = vmax.f32 %v3276_v6, 0.0  ;;  %v3442_v41 = vmax.f32 %v3365_v59, 0.0 }
 0x601   : > { %v2992_v29 = vmul.f32 1.442695, %v2935_v57  ;;  %v5228_v57 = vor.u32 %v5455_v24, %v5225_v15  ;;  %3907 = vmatpush.bf16.msrb.mxu0 %v5164_v17 }
 0x603   : > { %5819 = vpow2.f32 %v2992_v29  ;;  %3996 = vmatpush.bf16.msrb.mxu1 %v5228_v57 }
 0x604   : > { %v2835_v11 = vpop.permute.xlu0 %2834 }
 0x605   : > { %v5087_v30 = vclamps-f32 %v2835_v11, 10.0  ;;  %v3277_v34 = vpop.f32.mrf.mxu0  ;;  %v3366_v50 = vpop.f32.mrf.mxu1 }
 0x606   : > { %v3278_v0 = vadd.f32 %v3277_v34, %v8150_v27  ;;  %v3367_v7 = vadd.f32 %v3366_v50, %v8152_v45 }
 0x607   : > { %v2936_v22 = vmul.f32 0.5, %v5087_v30 }
 0x608   : > { %v3443_v20 = vmax.f32 %v3278_v0, 0.0  ;;  %v3444_v13 = vmax.f32 %v3367_v7, 0.0 }
 0x609   : > { %v5820_v3 = vpop.eup %5819  ;;  %v2994_v46 = vmul.f32 1.442695, %v2936_v22 }
 0x60a   : > { %v8200_v1 = vpack.c.bf16 %v3443_v20, %v3441_v49  ;;  %v8202_v48 = vpack.c.bf16 %v3444_v13, %v3442_v41  ;;  %v3095_v39 = vmul.f32 %v5820_v3, %v5540_v16  ;;  %v5475_v16 = vld [vmem:[#allocation16 + $0x20] sm:$0xff] }
 0x60b   : > { %5821 = vpow2.f32 %v2994_v46  ;;  %4305 = vmatpush.bf16.msrb.mxu2 %v5475_v16  ;;  %v5566_v46 = vld [vmem:[%s6493_s27 + $0x70] sm:$0xff]  }
 0x60c   : > { %3745 = vmatmul.bf16.gmra.mxu2 %v8200_v1  ;;  %3834 = vmatmul.bf16.gmra.mxu3 %v8202_v48  ;;  %v3127_v8 = vadd.f32 %v3095_v39, %v8078_v10  ;;  %5823 = vpow2.f32 %v2996_v54  ;;  %v2843_v20 = vpop.permute.xlu2 %2842 }
 0x60d   : > { %v3280_v42 = vpop.f32.mrf.mxu0  ;;  %v3369_v52 = vpop.f32.mrf.mxu1  ;;  %v5091_v54 = vclamps-f32 %v2843_v20, 10.0 }
 0x60e   : > { %v3146_v12 = vpack.c.bf16 %v3127_v8, %v3126_v4  ;;  %v3281_v9 = vadd.f32 %v3280_v42, %v8150_v27  ;;  %v3370_v32 = vadd.f32 %v3369_v52, %v8152_v45  ;;  %v5547_v4 = vunpack.c.l.bf16 %v5566_v46 }
 0x610   : > { %3319 = vmatmul.bf16.gmra.mxu0 %v3146_v12  ;;  %3408 = vmatmul.bf16.gmra.mxu1 %v3146_v12  ;;  %v3445_v53 = vmax.f32 %v3281_v9, 0.0  ;;  %v3446_v6 = vmax.f32 %v3370_v32, 0.0  ;;  %v2940_v12 = vmul.f32 0.5, %v5091_v54 }
 0x611   : > { %v5822_v56 = vpop.eup %5821 }
 0x612   : > { %v5824_v18 = vpop.eup %5823  ;;  %v3096_v43 = vmul.f32 %v5822_v56, %v5543_v62  ;;  %v5548_v56 = vunpack.c.h.bf16 %v5566_v46  ;;  %v3002_v32 = vmul.f32 1.442695, %v2940_v12 }
 0x613   : > { %v3097_v55 = vmul.f32 %v5824_v18, %v5544_v21 }
 0x614   : > { %v2839_v10 = vpop.permute.xlu1 %2838  ;;  %v3128_v50 = vadd.f32 %v3096_v43, %v8089_v58  ;;  %v5483_v58 = vld [vmem:[#allocation16 + $0x60] sm:$0xff] }
 0x615   : > { %v5089_v60 = vclamps-f32 %v2839_v10, 10.0  ;;  %v3282_v37 = vpop.f32.mrf.mxu0  ;;  %v3371_v36 = vpop.f32.mrf.mxu1  ;;  %v3129_v7 = vadd.f32 %v3097_v55, %v8099_v2  ;;  %4394 = vmatpush.bf16.msrb.mxu3 %v5483_v58  ;;  %v5567_v55 = vld [vmem:[%s6493_s27 + $0x78] sm:$0xff]  }
 0x616   : > { %v3283_v51 = vadd.f32 %v3282_v37, %v8150_v27  ;;  %v3372_v29 = vadd.f32 %v3371_v36, %v8152_v45 }
 0x617   : > { %v2938_v38 = vmul.f32 0.5, %v5089_v60  ;;  %v3147_v41 = vpack.c.bf16 %v3129_v7, %v3128_v50  ;;  %v5552_v7 = vunpack.c.h.bf16 %v5567_v55 }
 0x618   : > { %v3447_v59 = vmax.f32 %v3283_v51, 0.0  ;;  %v3448_v11 = vmax.f32 %v3372_v29, 0.0 }
 0x619   : > { %v2998_v23 = vmul.f32 1.442695, %v2938_v38 }
 0x61a   : > { %v8213_v30 = vpack.c.bf16 %v3447_v59, %v3445_v53  ;;  %v8215_v34 = vpack.c.bf16 %v3448_v11, %v3446_v6  ;;  %v5551_v6 = vunpack.c.l.bf16 %v5567_v55 }
 0x61b   : > { %5825 = vpow2.f32 %v2998_v23 }
 0x61c   : > { %v2841_v0 = vpop.permute.xlu0 %2840  ;;  %3750 = vmatmul.bf16.gmra.mxu2 %v8213_v30  ;;  %3839 = vmatmul.bf16.gmra.mxu3 %v8215_v34 }
 0x61d   : > { %v5090_v22 = vclamps-f32 %v2841_v0, 10.0  ;;  %v3285_v5 = vpop.f32.mrf.mxu0  ;;  %v3374_v49 = vpop.f32.mrf.mxu1 }
 0x61e   : > { %v3286_v39 = vadd.f32 %v3285_v5, %v8150_v27  ;;  %v3375_v2 = vadd.f32 %v3374_v49, %v8152_v45 }
 0x61f   : > { %v2939_v13 = vmul.f32 0.5, %v5090_v22 }
 0x620   : > { %3324 = vmatmul.bf16.gmra.mxu0 %v3147_v41  ;;  %3413 = vmatmul.bf16.gmra.mxu1 %v3147_v41  ;;  %v3449_v21 = vmax.f32 %v3286_v39, 0.0  ;;  %v3450_v40 = vmax.f32 %v3375_v2, 0.0 }
 0x621   : > { %v3000_v3 = vmul.f32 1.442695, %v2939_v13  ;;  %v5826_v8 = vpop.eup %5825 }
 0x622   : > { %v3098_v18 = vmul.f32 %v5826_v8, %v5547_v4  ;;  %v5474_v4 = vld [vmem:[#allocation16 + $0x18] sm:$0xff] }
 0x623   : > { %5827 = vpow2.f32 %v3000_v3  ;;  %4306 = vmatpush.bf16.msrb.mxu2 %v5474_v4 }
 0x624   : > { %v3130_v37 = vadd.f32 %v3098_v18, %v8110_v47  ;;  %5829 = vpow2.f32 %v3002_v32 }
 0x625   : > { %v3287_v42 = vpop.f32.mrf.mxu0  ;;  %v3376_v52 = vpop.f32.mrf.mxu1 }
 0x626   : > { %v3288_v25 = vadd.f32 %v3287_v42, %v8150_v27  ;;  %v3377_v62 = vadd.f32 %v3376_v52, %v8152_v45  ;;  %v5482_v42 = vld [vmem:[#allocation16 + $0x58] sm:$0xff] }
 0x627   : > { %4395 = vmatpush.bf16.msrb.mxu3 %v5482_v42 }
 0x628   : > { %v3451_v44 = vmax.f32 %v3288_v25, 0.0  ;;  %v3452_v24 = vmax.f32 %v3377_v62, 0.0 }
 0x629   : > { %v5828_v9 = vpop.eup %5827 }
 0x62a   : > { %v8226_v10 = vpack.c.bf16 %v3451_v44, %v3449_v21  ;;  %v8228_v17 = vpack.c.bf16 %v3452_v24, %v3450_v40  ;;  %v3099_v15 = vmul.f32 %v5828_v9, %v5548_v56  ;;  %v5830_v59 = vpop.eup %5829 }
 0x62b   : > { %v3100_v16 = vmul.f32 %v5830_v59, %v5551_v6 }
 0x62c   : > { %3755 = vmatmul.bf16.gmra.mxu2 %v8226_v10  ;;  %3844 = vmatmul.bf16.gmra.mxu3 %v8228_v17  ;;  %v2845_v60 = vpop.permute.xlu1 %2844  ;;  %v3131_v36 = vadd.f32 %v3099_v15, %v8120_v14  ;;  %v8259_v15 = vld [vmem:[#allocation7 + $0x6] ss:$8 sm:$0x3] }
 0x62d   : > { %v5092_v57 = vclamps-f32 %v2845_v60, 10.0  ;;  %v3290_v51 = vpop.f32.mrf.mxu0  ;;  %v3379_v29 = vpop.f32.mrf.mxu1  ;;  %v3132_v46 = vadd.f32 %v3100_v16, %v8131_v63 }
 0x62e   : > { %v3148_v43 = vpack.c.bf16 %v3131_v36, %v3130_v37  ;;  %v3291_v11 = vadd.f32 %v3290_v51, %v8150_v27  ;;  %v3380_v50 = vadd.f32 %v3379_v29, %v8152_v45  ;;  %v8264_v51 = vperm.slane %v8259_v15, 0 }
 0x62f   : > { %v2941_v38 = vmul.f32 0.5, %v5092_v57 }
 0x630   : > { %3329 = vmatmul.bf16.gmra.mxu0 %v3148_v43  ;;  %3418 = vmatmul.bf16.gmra.mxu1 %v3148_v43  ;;  %v3453_v22 = vmax.f32 %v3291_v11, 0.0  ;;  %v3454_v5 = vmax.f32 %v3380_v50, 0.0 }
 0x631   : > { %v3004_v53 = vmul.f32 1.442695, %v2941_v38 }
 0x633   : > { %5831 = vpow2.f32 %v3004_v53 }
 0x635   : > { %v3292_v47 = vpop.f32.mrf.mxu0  ;;  %v3381_v23 = vpop.f32.mrf.mxu1 }
 0x636   : > { %v3293_v14 = vadd.f32 %v3292_v47, %v8150_v27  ;;  %v3382_v0 = vadd.f32 %v3381_v23, %v8152_v45  ;;  %v5473_v23 = vld [vmem:[#allocation16 + $0x10] sm:$0xff] }
 0x637   : > { %4307 = vmatpush.bf16.msrb.mxu2 %v5473_v23  ;;  %v5472_v23 = vld [vmem:[#allocation16 + $0x8] sm:$0xff] }
 0x638   : > { %v3455_v49 = vmax.f32 %v3293_v14, 0.0  ;;  %v3456_v41 = vmax.f32 %v3382_v0, 0.0 }
 0x639   : > { %v5832_v20 = vpop.eup %5831 }
 0x63a   : > { %v8239_v13 = vpack.c.bf16 %v3455_v49, %v3453_v22  ;;  %v8241_v58 = vpack.c.bf16 %v3456_v41, %v3454_v5  ;;  %v3101_v3 = vmul.f32 %v5832_v20, %v5552_v7  ;;  %v5481_v22 = vld [vmem:[#allocation16 + $0x50] sm:$0xff] }
 0x63b   : > { %4396 = vmatpush.bf16.msrb.mxu3 %v5481_v22  ;;  %4308 = vmatpush.bf16.msrb.mxu2 %v5472_v23 }
 0x63c   : > { %3760 = vmatmul.bf16.gmra.mxu2 %v8239_v13  ;;  %3849 = vmatmul.bf16.gmra.mxu3 %v8241_v58  ;;  %v3133_v54 = vadd.f32 %v3101_v3, %v8141_v31 }
 0x63d   : > { %v3295_v39 = vpop.f32.mrf.mxu0  ;;  %v3384_v2 = vpop.f32.mrf.mxu1 }
 0x63e   : > { %v3149_v8 = vpack.c.bf16 %v3133_v54, %v3132_v46  ;;  %v3296_v52 = vadd.f32 %v3295_v39, %v8150_v27  ;;  %v3385_v12 = vadd.f32 %v3384_v2, %v8152_v45 }
 0x640   : > { %3334 = vmatmul.bf16.gmra.mxu0 %v3149_v8  ;;  %3423 = vmatmul.bf16.gmra.mxu1 %v3149_v8  ;;  %v3457_v31 = vmax.f32 %v3296_v52, 0.0  ;;  %v3458_v21 = vmax.f32 %v3385_v12, 0.0 }
 0x645   : > { %v3297_v25 = vpop.f32.mrf.mxu0  ;;  %v3386_v62 = vpop.f32.mrf.mxu1 }
 0x646   : > { %v3298_v56 = vadd.f32 %v3297_v25, %v8150_v27  ;;  %v3387_v63 = vadd.f32 %v3386_v62, %v8152_v45 }
 0x648   : > { %v3459_v40 = vmax.f32 %v3298_v56, 0.0  ;;  %v3460_v44 = vmax.f32 %v3387_v63, 0.0 }
 0x64a   : > { %v8251_v24 = vpack.c.bf16 %v3459_v40, %v3457_v31  ;;  %v8253_v18 = vpack.c.bf16 %v3460_v44, %v3458_v21 }
 0x64c   : > { %3765 = vmatmul.bf16.gmra.mxu2 %v8251_v24  ;;  %3854 = vmatmul.bf16.gmra.mxu3 %v8253_v18 }
 0x64d   : > { %v3300_v9 = vpop.f32.mrf.mxu0  ;;  %v3389_v32 = vpop.f32.mrf.mxu1 }
 0x64e   : > { %v3301_v60 = vadd.f32 %v3300_v9, %v8150_v27  ;;  %v3390_v37 = vadd.f32 %v3389_v32, %v8152_v45 }
 0x650   : > { %3908 = vmatmul.bf16.vlgmr.msrb.gmra.mxu0 %v8161_v33  ;;  %3997 = vmatmul.bf16.vlgmr.msrb.gmra.mxu1 %v8163_v35  ;;  %v3461_v38 = vmax.f32 %v3301_v60, 0.0  ;;  %v3462_v55 = vmax.f32 %v3390_v37, 0.0 }
 0x655   : > { %v3302_v36 = vpop.f32.mrf.mxu0  ;;  %v3391_v57 = vpop.f32.mrf.mxu1 }
 0x656   : > { %v3303_v29 = vadd.f32 %v3302_v36, %v8150_v27  ;;  %v3392_v43 = vadd.f32 %v3391_v57, %v8152_v45 }
 0x657   : > { %v3731_v35 = vpop.f32.mrf.mxu2  ;;  %v3820_v6 = vpop.f32.mrf.mxu3 }
 0x658   : > { %v3463_v33 = vmax.f32 %v3303_v29, 0.0  ;;  %v3464_v53 = vmax.f32 %v3392_v43, 0.0  ;;  %v3732_v59 = vadd.f32 %v3731_v35, %v8264_v51 }
 0x65a   : > { %v8269_v11 = vpack.c.bf16 %v3463_v33, %v3461_v38  ;;  %v8271_v50 = vpack.c.bf16 %v3464_v53, %v3462_v55  ;;  %v3821_v47 = vadd.f32 %v3820_v6, %v3732_v59 }
 0x65c   : > { %3770 = vmatmul.bf16.gmra.mxu2 %v8269_v11  ;;  %3859 = vmatmul.bf16.gmra.mxu3 %v8271_v50  ;;  %v4078_v3 = vmax.f32 %v3821_v47, 0.0 }
 0x65d   : > { %v3305_v14 = vpop.f32.mrf.mxu0  ;;  %v3394_v0 = vpop.f32.mrf.mxu1 }
 0x65e   : > { %v3306_v41 = vadd.f32 %v3305_v14, %v8150_v27  ;;  %v3395_v20 = vadd.f32 %v3394_v0, %v8152_v45 }
 0x65f   : > { %v3733_v7 = vpop.f32.mrf.mxu2  ;;  %v3822_v16 = vpop.f32.mrf.mxu3 }
 0x660   : > { %3913 = vmatmul.bf16.gmra.mxu0 %v8176_v26  ;;  %4002 = vmatmul.bf16.gmra.mxu1 %v8174_v19  ;;  %v3734_v5 = vadd.f32 %v3733_v7, %v8264_v51  ;;  %v3465_v19 = vmax.f32 %v3306_v41, 0.0  ;;  %v3466_v8 = vmax.f32 %v3395_v20, 0.0 }
 0x662   : > { %v3823_v49 = vadd.f32 %v3822_v16, %v3734_v5  ;;  %v5480_v5 = vld [vmem:[#allocation16 + $0x48] sm:$0xff] }
 0x663   : > { %4397 = vmatpush.bf16.msrb.mxu3 %v5480_v5 }
 0x664   : > { %v4080_v46 = vmax.f32 %v3823_v49, 0.0 }
 0x665   : > { %v3307_v54 = vpop.f32.mrf.mxu0  ;;  %v3396_v39 = vpop.f32.mrf.mxu1 }
 0x666   : > { %v3308_v2 = vadd.f32 %v3307_v54, %v8150_v27  ;;  %v3397_v4 = vadd.f32 %v3396_v39, %v8152_v45  ;;  %v8282_v26 = vpack.c.bf16 %v4080_v46, %v4078_v3 }
 0x667   : > { %v3736_v12 = vpop.f32.mrf.mxu2  ;;  %v3825_v25 = vpop.f32.mrf.mxu3 }
 0x668   : > { %v3467_v42 = vmax.f32 %v3308_v2, 0.0  ;;  %v3468_v52 = vmax.f32 %v3397_v4, 0.0  ;;  %v3737_v62 = vadd.f32 %v3736_v12, %v8264_v51 }
 0x66a   : > { %v8285_v56 = vpack.c.bf16 %v3467_v42, %v3465_v19  ;;  %v8287_v63 = vpack.c.bf16 %v3468_v52, %v3466_v8  ;;  %v3826_v31 = vadd.f32 %v3825_v25, %v3737_v62 }
 0x66c   : > { %3775 = vmatmul.bf16.gmra.mxu2 %v8285_v56  ;;  %3864 = vmatmul.bf16.gmra.mxu3 %v8287_v63  ;;  %v4082_v57 = vmax.f32 %v3826_v31, 0.0 }
 0x66d   : > { %v3310_v21 = vpop.f32.mrf.mxu0  ;;  %v3399_v40 = vpop.f32.mrf.mxu1 }
 0x66e   : > { %v3311_v37 = vadd.f32 %v3310_v21, %v8150_v27  ;;  %v3400_v36 = vadd.f32 %v3399_v40, %v8152_v45 }
 0x66f   : > { %v3738_v44 = vpop.f32.mrf.mxu2  ;;  %v3827_v32 = vpop.f32.mrf.mxu3 }
 0x670   : > { %3918 = vmatmul.bf16.gmra.mxu0 %v8189_v61  ;;  %4007 = vmatmul.bf16.gmra.mxu1 %v8187_v28  ;;  %v3739_v9 = vadd.f32 %v3738_v44, %v8264_v51  ;;  %v3469_v61 = vmax.f32 %v3311_v37, 0.0  ;;  %v3470_v28 = vmax.f32 %v3400_v36, 0.0 }
 0x672   : > { %v3828_v60 = vadd.f32 %v3827_v32, %v3739_v9 }
 0x674   : > { %v4084_v29 = vmax.f32 %v3828_v60, 0.0 }
 0x675   : > { %v3312_v43 = vpop.f32.mrf.mxu0  ;;  %v3401_v38 = vpop.f32.mrf.mxu1 }
 0x676   : > { %v3313_v55 = vadd.f32 %v3312_v43, %v8150_v27  ;;  %v3402_v33 = vadd.f32 %v3401_v38, %v8152_v45  ;;  %v8298_v53 = vpack.c.bf16 %v4084_v29, %v4082_v57 }
 0x678   : > { %v3471_v35 = vmax.f32 %v3313_v55, 0.0  ;;  %v3472_v6 = vmax.f32 %v3402_v33, 0.0 }
 0x67a   : > { %v8300_v59 = vpack.c.bf16 %v3471_v35, %v3469_v61  ;;  %v8302_v47 = vpack.c.bf16 %v3472_v6, %v3470_v28 }
 0x67c   : > { %3780 = vmatmul.bf16.gmra.mxu2 %v8300_v59  ;;  %3869 = vmatmul.bf16.gmra.mxu3 %v8302_v47 }
 0x67d   : > { %v3315_v14 = vpop.f32.mrf.mxu0  ;;  %v3404_v0 = vpop.f32.mrf.mxu1 }
 0x67e   : > { %v3316_v41 = vadd.f32 %v3315_v14, %v8150_v27  ;;  %v3405_v20 = vadd.f32 %v3404_v0, %v8152_v45 }
 0x67f   : > { %v3741_v7 = vpop.f32.mrf.mxu2  ;;  %v3830_v16 = vpop.f32.mrf.mxu3 }
 0x680   : > { %v3742_v22 = vadd.f32 %v3741_v7, %v8264_v51  ;;  %3923 = vmatmul.bf16.gmra.mxu0 %v8200_v1  ;;  %4012 = vmatmul.bf16.gmra.mxu1 %v8202_v48  ;;  %v3473_v2 = vmax.f32 %v3316_v41, 0.0  ;;  %v3474_v8 = vmax.f32 %v3405_v20, 0.0 }
 0x682   : > { %v3831_v49 = vadd.f32 %v3830_v16, %v3742_v22  ;;  %v5471_v22 = vld [vmem:[#allocation16] sm:$0xff] }
 0x683   : > { %4309 = vmatpush.bf16.msrb.mxu2 %v5471_v22 }
 0x684   : > { %v4086_v62 = vmax.f32 %v3831_v49, 0.0 }
 0x685   : > { %v3317_v3 = vpop.f32.mrf.mxu0  ;;  %v3406_v46 = vpop.f32.mrf.mxu1 }
 0x686   : > { %v3318_v54 = vadd.f32 %v3317_v3, %v8150_v27  ;;  %v3407_v39 = vadd.f32 %v3406_v46, %v8152_v45 }
 0x687   : > { %v3743_v4 = vpop.f32.mrf.mxu2  ;;  %v3832_v19 = vpop.f32.mrf.mxu3 }
 0x688   : > { %v3475_v1 = vmax.f32 %v3318_v54, 0.0  ;;  %v3476_v42 = vmax.f32 %v3407_v39, 0.0  ;;  %v3744_v48 = vadd.f32 %v3743_v4, %v8264_v51  ;;  %v5479_v54 = vld [vmem:[#allocation16 + $0x40] sm:$0xff] }
 0x689   : > { %4398 = vmatpush.bf16.msrb.mxu3 %v5479_v54 }
 0x68a   : > { %v3833_v52 = vadd.f32 %v3832_v19, %v3744_v48  ;;  %v8314_v12 = vpack.c.bf16 %v3475_v1, %v3473_v2  ;;  %v8316_v25 = vpack.c.bf16 %v3476_v42, %v3474_v8 }
 0x68c   : > { %v4088_v31 = vmax.f32 %v3833_v52, 0.0  ;;  %3785 = vmatmul.bf16.gmra.mxu2 %v8314_v12  ;;  %3874 = vmatmul.bf16.gmra.mxu3 %v8316_v25 }
 0x68d   : > { %v3320_v21 = vpop.f32.mrf.mxu0  ;;  %v3409_v40 = vpop.f32.mrf.mxu1 }
 0x68e   : > { %v8320_v44 = vpack.c.bf16 %v4088_v31, %v4086_v62  ;;  %v3321_v36 = vadd.f32 %v3320_v21, %v8150_v27  ;;  %v3410_v57 = vadd.f32 %v3409_v40, %v8152_v45 }
 0x68f   : > { %v3746_v9 = vpop.f32.mrf.mxu2  ;;  %v3835_v32 = vpop.f32.mrf.mxu3 }
 0x690   : > { %v3747_v60 = vadd.f32 %v3746_v9, %v8264_v51  ;;  %3928 = vmatmul.bf16.gmra.mxu0 %v8213_v30  ;;  %4017 = vmatmul.bf16.gmra.mxu1 %v8215_v34  ;;  %v3477_v33 = vmax.f32 %v3321_v36, 0.0  ;;  %v3478_v35 = vmax.f32 %v3410_v57, 0.0 }
 0x692   : > { %v3836_v37 = vadd.f32 %v3835_v32, %v3747_v60 }
 0x694   : > { %v4090_v7 = vmax.f32 %v3836_v37, 0.0 }
 0x695   : > { %v3322_v29 = vpop.f32.mrf.mxu0  ;;  %v3411_v43 = vpop.f32.mrf.mxu1 }
 0x696   : > { %v3323_v38 = vadd.f32 %v3322_v29, %v8150_v27  ;;  %v3412_v55 = vadd.f32 %v3411_v43, %v8152_v45 }
 0x697   : > { %v3748_v61 = vpop.f32.mrf.mxu2  ;;  %v3837_v28 = vpop.f32.mrf.mxu3 }
 0x698   : > { %v3479_v6 = vmax.f32 %v3323_v38, 0.0  ;;  %v3480_v23 = vmax.f32 %v3412_v55, 0.0  ;;  %v3749_v30 = vadd.f32 %v3748_v61, %v8264_v51 }
 0x69a   : > { %v3838_v34 = vadd.f32 %v3837_v28, %v3749_v30  ;;  %v8330_v14 = vpack.c.bf16 %v3479_v6, %v3477_v33  ;;  %v8332_v0 = vpack.c.bf16 %v3480_v23, %v3478_v35 }
 0x69c   : > { %v4092_v16 = vmax.f32 %v3838_v34, 0.0  ;;  %3790 = vmatmul.bf16.gmra.mxu2 %v8330_v14  ;;  %3879 = vmatmul.bf16.gmra.mxu3 %v8332_v0 }
 0x69d   : > { %v3325_v5 = vpop.f32.mrf.mxu0  ;;  %v3414_v49 = vpop.f32.mrf.mxu1 }
 0x69e   : > { %v8336_v41 = vpack.c.bf16 %v4092_v16, %v4090_v7  ;;  %v3326_v2 = vadd.f32 %v3325_v5, %v8150_v27  ;;  %v3415_v4 = vadd.f32 %v3414_v49, %v8152_v45 }
 0x69f   : > { %v3751_v20 = vpop.f32.mrf.mxu2  ;;  %v3840_v3 = vpop.f32.mrf.mxu3 }
 0x6a0   : > { %v3752_v46 = vadd.f32 %v3751_v20, %v8264_v51  ;;  %3933 = vmatmul.bf16.gmra.mxu0 %v8226_v10  ;;  %4022 = vmatmul.bf16.gmra.mxu1 %v8228_v17  ;;  %v3481_v48 = vmax.f32 %v3326_v2, 0.0  ;;  %v3482_v31 = vmax.f32 %v3415_v4, 0.0 }
 0x6a2   : > { %v3841_v39 = vadd.f32 %v3840_v3, %v3752_v46 }
 0x6a4   : > { %v4094_v60 = vmax.f32 %v3841_v39, 0.0 }
 0x6a5   : > { %v3327_v19 = vpop.f32.mrf.mxu0  ;;  %v3416_v8 = vpop.f32.mrf.mxu1 }
 0x6a6   : > { %v3328_v1 = vadd.f32 %v3327_v19, %v8150_v27  ;;  %v3417_v42 = vadd.f32 %v3416_v8, %v8152_v45 }
 0x6a7   : > { %v3753_v52 = vpop.f32.mrf.mxu2  ;;  %v3842_v62 = vpop.f32.mrf.mxu3 }
 0x6a8   : > { %v3483_v10 = vmax.f32 %v3328_v1, 0.0  ;;  %v3484_v21 = vmax.f32 %v3417_v42, 0.0  ;;  %v3754_v17 = vadd.f32 %v3753_v52, %v8264_v51 }
 0x6aa   : > { %v3843_v40 = vadd.f32 %v3842_v62, %v3754_v17  ;;  %v8346_v9 = vpack.c.bf16 %v3483_v10, %v3481_v48  ;;  %v8348_v32 = vpack.c.bf16 %v3484_v21, %v3482_v31 }
 0x6ac   : > { %v4096_v37 = vmax.f32 %v3843_v40, 0.0  ;;  %3795 = vmatmul.bf16.gmra.mxu2 %v8346_v9  ;;  %3884 = vmatmul.bf16.gmra.mxu3 %v8348_v32 }
 0x6ad   : > { %v3330_v36 = vpop.f32.mrf.mxu0  ;;  %v3419_v57 = vpop.f32.mrf.mxu1 }
 0x6ae   : > { %v8352_v29 = vpack.c.bf16 %v4096_v37, %v4094_v60  ;;  %v3331_v61 = vadd.f32 %v3330_v36, %v8150_v27  ;;  %v3420_v28 = vadd.f32 %v3419_v57, %v8152_v45 }
 0x6af   : > { %v3756_v43 = vpop.f32.mrf.mxu2  ;;  %v3845_v38 = vpop.f32.mrf.mxu3 }
 0x6b0   : > { %v3757_v55 = vadd.f32 %v3756_v43, %v8264_v51  ;;  %3938 = vmatmul.bf16.gmra.mxu0 %v8239_v13  ;;  %4027 = vmatmul.bf16.gmra.mxu1 %v8241_v58  ;;  %v3485_v34 = vmax.f32 %v3331_v61, 0.0  ;;  %v3486_v22 = vmax.f32 %v3420_v28, 0.0  ;;  %v8385_v61 = vperm.slane %v8259_v15, 1 }
 0x6b2   : > { %v3846_v33 = vadd.f32 %v3845_v38, %v3757_v55 }
 0x6b4   : > { %v4098_v46 = vmax.f32 %v3846_v33, 0.0 }
 0x6b5   : > { %v3332_v35 = vpop.f32.mrf.mxu0  ;;  %v3421_v6 = vpop.f32.mrf.mxu1 }
 0x6b6   : > { %v3333_v23 = vadd.f32 %v3332_v35, %v8150_v27  ;;  %v3422_v30 = vadd.f32 %v3421_v6, %v8152_v45 }
 0x6b7   : > { %v3758_v7 = vpop.f32.mrf.mxu2  ;;  %v3847_v16 = vpop.f32.mrf.mxu3 }
 0x6b8   : > { %v3487_v5 = vmax.f32 %v3333_v23, 0.0  ;;  %v3488_v49 = vmax.f32 %v3422_v30, 0.0  ;;  %v3759_v13 = vadd.f32 %v3758_v7, %v8264_v51 }
 0x6ba   : > { %v3848_v58 = vadd.f32 %v3847_v16, %v3759_v13  ;;  %v8362_v20 = vpack.c.bf16 %v3487_v5, %v3485_v34  ;;  %v8364_v3 = vpack.c.bf16 %v3488_v49, %v3486_v22 }
 0x6bc   : > { %v4100_v54 = vmax.f32 %v3848_v58, 0.0  ;;  %3800 = vmatmul.bf16.gmra.mxu2 %v8362_v20  ;;  %3889 = vmatmul.bf16.gmra.mxu3 %v8364_v3 }
 0x6bd   : > { %v3335_v39 = vpop.f32.mrf.mxu0  ;;  %v3424_v2 = vpop.f32.mrf.mxu1 }
 0x6be   : > { %v8368_v4 = vpack.c.bf16 %v4100_v54, %v4098_v46  ;;  %v3336_v48 = vadd.f32 %v3335_v39, %v8150_v27  ;;  %v3425_v52 = vadd.f32 %v3424_v2, %v8152_v45 }
 0x6bf   : > { %v3761_v19 = vpop.f32.mrf.mxu2  ;;  %v3850_v8 = vpop.f32.mrf.mxu3 }
 0x6c0   : > { %v3762_v1 = vadd.f32 %v3761_v19, %v8264_v51  ;;  %3943 = vmatmul.bf16.gmra.mxu0 %v8251_v24  ;;  %4032 = vmatmul.bf16.gmra.mxu1 %v8253_v18  ;;  %v3489_v17 = vmax.f32 %v3336_v48, 0.0  ;;  %v3490_v37 = vmax.f32 %v3425_v52, 0.0 }
 0x6c2   : > { %v3851_v42 = vadd.f32 %v3850_v8, %v3762_v1 }
 0x6c4   : > { %v4102_v55 = vmax.f32 %v3851_v42, 0.0 }
 0x6c5   : > { %v3337_v62 = vpop.f32.mrf.mxu0  ;;  %v3426_v31 = vpop.f32.mrf.mxu1 }
 0x6c6   : > { %v3338_v10 = vadd.f32 %v3337_v62, %v8150_v27  ;;  %v3427_v21 = vadd.f32 %v3426_v31, %v8152_v45 }
 0x6c7   : > { %v3763_v40 = vpop.f32.mrf.mxu2  ;;  %v3852_v60 = vpop.f32.mrf.mxu3 }
 0x6c8   : > { %v3491_v36 = vmax.f32 %v3338_v10, 0.0  ;;  %v3492_v57 = vmax.f32 %v3427_v21, 0.0  ;;  %v3764_v24 = vadd.f32 %v3763_v40, %v8264_v51 }
 0x6ca   : > { %v3853_v18 = vadd.f32 %v3852_v60, %v3764_v24  ;;  %v8378_v43 = vpack.c.bf16 %v3491_v36, %v3489_v17  ;;  %v8380_v38 = vpack.c.bf16 %v3492_v57, %v3490_v37 }
 0x6cc   : > { %v4104_v33 = vmax.f32 %v3853_v18, 0.0  ;;  %3805 = vmatmul.bf16.gmra.mxu2 %v8378_v43  ;;  %3894 = vmatmul.bf16.gmra.mxu3 %v8380_v38 }
 0x6cd   : > { %v3909_v27 = vpop.f32.mrf.mxu0  ;;  %v3998_v45 = vpop.f32.mrf.mxu1 }
 0x6ce   : > { %v8387_v28 = vpack.c.bf16 %v4104_v33, %v4102_v55  ;;  %v3910_v30 = vadd.f32 %v3909_v27, %v8385_v61 }
 0x6cf   : > { %v3766_v35 = vpop.f32.mrf.mxu2  ;;  %v3855_v6 = vpop.f32.mrf.mxu3 }
 0x6d0   : > { %v3767_v23 = vadd.f32 %v3766_v35, %v8264_v51  ;;  %3948 = vmatmul.bf16.gmra.mxu0 %v8269_v11  ;;  %4037 = vmatmul.bf16.gmra.mxu1 %v8271_v50  ;;  %v3999_v22 = vadd.f32 %v3998_v45, %v3910_v30 }
 0x6d2   : > { %v3856_v34 = vadd.f32 %v3855_v6, %v3767_v23  ;;  %v4079_v46 = vmax.f32 %v3999_v22, 0.0 }
 0x6d4   : > { %v4106_v2 = vmax.f32 %v3856_v34, 0.0 }
 0x6d5   : > { %v3911_v7 = vpop.f32.mrf.mxu0  ;;  %v4000_v16 = vpop.f32.mrf.mxu1 }
 0x6d6   : > { %v3912_v5 = vadd.f32 %v3911_v7, %v8385_v61 }
 0x6d7   : > { %v3768_v15 = vpop.f32.mrf.mxu2  ;;  %v3857_v49 = vpop.f32.mrf.mxu3 }
 0x6d8   : > { %v4001_v13 = vadd.f32 %v4000_v16, %v3912_v5  ;;  %v3769_v58 = vadd.f32 %v3768_v15, %v8264_v51 }
 0x6da   : > { %v4081_v54 = vmax.f32 %v4001_v13, 0.0  ;;  %v3858_v39 = vadd.f32 %v3857_v49, %v3769_v58 }
 0x6dc   : > { %v4143_v11 = vpack.c.bf16 %v4081_v54, %v4079_v46  ;;  %v4108_v19 = vmax.f32 %v3858_v39, 0.0  ;;  %4310 = vmatmul.bf16.vlgmr.msrb.gmra.mxu2 %v8282_v26 }
 0x6dd   : > { %v3914_v50 = vpop.f32.mrf.mxu0  ;;  %v4003_v8 = vpop.f32.mrf.mxu1 }
 0x6de   : > { %4399 = vmatmul.bf16.vlgmr.msrb.gmra.mxu3 %v4143_v11  ;;  %v8396_v1 = vpack.c.bf16 %v4108_v19, %v4106_v2  ;;  %v3915_v62 = vadd.f32 %v3914_v50, %v8385_v61 }
 0x6df   : > { %v3771_v42 = vpop.f32.mrf.mxu2  ;;  %v3860_v48 = vpop.f32.mrf.mxu3 }
 0x6e0   : > { %v3772_v52 = vadd.f32 %v3771_v42, %v8264_v51  ;;  %3953 = vmatmul.bf16.gmra.mxu0 %v8285_v56  ;;  %4042 = vmatmul.bf16.gmra.mxu1 %v8287_v63  ;;  %v4004_v17 = vadd.f32 %v4003_v8, %v3915_v62 }
 0x6e2   : > { %v3861_v31 = vadd.f32 %v3860_v48, %v3772_v52  ;;  %v4083_v57 = vmax.f32 %v4004_v17, 0.0 }
 0x6e4   : > { %v4110_v55 = vmax.f32 %v3861_v31, 0.0 }
 0x6e5   : > { %v3916_v10 = vpop.f32.mrf.mxu0  ;;  %v4005_v21 = vpop.f32.mrf.mxu1 }
 0x6e6   : > { %v3917_v26 = vadd.f32 %v3916_v10, %v8385_v61 }
 0x6e7   : > { %v3773_v40 = vpop.f32.mrf.mxu2  ;;  %v3862_v60 = vpop.f32.mrf.mxu3 }
 0x6e8   : > { %v4006_v37 = vadd.f32 %v4005_v21, %v3917_v26  ;;  %v3774_v36 = vadd.f32 %v3773_v40, %v8264_v51 }
 0x6ea   : > { %v4085_v24 = vmax.f32 %v4006_v37, 0.0  ;;  %v3863_v18 = vadd.f32 %v3862_v60, %v3774_v36 }
 0x6ec   : > { %v4112_v56 = vmax.f32 %v3863_v18, 0.0  ;;  %4315 = vmatmul.bf16.gmra.mxu2 %v8298_v53  ;;  %v4145_v63 = vpack.c.bf16 %v4085_v24, %v4083_v57 }
 0x6ed   : > { %v3919_v33 = vpop.f32.mrf.mxu0  ;;  %v4008_v27 = vpop.f32.mrf.mxu1 }
 0x6ee   : > { %4404 = vmatmul.bf16.gmra.mxu3 %v4145_v63  ;;  %v8405_v45 = vpack.c.bf16 %v4112_v56, %v4110_v55  ;;  %v3920_v30 = vadd.f32 %v3919_v33, %v8385_v61 }
 0x6ef   : > { %v3776_v35 = vpop.f32.mrf.mxu2  ;;  %v3865_v6 = vpop.f32.mrf.mxu3 }
 0x6f0   : > { %v3777_v23 = vadd.f32 %v3776_v35, %v8264_v51  ;;  %3958 = vmatmul.bf16.gmra.mxu0 %v8300_v59  ;;  %4047 = vmatmul.bf16.gmra.mxu1 %v8302_v47  ;;  %v4009_v53 = vadd.f32 %v4008_v27, %v3920_v30 }
 0x6f2   : > { %v3866_v34 = vadd.f32 %v3865_v6, %v3777_v23  ;;  %v4087_v58 = vmax.f32 %v4009_v53, 0.0 }
 0x6f4   : > { %v4114_v39 = vmax.f32 %v3866_v34, 0.0 }
 0x6f5   : > { %v3921_v7 = vpop.f32.mrf.mxu0  ;;  %v4010_v16 = vpop.f32.mrf.mxu1 }
 0x6f6   : > { %v3922_v22 = vadd.f32 %v3921_v7, %v8385_v61 }
 0x6f7   : > { %v3778_v5 = vpop.f32.mrf.mxu2  ;;  %v3867_v15 = vpop.f32.mrf.mxu3 }
 0x6f8   : > { %v4011_v49 = vadd.f32 %v4010_v16, %v3922_v22  ;;  %v3779_v13 = vadd.f32 %v3778_v5, %v8264_v51 }
 0x6fa   : > { %v4089_v46 = vmax.f32 %v4011_v49, 0.0  ;;  %v3868_v54 = vadd.f32 %v3867_v15, %v3779_v13 }
 0x6fc   : > { %v4116_v59 = vmax.f32 %v3868_v54, 0.0  ;;  %4320 = vmatmul.bf16.gmra.mxu2 %v8320_v44  ;;  %v4147_v47 = vpack.c.bf16 %v4089_v46, %v4087_v58 }
 0x6fd   : > { %v3924_v2 = vpop.f32.mrf.mxu0  ;;  %v4013_v11 = vpop.f32.mrf.mxu1 }
 0x6fe   : > { %4409 = vmatmul.bf16.gmra.mxu3 %v4147_v47  ;;  %v8414_v19 = vpack.c.bf16 %v4116_v59, %v4114_v39  ;;  %v3925_v48 = vadd.f32 %v3924_v2, %v8385_v61 }
 0x6ff   : > { %v3781_v50 = vpop.f32.mrf.mxu2  ;;  %v3870_v8 = vpop.f32.mrf.mxu3 }
 0x700   : > { %v3782_v42 = vadd.f32 %v3781_v50, %v8264_v51  ;;  %3963 = vmatmul.bf16.gmra.mxu0 %v8314_v12  ;;  %4052 = vmatmul.bf16.gmra.mxu1 %v8316_v25  ;;  %v4014_v44 = vadd.f32 %v4013_v11, %v3925_v48 }
 0x702   : > { %v3871_v52 = vadd.f32 %v3870_v8, %v3782_v42  ;;  %v4091_v60 = vmax.f32 %v4014_v44, 0.0 }
 0x704   : > { %v4118_v57 = vmax.f32 %v3871_v52, 0.0 }
 0x705   : > { %v3926_v62 = vpop.f32.mrf.mxu0  ;;  %v4015_v31 = vpop.f32.mrf.mxu1 }
 0x706   : > { %v3927_v10 = vadd.f32 %v3926_v62, %v8385_v61 }
 0x707   : > { %v3783_v21 = vpop.f32.mrf.mxu2  ;;  %v3872_v17 = vpop.f32.mrf.mxu3 }
 0x708   : > { %v4016_v26 = vadd.f32 %v4015_v31, %v3927_v10  ;;  %v3784_v40 = vadd.f32 %v3783_v21, %v8264_v51 }
 0x70a   : > { %v4093_v37 = vmax.f32 %v4016_v26, 0.0  ;;  %v3873_v36 = vadd.f32 %v3872_v17, %v3784_v40 }
 0x70c   : > { %v4120_v12 = vmax.f32 %v3873_v36, 0.0  ;;  %4325 = vmatmul.bf16.gmra.mxu2 %v8336_v41  ;;  %v4149_v25 = vpack.c.bf16 %v4093_v37, %v4091_v60 }
 0x70d   : > { %v3929_v24 = vpop.f32.mrf.mxu0  ;;  %v4018_v18 = vpop.f32.mrf.mxu1 }
 0x70e   : > { %4414 = vmatmul.bf16.gmra.mxu3 %v4149_v25  ;;  %v8423_v55 = vpack.c.bf16 %v4120_v12, %v4118_v57  ;;  %v3930_v27 = vadd.f32 %v3929_v24, %v8385_v61 }
 0x70f   : > { %v3786_v56 = vpop.f32.mrf.mxu2  ;;  %v3875_v63 = vpop.f32.mrf.mxu3 }
 0x710   : > { %v3787_v33 = vadd.f32 %v3786_v56, %v8264_v51  ;;  %3968 = vmatmul.bf16.gmra.mxu0 %v8330_v14  ;;  %4057 = vmatmul.bf16.gmra.mxu1 %v8332_v0  ;;  %v4019_v41 = vadd.f32 %v4018_v18, %v3930_v27 }
 0x712   : > { %v3876_v35 = vadd.f32 %v3875_v63, %v3787_v33  ;;  %v4095_v22 = vmax.f32 %v4019_v41, 0.0 }
 0x714   : > { %v4122_v49 = vmax.f32 %v3876_v35, 0.0 }
 0x715   : > { %v3931_v6 = vpop.f32.mrf.mxu0  ;;  %v4020_v23 = vpop.f32.mrf.mxu1 }
 0x716   : > { %v3932_v30 = vadd.f32 %v3931_v6, %v8385_v61 }
 0x717   : > { %v3788_v34 = vpop.f32.mrf.mxu2  ;;  %v3877_v7 = vpop.f32.mrf.mxu3 }
 0x718   : > { %v4021_v16 = vadd.f32 %v4020_v23, %v3932_v30  ;;  %v3789_v53 = vadd.f32 %v3788_v34, %v8264_v51 }
 0x71a   : > { %v4097_v5 = vmax.f32 %v4021_v16, 0.0  ;;  %v3878_v15 = vadd.f32 %v3877_v7, %v3789_v53 }
 0x71c   : > { %v4151_v14 = vpack.c.bf16 %v4097_v5, %v4095_v22  ;;  %v4124_v13 = vmax.f32 %v3878_v15, 0.0  ;;  %4330 = vmatmul.bf16.gmra.mxu2 %v8352_v29 }
 0x71d   : > { %v3934_v0 = vpop.f32.mrf.mxu0  ;;  %v4023_v58 = vpop.f32.mrf.mxu1 }
 0x71e   : > { %4419 = vmatmul.bf16.gmra.mxu3 %v4151_v14  ;;  %v8432_v46 = vpack.c.bf16 %v4124_v13, %v4122_v49  ;;  %v3935_v47 = vadd.f32 %v3934_v0, %v8385_v61 }
 0x71f   : > { %v3791_v54 = vpop.f32.mrf.mxu2  ;;  %v3880_v39 = vpop.f32.mrf.mxu3 }
 0x720   : > { %v3792_v59 = vadd.f32 %v3791_v54, %v8264_v51  ;;  %3973 = vmatmul.bf16.gmra.mxu0 %v8346_v9  ;;  %4062 = vmatmul.bf16.gmra.mxu1 %v8348_v32  ;;  %v4024_v8 = vadd.f32 %v4023_v58, %v3935_v47 }
 0x722   : > { %v3881_v2 = vadd.f32 %v3880_v39, %v3792_v59  ;;  %v4099_v31 = vmax.f32 %v4024_v8, 0.0 }
 0x724   : > { %v4126_v21 = vmax.f32 %v3881_v2, 0.0 }
 0x725   : > { %v3936_v11 = vpop.f32.mrf.mxu0  ;;  %v4025_v50 = vpop.f32.mrf.mxu1 }
 0x726   : > { %v3937_v29 = vadd.f32 %v3936_v11, %v8385_v61 }
 0x727   : > { %v3793_v42 = vpop.f32.mrf.mxu2  ;;  %v3882_v48 = vpop.f32.mrf.mxu3 }
 0x728   : > { %v4026_v52 = vadd.f32 %v4025_v50, %v3937_v29  ;;  %v3794_v62 = vadd.f32 %v3793_v42, %v8264_v51 }
 0x72a   : > { %v4101_v44 = vmax.f32 %v4026_v52, 0.0  ;;  %v3883_v10 = vadd.f32 %v3882_v48, %v3794_v62 }
 0x72c   : > { %v4153_v9 = vpack.c.bf16 %v4101_v44, %v4099_v31  ;;  %v4128_v17 = vmax.f32 %v3883_v10, 0.0  ;;  %4335 = vmatmul.bf16.gmra.mxu2 %v8368_v4 }
 0x72d   : > { %v3939_v32 = vpop.f32.mrf.mxu0  ;;  %v4028_v26 = vpop.f32.mrf.mxu1 }
 0x72e   : > { %4424 = vmatmul.bf16.gmra.mxu3 %v4153_v9  ;;  %v8441_v40 = vpack.c.bf16 %v4128_v17, %v4126_v21  ;;  %v3940_v57 = vadd.f32 %v3939_v32, %v8385_v61 }
 0x72f   : > { %v3796_v60 = vpop.f32.mrf.mxu2  ;;  %v3885_v37 = vpop.f32.mrf.mxu3 }
 0x730   : > { %v3797_v36 = vadd.f32 %v3796_v60, %v8264_v51  ;;  %3978 = vmatmul.bf16.gmra.mxu0 %v8362_v20  ;;  %4067 = vmatmul.bf16.gmra.mxu1 %v8364_v3  ;;  %v4029_v18 = vadd.f32 %v4028_v26, %v3940_v57 }
 0x732   : > { %v3886_v12 = vadd.f32 %v3885_v37, %v3797_v36  ;;  %v4103_v35 = vmax.f32 %v4029_v18, 0.0 }
 0x734   : > { %v4130_v41 = vmax.f32 %v3886_v12, 0.0 }
 0x735   : > { %v3941_v25 = vpop.f32.mrf.mxu0  ;;  %v4030_v24 = vpop.f32.mrf.mxu1 }
 0x736   : > { %v3942_v4 = vadd.f32 %v3941_v25, %v8385_v61 }
 0x737   : > { %v3798_v56 = vpop.f32.mrf.mxu2  ;;  %v3887_v63 = vpop.f32.mrf.mxu3 }
 0x738   : > { %v4031_v33 = vadd.f32 %v4030_v24, %v3942_v4  ;;  %v3799_v27 = vadd.f32 %v3798_v56, %v8264_v51  ;;  %v8466_v4 = vld [vmem:[#allocation7 + $0x7] ss:$0 sm:$0xff] }
 0x73a   : > { %v4105_v6 = vmax.f32 %v4031_v33, 0.0  ;;  %v3888_v23 = vadd.f32 %v3887_v63, %v3799_v27 }
 0x73c   : > { %v4155_v20 = vpack.c.bf16 %v4105_v6, %v4103_v35  ;;  %v4132_v30 = vmax.f32 %v3888_v23, 0.0  ;;  %4340 = vmatmul.bf16.gmra.mxu2 %v8387_v28 }
 0x73d   : > { %v3944_v3 = vpop.f32.mrf.mxu0  ;;  %v4033_v34 = vpop.f32.mrf.mxu1 }
 0x73e   : > { %4429 = vmatmul.bf16.gmra.mxu3 %v4155_v20  ;;  %v8450_v7 = vpack.c.bf16 %v4132_v30, %v4130_v41  ;;  %v3945_v5 = vadd.f32 %v3944_v3, %v8385_v61 }
 0x73f   : > { %v3801_v16 = vpop.f32.mrf.mxu2  ;;  %v3890_v53 = vpop.f32.mrf.mxu3 }
 0x740   : > { %v3802_v22 = vadd.f32 %v3801_v16, %v8264_v51  ;;  %3983 = vmatmul.bf16.gmra.mxu0 %v8378_v43  ;;  %4072 = vmatmul.bf16.gmra.mxu1 %v8380_v38  ;;  %v4034_v13 = vadd.f32 %v4033_v34, %v3945_v5 }
 0x742   : > { %v3891_v15 = vadd.f32 %v3890_v53, %v3802_v22  ;;  %v4107_v59 = vmax.f32 %v4034_v13, 0.0 }
 0x744   : > { %v4134_v11 = vmax.f32 %v3891_v15, 0.0 }
 0x745   : > { %v3946_v49 = vpop.f32.mrf.mxu0  ;;  %v4035_v14 = vpop.f32.mrf.mxu1 }
 0x746   : > { %v3947_v28 = vadd.f32 %v3946_v49, %v8385_v61 }
 0x747   : > { %v3803_v0 = vpop.f32.mrf.mxu2  ;;  %v3892_v58 = vpop.f32.mrf.mxu3 }
 0x748   : > { %v4036_v54 = vadd.f32 %v4035_v14, %v3947_v28  ;;  %v3804_v39 = vadd.f32 %v3803_v0, %v8264_v51 }
 0x74a   : > { %v4109_v47 = vmax.f32 %v4036_v54, 0.0  ;;  %v3893_v2 = vadd.f32 %v3892_v58, %v3804_v39 }
 0x74c   : > { %v4157_v43 = vpack.c.bf16 %v4109_v47, %v4107_v59  ;;  %v4136_v50 = vmax.f32 %v3893_v2, 0.0  ;;  %4345 = vmatmul.bf16.gmra.mxu2 %v8396_v1 }
 0x74d   : > { %v3949_v38 = vpop.f32.mrf.mxu0  ;;  %v4038_v8 = vpop.f32.mrf.mxu1 }
 0x74e   : > { %4434 = vmatmul.bf16.gmra.mxu3 %v4157_v43  ;;  %v8459_v29 = vpack.c.bf16 %v4136_v50, %v4134_v11  ;;  %v3950_v62 = vadd.f32 %v3949_v38, %v8385_v61 }
 0x74f   : > { %v3806_v42 = vpop.f32.mrf.mxu2  ;;  %v3895_v48 = vpop.f32.mrf.mxu3 }
 0x750   : > { %v3807_v52 = vadd.f32 %v3806_v42, %v8264_v51  ;;  %v4039_v21 = vadd.f32 %v4038_v8, %v3950_v62 }
 0x752   : > { %v3896_v31 = vadd.f32 %v3895_v48, %v3807_v52  ;;  %v4111_v60 = vmax.f32 %v4039_v21, 0.0 }
 0x754   : > { %v4138_v57 = vmax.f32 %v3896_v31, 0.0 }
 0x755   : > { %v3951_v44 = vpop.f32.mrf.mxu0  ;;  %v4040_v10 = vpop.f32.mrf.mxu1 }
 0x756   : > { %v3952_v9 = vadd.f32 %v3951_v44, %v8385_v61 }
 0x757   : > { %v3808_v17 = vpop.f32.mrf.mxu2  ;;  %v3897_v26 = vpop.f32.mrf.mxu3 }
 0x758   : > { %v4041_v32 = vadd.f32 %v4040_v10, %v3952_v9  ;;  %v3809_v1 = vadd.f32 %v3808_v17, %v8264_v51 }
 0x75a   : > { %v4113_v37 = vmax.f32 %v4041_v32, 0.0  ;;  %v3898_v36 = vadd.f32 %v3897_v26, %v3809_v1 }
 0x75c   : > { %v4159_v12 = vpack.c.bf16 %v4113_v37, %v4111_v60  ;;  %v4140_v25 = vmax.f32 %v3898_v36, 0.0  ;;  %4350 = vmatmul.bf16.gmra.mxu2 %v8405_v45 }
 0x75d   : > { %v3954_v24 = vpop.f32.mrf.mxu0  ;;  %v4043_v18 = vpop.f32.mrf.mxu1 }
 0x75e   : > { %4439 = vmatmul.bf16.gmra.mxu3 %v4159_v12  ;;  %v8468_v56 = vpack.c.bf16 %v4140_v25, %v4138_v57  ;;  %v3955_v27 = vadd.f32 %v3954_v24, %v8385_v61 }
 0x75f   : > { %v4311_v63 = vpop.f32.mrf.mxu2 }
 0x760   : > { %v4312_v51 = vadd.f32 %v4311_v63, %v8466_v4  ;;  %v4044_v23 = vadd.f32 %v4043_v18, %v3955_v27 }
 0x761   : > { %v4400_v33 = vpop.f32.mrf.mxu3 }
 0x762   : > { %v4401_v35 = vadd.f32 %v4400_v33, %v4312_v51  ;;  %v4115_v16 = vmax.f32 %v4044_v23, 0.0 }
 0x764   : > { %4480 = vst [vmem:[%s8473_s8] sm:$0xff] %v4401_v35 }
 0x765   : > { %v3956_v45 = vpop.f32.mrf.mxu0  ;;  %v4045_v6 = vpop.f32.mrf.mxu1 }
 0x766   : > { %v3957_v41 = vadd.f32 %v3956_v45, %v8385_v61 }
 0x767   : > { %v4313_v20 = vpop.f32.mrf.mxu2 }
 0x768   : > { %v4046_v30 = vadd.f32 %v4045_v6, %v3957_v41  ;;  %v4314_v3 = vadd.f32 %v4313_v20, %v8466_v4 }
 0x769   : > { %v4402_v34 = vpop.f32.mrf.mxu3 }
 0x76a   : > { %v4117_v53 = vmax.f32 %v4046_v30, 0.0  ;;  %v4403_v22 = vadd.f32 %v4402_v34, %v4314_v3 }
 0x76c   : > { %v4161_v5 = vpack.c.bf16 %v4117_v53, %v4115_v16  ;;  %4481 = vst [vmem:[%s8473_s8 + $0x8] sm:$0xff] %v4403_v22  ;;  %4355 = vmatmul.bf16.gmra.mxu2 %v8414_v19 }
 0x76d   : > { %v3959_v15 = vpop.f32.mrf.mxu0  ;;  %v4048_v49 = vpop.f32.mrf.mxu1 }
 0x76e   : > { %4444 = vmatmul.bf16.gmra.mxu3 %v4161_v5  ;;  %v3960_v0 = vadd.f32 %v3959_v15, %v8385_v61 }
 0x76f   : > { %v4316_v14 = vpop.f32.mrf.mxu2 }
 0x770   : > { %v4317_v13 = vadd.f32 %v4316_v14, %v8466_v4  ;;  %v4049_v59 = vadd.f32 %v4048_v49, %v3960_v0 }
 0x771   : > { %v4405_v28 = vpop.f32.mrf.mxu3 }
 0x772   : > { %v4406_v58 = vadd.f32 %v4405_v28, %v4317_v13  ;;  %v4119_v50 = vmax.f32 %v4049_v59, 0.0 }
 0x774   : > { %4482 = vst [vmem:[%s8473_s8 + $0x10] sm:$0xff] %v4406_v58 }
 0x775   : > { %v3961_v54 = vpop.f32.mrf.mxu0  ;;  %v4050_v39 = vpop.f32.mrf.mxu1 }
 0x776   : > { %v3962_v47 = vadd.f32 %v3961_v54, %v8385_v61 }
 0x777   : > { %v4318_v2 = vpop.f32.mrf.mxu2 }
 0x778   : > { %v4051_v11 = vadd.f32 %v4050_v39, %v3962_v47  ;;  %v4319_v19 = vadd.f32 %v4318_v2, %v8466_v4 }
 0x779   : > { %v4407_v43 = vpop.f32.mrf.mxu3 }
 0x77a   : > { %v4121_v38 = vmax.f32 %v4051_v11, 0.0  ;;  %v4408_v8 = vadd.f32 %v4407_v43, %v4319_v19 }
 0x77c   : > { %v4163_v42 = vpack.c.bf16 %v4121_v38, %v4119_v50  ;;  %4483 = vst [vmem:[%s8473_s8 + $0x18] sm:$0xff] %v4408_v8  ;;  %4360 = vmatmul.bf16.gmra.mxu2 %v8423_v55 }
 0x77d   : > { %v3964_v48 = vpop.f32.mrf.mxu0  ;;  %v4053_v52 = vpop.f32.mrf.mxu1 }
 0x77e   : > { %4449 = vmatmul.bf16.gmra.mxu3 %v4163_v42  ;;  %v3965_v10 = vadd.f32 %v3964_v48, %v8385_v61 }
 0x77f   : > { %v4321_v62 = vpop.f32.mrf.mxu2 }
 0x780   : > { %v4322_v31 = vadd.f32 %v4321_v62, %v8466_v4  ;;  %v4054_v32 = vadd.f32 %v4053_v52, %v3965_v10 }
 0x781   : > { %v4410_v44 = vpop.f32.mrf.mxu3 }
 0x782   : > { %v4411_v21 = vadd.f32 %v4410_v44, %v4322_v31  ;;  %v4123_v36 = vmax.f32 %v4054_v32, 0.0 }
 0x784   : > { %4484 = vst [vmem:[%s8473_s8 + $0x20] sm:$0xff] %v4411_v21 }
 0x785   : > { %v3966_v9 = vpop.f32.mrf.mxu0  ;;  %v4055_v17 = vpop.f32.mrf.mxu1 }
 0x786   : > { %v3967_v1 = vadd.f32 %v3966_v9, %v8385_v61 }
 0x787   : > { %v4323_v26 = vpop.f32.mrf.mxu2 }
 0x788   : > { %v4056_v60 = vadd.f32 %v4055_v17, %v3967_v1  ;;  %v4324_v55 = vadd.f32 %v4323_v26, %v8466_v4 }
 0x789   : > { %v4412_v37 = vpop.f32.mrf.mxu3 }
 0x78a   : > { %v4125_v57 = vmax.f32 %v4056_v60, 0.0  ;;  %v4413_v12 = vadd.f32 %v4412_v37, %v4324_v55 }
 0x78c   : > { %v4165_v25 = vpack.c.bf16 %v4125_v57, %v4123_v36  ;;  %4485 = vst [vmem:[%s8473_s8 + $0x28] sm:$0xff] %v4413_v12  ;;  %4365 = vmatmul.bf16.gmra.mxu2 %v8432_v46 }
 0x78d   : > { %v3969_v24 = vpop.f32.mrf.mxu0  ;;  %v4058_v18 = vpop.f32.mrf.mxu1 }
 0x78e   : > { %4454 = vmatmul.bf16.gmra.mxu3 %v4165_v25  ;;  %v3970_v27 = vadd.f32 %v3969_v24, %v8385_v61 }
 0x78f   : > { %v4326_v63 = vpop.f32.mrf.mxu2 }
 0x790   : > { %v4327_v51 = vadd.f32 %v4326_v63, %v8466_v4  ;;  %v4059_v23 = vadd.f32 %v4058_v18, %v3970_v27 }
 0x791   : > { %v4415_v33 = vpop.f32.mrf.mxu3 }
 0x792   : > { %v4416_v35 = vadd.f32 %v4415_v33, %v4327_v51  ;;  %v4127_v34 = vmax.f32 %v4059_v23, 0.0 }
 0x794   : > { %4486 = vst [vmem:[%s8473_s8 + $0x30] sm:$0xff] %v4416_v35 }
 0x795   : > { %v3971_v45 = vpop.f32.mrf.mxu0  ;;  %v4060_v6 = vpop.f32.mrf.mxu1 }
 0x796   : > { %v3972_v41 = vadd.f32 %v3971_v45, %v8385_v61 }
 0x797   : > { %v4328_v20 = vpop.f32.mrf.mxu2 }
 0x798   : > { %v4061_v30 = vadd.f32 %v4060_v6, %v3972_v41  ;;  %v4329_v46 = vadd.f32 %v4328_v20, %v8466_v4 }
 0x799   : > { %v4417_v3 = vpop.f32.mrf.mxu3 }
 0x79a   : > { %v4129_v16 = vmax.f32 %v4061_v30, 0.0  ;;  %v4418_v53 = vadd.f32 %v4417_v3, %v4329_v46 }
 0x79c   : > { %v4167_v22 = vpack.c.bf16 %v4129_v16, %v4127_v34  ;;  %4487 = vst [vmem:[%s8473_s8 + $0x38] sm:$0xff] %v4418_v53  ;;  %4370 = vmatmul.bf16.gmra.mxu2 %v8441_v40 }
 0x79d   : > { %v3974_v5 = vpop.f32.mrf.mxu0  ;;  %v4063_v15 = vpop.f32.mrf.mxu1 }
 0x79e   : > { %4459 = vmatmul.bf16.gmra.mxu3 %v4167_v22  ;;  %v3975_v28 = vadd.f32 %v3974_v5, %v8385_v61 }
 0x79f   : > { %v4331_v49 = vpop.f32.mrf.mxu2 }
 0x7a0   : > { %v4332_v14 = vadd.f32 %v4331_v49, %v8466_v4  ;;  %v4064_v39 = vadd.f32 %v4063_v15, %v3975_v28 }
 0x7a1   : > { %v4420_v13 = vpop.f32.mrf.mxu3 }
 0x7a2   : > { %v4421_v0 = vadd.f32 %v4420_v13, %v4332_v14  ;;  %v4131_v19 = vmax.f32 %v4064_v39, 0.0 }
 0x7a4   : > { %4488 = vst [vmem:[%s8473_s8 + $0x40] sm:$0xff] %v4421_v0 }
 0x7a5   : > { %v3976_v58 = vpop.f32.mrf.mxu0  ;;  %v4065_v54 = vpop.f32.mrf.mxu1 }
 0x7a6   : > { %v3977_v59 = vadd.f32 %v3976_v58, %v8385_v61 }
 0x7a7   : > { %v4333_v47 = vpop.f32.mrf.mxu2 }
 0x7a8   : > { %v4066_v2 = vadd.f32 %v4065_v54, %v3977_v59  ;;  %v4334_v40 = vadd.f32 %v4333_v47, %v8466_v4 }
 0x7a9   : > { %v4422_v11 = vpop.f32.mrf.mxu3 }
 0x7aa   : > { %v4133_v43 = vmax.f32 %v4066_v2, 0.0  ;;  %v4423_v50 = vadd.f32 %v4422_v11, %v4334_v40 }
 0x7ac   : > { %v4169_v38 = vpack.c.bf16 %v4133_v43, %v4131_v19  ;;  %4489 = vst [vmem:[%s8473_s8 + $0x48] sm:$0xff] %v4423_v50  ;;  %4375 = vmatmul.bf16.gmra.mxu2 %v8450_v7 }
 0x7ad   : > { %v3979_v8 = vpop.f32.mrf.mxu0  ;;  %v4068_v42 = vpop.f32.mrf.mxu1 }
 0x7ae   : > { %4464 = vmatmul.bf16.gmra.mxu3 %v4169_v38  ;;  %v3980_v31 = vadd.f32 %v3979_v8, %v8385_v61 }
 0x7af   : > { %v4336_v48 = vpop.f32.mrf.mxu2 }
 0x7b0   : > { %v4337_v52 = vadd.f32 %v4336_v48, %v8466_v4  ;;  %v4069_v9 = vadd.f32 %v4068_v42, %v3980_v31 }
 0x7b1   : > { %v4425_v62 = vpop.f32.mrf.mxu3 }
 0x7b2   : > { %v4426_v44 = vadd.f32 %v4425_v62, %v4337_v52  ;;  %v4135_v60 = vmax.f32 %v4069_v9, 0.0 }
 0x7b4   : > { %4490 = vst [vmem:[%s8473_s8 + $0x50] sm:$0xff] %v4426_v44 }
 0x7b5   : > { %v3981_v10 = vpop.f32.mrf.mxu0  ;;  %v4070_v21 = vpop.f32.mrf.mxu1 }
 0x7b6   : > { %v3982_v17 = vadd.f32 %v3981_v10, %v8385_v61 }
 0x7b7   : > { %v4338_v32 = vpop.f32.mrf.mxu2 }
 0x7b8   : > { %v4071_v1 = vadd.f32 %v4070_v21, %v3982_v17  ;;  %v4339_v7 = vadd.f32 %v4338_v32, %v8466_v4 }
 0x7b9   : > { %v4427_v26 = vpop.f32.mrf.mxu3 }
 0x7ba   : > { %v4137_v55 = vmax.f32 %v4071_v1, 0.0  ;;  %v4428_v37 = vadd.f32 %v4427_v26, %v4339_v7 }
 0x7bc   : > { %v4171_v36 = vpack.c.bf16 %v4137_v55, %v4135_v60  ;;  %4491 = vst [vmem:[%s8473_s8 + $0x58] sm:$0xff] %v4428_v37  ;;  %4380 = vmatmul.bf16.gmra.mxu2 %v8459_v29 }
 0x7bd   : > { %v3984_v57 = vpop.f32.mrf.mxu0  ;;  %v4073_v12 = vpop.f32.mrf.mxu1 }
 0x7be   : > { %4469 = vmatmul.bf16.gmra.mxu3 %v4171_v36  ;;  %v3985_v63 = vadd.f32 %v3984_v57, %v8385_v61 }
 0x7bf   : > { %v4341_v25 = vpop.f32.mrf.mxu2 }
 0x7c0   : > { %v4342_v24 = vadd.f32 %v4341_v25, %v8466_v4  ;;  %v4074_v27 = vadd.f32 %v4073_v12, %v3985_v63 }
 0x7c1   : > { %v4430_v18 = vpop.f32.mrf.mxu3 }
 0x7c2   : > { %v4431_v51 = vadd.f32 %v4430_v18, %v4342_v24  ;;  %v4139_v20 = vmax.f32 %v4074_v27, 0.0 }
 0x7c4   : > { %4492 = vst [vmem:[%s8473_s8 + $0x60] sm:$0xff] %v4431_v51 }
 0x7c5   : > { %v3986_v33 = vpop.f32.mrf.mxu0  ;;  %v4075_v45 = vpop.f32.mrf.mxu1 }
 0x7c6   : > { %v3987_v35 = vadd.f32 %v3986_v33, %v8385_v61 }
 0x7c7   : > { %v4343_v6 = vpop.f32.mrf.mxu2 }
 0x7c8   : > { %v4076_v29 = vadd.f32 %v4075_v45, %v3987_v35  ;;  %v4344_v23 = vadd.f32 %v4343_v6, %v8466_v4 }
 0x7c9   : > { %v4432_v41 = vpop.f32.mrf.mxu3 }
 0x7ca   : > { %v4141_v30 = vmax.f32 %v4076_v29, 0.0  ;;  %v4433_v46 = vadd.f32 %v4432_v41, %v4344_v23 }
 0x7cc   : > { %v4173_v3 = vpack.c.bf16 %v4141_v30, %v4139_v20  ;;  %4493 = vst [vmem:[%s8473_s8 + $0x68] sm:$0xff] %v4433_v46  ;;  %4385 = vmatmul.bf16.gmra.mxu2 %v8468_v56 }
 0x7ce   : > { %4474 = vmatmul.bf16.gmra.mxu3 %v4173_v3 }
 0x7cf   : > { %v4346_v61 = vpop.f32.mrf.mxu2 }
 0x7d0   : > { %v4347_v34 = vadd.f32 %v4346_v61, %v8466_v4 }
 0x7d1   : > { %v4435_v16 = vpop.f32.mrf.mxu3 }
 0x7d2   : > { %v4436_v53 = vadd.f32 %v4435_v16, %v4347_v34 }
 0x7d4   : > { %4494 = vst [vmem:[%s8473_s8 + $0x70] sm:$0xff] %v4436_v53 }
 0x7d7   : > { %v4348_v22 = vpop.f32.mrf.mxu2 }
 0x7d8   : > { %v4349_v5 = vadd.f32 %v4348_v22, %v8466_v4 }
 0x7d9   : > { %v4437_v15 = vpop.f32.mrf.mxu3 }
 0x7da   : > { %v4438_v49 = vadd.f32 %v4437_v15, %v4349_v5 }
 0x7dc   : > { %4495 = vst [vmem:[%s8473_s8 + $0x78] sm:$0xff] %v4438_v49 }
 0x7df   : > { %v4351_v56 = vpop.f32.mrf.mxu2 }
 0x7e0   : > { %v4352_v14 = vadd.f32 %v4351_v56, %v8466_v4 }
 0x7e1   : > { %v4440_v13 = vpop.f32.mrf.mxu3 }
 0x7e2   : > { %v4441_v28 = vadd.f32 %v4440_v13, %v4352_v14 }
 0x7e4   : > { %4496 = vst [vmem:[%s8473_s8 + $0x80] sm:$0xff] %v4441_v28 }
 0x7e5   : > { %6134 = shalt.err (!%p6131_p8)
}
 0x7e6   : > { %s6240_s2 = smov 128   ;;  %s6241_s27 = smov 8  }
 0x7e7   : > { %5601 = dma.vmem_to_hbm [thread:$0]  (%p6415_p0), %s4548_s5, 4096, %s4550_s30, %s4518_s18, %s6240_s2, %s6240_s2, %s6241_s27   ;;  %v4353_v0 = vpop.f32.mrf.mxu2 }
 0x7e8   : > { %v4354_v58 = vadd.f32 %v4353_v0, %v8466_v4  ;;  %s4529_s28 = scalar_lea.hbm %s8626_s9, %s5487_s23  ;;  %s4530_s3 = sshll.u32 %s8473_s8, 4  ;;  %s4531_s3 = int_to_ptr.vmem [resolvable:$true] %s4530_s3 }
 0x7e9   : > { %v4442_v54 = vpop.f32.mrf.mxu3  ;;  %s4532_s6 = sshll.u32 %s4529_s28, 4  ;;  %s4513_s5 = scalar_lea.sflag [#allocation4], %s6478_s25  ;;  %s4533_s6 = int_to_ptr.hbm [resolvable:$true] %s4532_s6 }
 0x7ea   : > { %v4443_v39 = vadd.f32 %v4442_v54, %v4354_v58  ;;  %s6149_s30 = sshra.s32 %s4533_s6, 4  ;;  %s6155_s4 = scalar_lea.hbm %s8626_s9, 512  ;;  %s6150_s30 = int_to_ptr.hbm [resolvable:$true] %s6149_s30 }
 0x7eb   : > { %s6151_s18 = scalar_lea.hbm %s6150_s30, 256  ;;  %p6156_p2 = scmp.lt.s32.totalorder %s6150_s30, %s8626_s9 }
 0x7ec   : > { %4497 = vst [vmem:[%s8473_s8 + $0x88] sm:$0xff] %v4443_v39  ;;  %p6152_p10 = scmp.ne.s32.totalorder %s6150_s30, %s6151_s18  ;;  %p6157_p5 = scmp.lt.s32.totalorder %s6155_s4, %s6151_s18 }
 0x7ee   : > { %p6153_p11 = pnand %p6152_p10, %p6415_p0  ;;  %p6158_p1 = por %p6157_p5, %p6156_p2 }
 0x7ef   : > { %v4356_v59 = vpop.f32.mrf.mxu2 }
 0x7f0   : > { %v4357_v47 = vadd.f32 %v4356_v59, %v8466_v4  ;;  %p6154_p12 = pneg %p6153_p11 }
 0x7f1   : > { %v4445_v2 = vpop.f32.mrf.mxu3 }
 0x7f2   : > { %v4446_v40 = vadd.f32 %v4445_v2, %v4357_v47  ;;  %p6159_p3 = pnand %p6158_p1, %p6154_p12 }
 0x7f4   : > { %4498 = vst [vmem:[%s8473_s8 + $0x90] sm:$0xff] %v4446_v40 }
 0x7f7   : > { %v4358_v11 = vpop.f32.mrf.mxu2 }
 0x7f8   : > { %v4359_v19 = vadd.f32 %v4358_v11, %v8466_v4 }
 0x7f9   : > { %v4447_v43 = vpop.f32.mrf.mxu3 }
 0x7fa   : > { %v4448_v50 = vadd.f32 %v4447_v43, %v4359_v19 }
 0x7fc   : > { %4499 = vst [vmem:[%s8473_s8 + $0x98] sm:$0xff] %v4448_v50 }
 0x7ff   : > { %v4361_v38 = vpop.f32.mrf.mxu2 }
 0x800   : > { %v4362_v8 = vadd.f32 %v4361_v38, %v8466_v4 }
 0x801   : > { %v4450_v42 = vpop.f32.mrf.mxu3 }
 0x802   : > { %v4451_v48 = vadd.f32 %v4450_v42, %v4362_v8 }
 0x804   : > { %4500 = vst [vmem:[%s8473_s8 + $0xa0] sm:$0xff] %v4451_v48 }
 0x807   : > { %v4363_v52 = vpop.f32.mrf.mxu2 }
 0x808   : > { %v4364_v62 = vadd.f32 %v4363_v52, %v8466_v4 }
 0x809   : > { %v4452_v31 = vpop.f32.mrf.mxu3 }
 0x80a   : > { %v4453_v44 = vadd.f32 %v4452_v31, %v4364_v62 }
 0x80c   : > { %4501 = vst [vmem:[%s8473_s8 + $0xa8] sm:$0xff] %v4453_v44 }
 0x80f   : > { %v4366_v10 = vpop.f32.mrf.mxu2 }
 0x810   : > { %v4367_v21 = vadd.f32 %v4366_v10, %v8466_v4 }
 0x811   : > { %v4455_v9 = vpop.f32.mrf.mxu3 }
 0x812   : > { %v4456_v17 = vadd.f32 %v4455_v9, %v4367_v21 }
 0x814   : > { %4502 = vst [vmem:[%s8473_s8 + $0xb0] sm:$0xff] %v4456_v17 }
 0x817   : > { %v4368_v32 = vpop.f32.mrf.mxu2 }
 0x818   : > { %v4369_v1 = vadd.f32 %v4368_v32, %v8466_v4 }
 0x819   : > { %v4457_v7 = vpop.f32.mrf.mxu3 }
 0x81a   : > { %v4458_v26 = vadd.f32 %v4457_v7, %v4369_v1 }
 0x81c   : > { %4503 = vst [vmem:[%s8473_s8 + $0xb8] sm:$0xff] %v4458_v26 }
 0x81f   : > { %v4371_v60 = vpop.f32.mrf.mxu2 }
 0x820   : > { %v4372_v55 = vadd.f32 %v4371_v60, %v8466_v4 }
 0x821   : > { %v4460_v37 = vpop.f32.mrf.mxu3 }
 0x822   : > { %v4461_v36 = vadd.f32 %v4460_v37, %v4372_v55 }
 0x824   : > { %4504 = vst [vmem:[%s8473_s8 + $0xc0] sm:$0xff] %v4461_v36 }
 0x827   : > { %v4373_v57 = vpop.f32.mrf.mxu2 }
 0x828   : > { %v4374_v12 = vadd.f32 %v4373_v57, %v8466_v4 }
 0x829   : > { %v4462_v25 = vpop.f32.mrf.mxu3 }
 0x82a   : > { %v4463_v24 = vadd.f32 %v4462_v25, %v4374_v12 }
 0x82c   : > { %4505 = vst [vmem:[%s8473_s8 + $0xc8] sm:$0xff] %v4463_v24 }
 0x82f   : > { %v4376_v18 = vpop.f32.mrf.mxu2 }
 0x830   : > { %v4377_v63 = vadd.f32 %v4376_v18, %v8466_v4 }
 0x831   : > { %v4465_v51 = vpop.f32.mrf.mxu3 }
 0x832   : > { %v4466_v33 = vadd.f32 %v4465_v51, %v4377_v63 }
 0x834   : > { %4506 = vst [vmem:[%s8473_s8 + $0xd0] sm:$0xff] %v4466_v33 }
 0x837   : > { %v4378_v27 = vpop.f32.mrf.mxu2 }
 0x838   : > { %v4379_v35 = vadd.f32 %v4378_v27, %v8466_v4 }
 0x839   : > { %v4467_v45 = vpop.f32.mrf.mxu3 }
 0x83a   : > { %v4468_v6 = vadd.f32 %v4467_v45, %v4379_v35 }
 0x83c   : > { %4507 = vst [vmem:[%s8473_s8 + $0xd8] sm:$0xff] %v4468_v6 }
 0x83f   : > { %v4381_v29 = vpop.f32.mrf.mxu2 }
 0x840   : > { %v4382_v23 = vadd.f32 %v4381_v29, %v8466_v4 }
 0x841   : > { %v4470_v41 = vpop.f32.mrf.mxu3 }
 0x842   : > { %v4471_v20 = vadd.f32 %v4470_v41, %v4382_v23 }
 0x844   : > { %4508 = vst [vmem:[%s8473_s8 + $0xe0] sm:$0xff] %v4471_v20 }
 0x847   : > { %v4383_v30 = vpop.f32.mrf.mxu2 }
 0x848   : > { %v4384_v46 = vadd.f32 %v4383_v30, %v8466_v4 }
 0x849   : > { %v4472_v3 = vpop.f32.mrf.mxu3 }
 0x84a   : > { %v4473_v61 = vadd.f32 %v4472_v3, %v4384_v46 }
 0x84c   : > { %4509 = vst [vmem:[%s8473_s8 + $0xe8] sm:$0xff] %v4473_v61 }
 0x84f   : > { %v4386_v34 = vpop.f32.mrf.mxu2 }
 0x850   : > { %v4387_v16 = vadd.f32 %v4386_v34, %v8466_v4 }
 0x851   : > { %v4475_v53 = vpop.f32.mrf.mxu3 }
 0x852   : > { %v4476_v22 = vadd.f32 %v4475_v53, %v4387_v16 }
 0x854   : > { %4510 = vst [vmem:[%s8473_s8 + $0xf0] sm:$0xff] %v4476_v22 }
 0x857   : > { %v4388_v5 = vpop.f32.mrf.mxu2 }
 0x858   : > { %v4389_v15 = vadd.f32 %v4388_v5, %v8466_v4 }
 0x859   : > { %v4477_v49 = vpop.f32.mrf.mxu3 }
 0x85a   : > { %v4478_v56 = vadd.f32 %v4477_v49, %v4389_v15 }
 0x85c   : > { %4511 = vst [vmem:[%s8473_s8 + $0xf8] sm:$0xff] %v4478_v56 }
 0x85d   : > { %6162 = shalt.err (!%p6159_p3)
}
 0x85e   : > { %5600 = dma.vmem_to_hbm [thread:$0]  (%p6415_p0), %s4531_s3, 4096, %s4533_s6, %s4513_s5, %s6240_s2, %s6240_s2, %s6241_s27  }
 0x85f PF: > { %s4564_s25 = sand.u32 1, %s6213_s13   ;;  %p8724_p13 = scmp.ge.s32.totalorder %s6225_s16, 2 }
 0x860   : > { %s4565_s8 = scalar_lea.sflag [#allocation4], %s4564_s25 }
 0x861   : > { %p5634_p7 = pnand %p8724_p13, %p6423_p6 }
 0x863   : > { %p5635_p9 = pneg %p5634_p7 }
 0x865   : > { %6204 = dma.done.wait (%p5635_p9), %s4565_s8, 4096  }
 0x866   : > { %6206 = vsyncadd (%p5635_p9), %s4565_s8, 4294963200  ;;  %s4575_s12 = scalar_lea.sflag [#allocation19], %s4564_s25 }
 0x867   : > { %6208 = dma.done.wait (%p5635_p9), %s4575_s12, 4096  }
 0x868   : > { %6210 = vsyncadd (%p5635_p9), %s4575_s12, 4294963200  ;;  %s8725_s17 = sld [smem:[#allocation28_spill]]  ;;  %p33_p0 = scmp.ge.s32.totalorder %s6391_s26, 4  }
 0x869   : > { %s8726_s15 = sld [smem:[#allocation29_spill]]  ;;  %s8727_s13 = smov %s6217_s14 }
 0x86a   : > { %s8729_s16 = smov %s6391_s26  ;;  %35 = sbr.rel (!%p33_p0) target bundleno = 20 (0x14), region = 163 }
 0x86e   : > { %s8728_s14 = smov %s8725_s17 }
 0x86f   :  { %4581 = vsyncpa [#allocation3], 1 }
 0x870   :  { %4583 = vsyncpa [#allocation3 + $0x1], 1 }
 0x871   :  { %4584 = vsyncpa [#allocation6], 1 }
 0x872   :  { %4586 = vsyncpa [#allocation6 + $0x1], 1 }
 0x873   :  { %4587 = vsyncpa [#allocation9], 1 }
 0x874   :  { %4588 = vsyncpa [#allocation12], 1 }
 0x875   :  { %4589 = vsyncpa [#allocation15], 1 }
 0x876   :  { %4590 = vsyncpa [#allocation4], 1 }
 0x877   :  { %4592 = vsyncpa [#allocation4 + $0x1], 1 }
 0x878   :  { %4593 = vsyncpa [#allocation19], 1 }
 0x879   :  { %4595 = vsyncpa [#allocation19 + $0x1], 1 }

</bundles_post_ra>
